<compile_context>
chip_gen: v7x
topology: tpu7x:2x2x1
jax: 0.10.0
libtpu: 0.0.40
codegen_flags: <defaults>
</compile_context>

<pallas_src>
import functools
import math

import jax
import jax.numpy as jnp
from jax import lax
from jax.experimental import pallas as pl
from jax.experimental.pallas import tpu as pltpu

D_MODEL = 32
NHEAD = 4
DIM_FF = 64
NUM_LAYERS = 2
EPS = 1e-5

VEC_ROWS = 17   # packed bias / LayerNorm table rows per layer
VEC_W = 128     # packed table lane width


# ----------------------------------------------------------------------------
# Fused whole-decoder Pallas kernel: grid = (batch, layer)
# ----------------------------------------------------------------------------
def _decoder_kernel(ent_in_ref, trip_in_ref, mem_ref, pos_ref, epos_ref,
                    tpos_ref, sop_ref,
                    w_sa_ref, w_pq_ref, w_po_ref, w_pkv_ref,
                    fe1_ref, fe2_ref, fp1_ref, fp2_ref, vec_ref,
                    out_ref,
                    ent_s, trip_s, memk_s,
                    *, nhead):
    # TODO(synk): tgt_mask / memory_mask / key_padding_mask / dropout paths
    # (all None / eval in RelTR inference) are not implemented.
    layer = pl.program_id(1)
    d = ent_in_ref.shape[-1]
    hd = d // nhead
    nt = trip_in_ref.shape[1]
    f = fe1_ref.shape[-1]
    bf16 = jnp.bfloat16

    # ---- per-batch state init (first layer only) ----
    @pl.when(layer == 0)
    def _():
        ent_s[...] = ent_in_ref[0]
        trip_s[...] = trip_in_ref[0]
        memk_s[...] = mem_ref[0] + pos_ref[0]

    entity = ent_s[...]                  # (Ne, D)   carried across layers
    trip = trip_s[...]                   # (Nt, 2D)  carried across layers
    memory = mem_ref[0]                  # (Sm, D)
    mem_k = memk_s[...]                  # memory + pos, computed once per batch
    epos = epos_ref[0]
    tpos = tpos_ref[0]
    so_s = sop_ref[0]                    # (1, D)
    so_o = sop_ref[1]                    # (1, D)
    vec = vec_ref[0]                     # (VEC_ROWS, 128) f32 bias/LN table

    def mm(x, w):                        # bf16 MXU matmul, f32 accumulate
        return jnp.dot(x.astype(bf16), w, preferred_element_type=jnp.float32)

    def split_heads(x):                  # (n, H*hd) -> (H, n, hd)
        h = x.shape[-1] // hd
        return jnp.stack([x[:, i * hd:(i + 1) * hd] for i in range(h)], axis=0)

    def merge_heads(x):                  # (H, n, hd) -> (n, H*hd)
        return jnp.concatenate([x[i] for i in range(x.shape[0])], axis=-1)

    def attention(qp, kp, vp, exact):
        # batched over heads: one score einsum + one context einsum per MHA
        q3 = split_heads(qp).astype(bf16)
        k3 = split_heads(kp).astype(bf16)
        v3 = split_heads(vp).astype(bf16)
        s = jnp.einsum('hqd,hkd->hqk', q3, k3, preferred_element_type=jnp.float32)
        s = s - jnp.max(s, axis=-1, keepdims=True)
        e = jnp.exp(s)
        den = jnp.sum(e, axis=-1, keepdims=True)
        p = e / den if exact else e * pl.reciprocal(den, approx=True)
        ctx = jnp.einsum('hqk,hkd->hqd', p.astype(bf16), v3,
                         preferred_element_type=jnp.float32)
        return merge_heads(ctx), p

    def mha_single(idx, xq, xk, xv, qk_same=False):
        # slots: 0 = entity self-attn, 1 = entity cross-attn, 2 = coupled so self-attn
        w = w_sa_ref[0, idx]                       # (D, 4D) bf16 [Wq|Wk|Wv|Wo]
        b = vec[idx:idx + 1, :]                    # (1, 128)   [bq|bk|bv|bo]
        if qk_same:                                # q/k share the same input
            qk = mm(xq, w[:, 0:2 * d]) + b[:, 0:2 * d]
            qp, kp = qk[:, 0:d], qk[:, d:2 * d]
        else:
            qp = mm(xq, w[:, 0:d]) + b[:, 0:d]
            kp = mm(xk, w[:, d:2 * d]) + b[:, d:2 * d]
        vp = mm(xv, w[:, 2 * d:3 * d]) + b[:, 2 * d:3 * d]
        ctx, _ = attention(qp, kp, vp, exact=False)
        return mm(ctx, w[:, 3 * d:4 * d]) + b[:, 3 * d:4 * d]

    def mha_pair(pidx, xq_cat, xk, xv, need_maps):
        # subject / object branches batched: lanes [0:D]=sub, [D:2D]=obj.
        # pidx 0: cross-attn to memory (returns maps); pidx 1: attn to entities.
        wq = w_pq_ref[0][:, pidx * 2 * d:(pidx + 1) * 2 * d]   # (2D, 2D) blockdiag
        wo = w_po_ref[0][:, pidx * 2 * d:(pidx + 1) * 2 * d]   # (2D, 2D) blockdiag
        wkv = w_pkv_ref[0, pidx]                               # (D, 4D) [Wk_s|Wk_o|Wv_s|Wv_o]
        b0 = vec[3 + 2 * pidx:4 + 2 * pidx, :]                 # [bq_cat | bk_cat]
        b1 = vec[4 + 2 * pidx:5 + 2 * pidx, :]                 # [bv_cat | bo_cat]
        qp = mm(xq_cat, wq) + b0[:, 0:2 * d]                   # (Nt, 2D)
        kp = mm(xk, wkv[:, 0:2 * d]) + b0[:, 2 * d:4 * d]      # (Nk, 2D)
        vp = mm(xv, wkv[:, 2 * d:4 * d]) + b1[:, 0:2 * d]      # (Nk, 2D)
        ctx, p = attention(qp, kp, vp, exact=need_maps)
        out = mm(ctx, wo) + b1[:, 2 * d:4 * d]
        if need_maps:
            smap = jnp.mean(p[0:nhead], axis=0)                # head-averaged
            omap = jnp.mean(p[nhead:2 * nhead], axis=0)
            return out, smap, omap
        return out

    def norm(y):
        mu = jnp.mean(y, axis=-1, keepdims=True)
        var = jnp.mean(jnp.square(y - mu), axis=-1, keepdims=True)
        return (y - mu) * lax.rsqrt(var + EPS)

    def add_ln_e(i, x, res):                       # entity LayerNorms (rows 10..12)
        row = vec[10 + i:11 + i, :]
        return norm(x + res) * row[:, 0:d] + row[:, d:2 * d]

    def add_ln_p(i, x, res):                       # paired sub/obj LNs (rows 13..16)
        row = vec[13 + i:14 + i, :]
        y = x + res
        yn = jnp.concatenate([norm(y[:, 0:d]), norm(y[:, d:2 * d])], axis=-1)
        return yn * row[:, 0:2 * d] + row[:, 2 * d:4 * d]

    def ffn_entity(x):
        row = vec[7:8, :]
        h = jnp.maximum(mm(x, fe1_ref[0]) + row[:, 0:f], 0.0)
        return mm(h, fe2_ref[0]) + row[:, f:f + d]

    def ffn_pair(x):                               # block-diagonal sub/obj FFN
        h = jnp.maximum(mm(x, fp1_ref[0]) + vec[8:9, 0:2 * f], 0.0)
        return mm(h, fp2_ref[0]) + vec[9:10, 0:2 * d]

    # ---------------- entity branch (DETR-style post-norm) ----------------
    q = entity + epos
    entity = add_ln_e(0, entity, mha_single(0, q, q, entity, qk_same=True))
    entity = add_ln_e(1, entity, mha_single(1, entity + epos, mem_k, memory))
    entity = add_ln_e(2, entity, ffn_entity(entity))

    # ---------------- triplet branch ----------------
    sub = trip[:, 0:d]
    obj = trip[:, d:2 * d]
    tpos_s = tpos + so_s
    tpos_o = tpos + so_o

    # coupled self-attention over the [subject ; object] sequence (2*Nt tokens)
    q_so = jnp.concatenate([sub + tpos_s, obj + tpos_o], axis=0)
    v_so = jnp.concatenate([sub, obj], axis=0)
    t2 = mha_single(2, q_so, q_so, v_so, qk_same=True)
    t2_cat = jnp.concatenate([t2[0:nt], t2[nt:2 * nt]], axis=-1)
    trip = add_ln_p(0, trip, t2_cat)

    # sub/obj cross-attention to memory (returns sub_maps / obj_maps), batched
    q_a = trip + jnp.concatenate([tpos_s, tpos_o], axis=-1)
    a2, smap, omap = mha_pair(0, q_a, mem_k, memory, need_maps=True)
    trip = add_ln_p(1, trip, a2)

    # sub/obj decoupled attention to the (updated) entity representations, batched
    q_b = trip + jnp.concatenate([tpos, tpos], axis=-1)
    b2 = mha_pair(1, q_b, entity + epos, entity, need_maps=False)
    trip = add_ln_p(2, trip, b2)

    # sub/obj FFN (block-diagonal) + final LayerNorm
    trip = add_ln_p(3, trip, ffn_pair(trip))

    # ---------------- carry + single lane-dense packed output ----------------
    ent_s[...] = entity
    trip_s[...] = trip

    n_out = out_ref.shape[2]

    def pad_rows(x):
        if x.shape[0] == n_out:
            return x
        pad = jnp.zeros((n_out - x.shape[0], x.shape[1]), jnp.float32)
        return jnp.concatenate([x, pad], axis=0)

    slab = jnp.concatenate(
        [pad_rows(entity), pad_rows(trip), pad_rows(smap), pad_rows(omap)], axis=-1)
    out_ref[0, 0] = slab.astype(out_ref.dtype)


# ----------------------------------------------------------------------------
# pallas_call wrapper: one call for the whole decoder stack
# ----------------------------------------------------------------------------
def _cost_estimate(B, L, Ne, Nt, Sm, D, F, nhead):
    def mha(nq, nk, nb=1):
        proj = 2 * nb * (nq + 2 * nk) * D * D
        attn = 2 * 2 * nb * nq * nk * D
        outp = 2 * nb * nq * D * D
        return proj + attn + outp, nb * nhead * nq * nk
    fl = tr = 0
    for nq, nk, nb in ((Ne, Ne, 1), (Ne, Sm, 1), (2 * Nt, 2 * Nt, 1),
                       (Nt, Sm, 2), (Nt, Ne, 2)):
        f_, t_ = mha(nq, nk, nb)
        fl += f_
        tr += t_
    fl += 2 * 2 * Ne * D * F + 2 * 2 * 2 * Nt * D * F
    fl *= B * L
    tr *= B * L
    io = 4 * (B * (2 * Ne * D + Nt * 3 * D + 2 * Sm * D)
              + L * B * max(Ne, Nt) * (3 * D + 2 * Sm))
    par = 4 * L * (3 * D * 4 * D + 2 * 2 * D * 4 * D + 2 * D * 4 * D
                   + 2 * D * F + 2 * 2 * D * 2 * F + VEC_ROWS * VEC_W)
    return pl.CostEstimate(flops=int(fl), transcendentals=int(tr),
                           bytes_accessed=int(io + par))


def transformer_decoder(params, entity, triplet, memory, pos,
                        entity_pos, triplet_pos, so_pos,
                        return_intermediate=True):
    B, Ne, D = entity.shape
    Nt = triplet.shape[1]
    Sm = memory.shape[1]
    L = params['w_sa'].shape[0]
    F = params['fe1'].shape[-1]
    N = max(Ne, Nt)
    W = 3 * D + 2 * Sm

    batch3 = lambda b, l: (b, 0, 0)
    layer3 = lambda b, l: (l, 0, 0)
    layer4 = lambda b, l: (l, 0, 0, 0)

    slab = pl.pallas_call(
        functools.partial(_decoder_kernel, nhead=NHEAD),
        grid=(B, L),
        out_shape=jax.ShapeDtypeStruct((L, B, N, W), jnp.float32),
        in_specs=[
            pl.BlockSpec((1, Ne, D), batch3),                 # entity
            pl.BlockSpec((1, Nt, 2 * D), batch3),             # triplet
            pl.BlockSpec((1, Sm, D), batch3),                 # memory
            pl.BlockSpec((1, Sm, D), batch3),                 # pos
            pl.BlockSpec((1, Ne, D), batch3),                 # entity_pos
            pl.BlockSpec((1, Nt, D), batch3),                 # triplet_pos
            pl.BlockSpec((2, 1, D), lambda b, l: (0, 0, 0)),  # so_pos
            pl.BlockSpec((1, 3, D, 4 * D), layer4),           # single-MHA weights
            pl.BlockSpec((1, 2 * D, 4 * D), layer3),          # pair Q block-diags
            pl.BlockSpec((1, 2 * D, 4 * D), layer3),          # pair out block-diags
            pl.BlockSpec((1, 2, D, 4 * D), layer4),           # pair K/V weights
            pl.BlockSpec((1, D, F), layer3),                  # entity FFN W1
            pl.BlockSpec((1, F, D), layer3),                  # entity FFN W2
            pl.BlockSpec((1, 2 * D, 2 * F), layer3),          # pair FFN W1 (blockdiag)
            pl.BlockSpec((1, 2 * F, 2 * D), layer3),          # pair FFN W2 (blockdiag)
            pl.BlockSpec((1, VEC_ROWS, VEC_W), layer3),       # bias / LN table
        ],
        out_specs=pl.BlockSpec((1, 1, N, W), lambda b, l: (l, b, 0, 0)),
        scratch_shapes=[pltpu.VMEM((Ne, D), jnp.float32),       # entity carry
                        pltpu.VMEM((Nt, 2 * D), jnp.float32),   # triplet carry
                        pltpu.VMEM((Sm, D), jnp.float32)],      # memory + pos
        compiler_params=pltpu.CompilerParams(
            dimension_semantics=("parallel", "arbitrary")),
        cost_estimate=_cost_estimate(B, L, Ne, Nt, Sm, D, F, NHEAD),
    )(entity, triplet, memory, pos, entity_pos, triplet_pos, so_pos,
      params['w_sa'], params['w_pq'], params['w_po'], params['w_pkv'],
      params['fe1'], params['fe2'], params['fp1'], params['fp2'], params['vec'])

    hs_e = slab[:, :, :Ne, 0:D]
    hs_t = slab[:, :, :Nt, D:3 * D]
    sub_maps = slab[:, :, :Nt, 3 * D:3 * D + Sm]
    obj_maps = slab[:, :, :Nt, 3 * D + Sm:3 * D + 2 * Sm]
    if return_intermediate:
        return hs_e, hs_t, sub_maps, obj_maps
    return None  # matches PyTorch: no return value when not collecting intermediates


# ----------------------------------------------------------------------------
# Deterministic synthetic parameters, packed host-side
# (pre-transposed for x @ W, Q-scale folded, block-diagonal sub/obj packing,
#  all vectors collapsed into one (L, 17, 128) table, weights cast to bf16)
# ----------------------------------------------------------------------------
def init_params(key, num_layers, d, f, nhead):
    hd = d // nhead
    qs = 1.0 / math.sqrt(hd)
    s_d = 1.0 / math.sqrt(d)
    s_f = 1.0 / math.sqrt(f)
    assert 4 * d <= VEC_W and 2 * f <= VEC_W and d + f <= VEC_W

    def u(k, shape, s):
        return jax.random.uniform(k, shape, jnp.float32, -s, s)

    def blkdiag(a, b):
        r1, c1 = a.shape
        r2, c2 = b.shape
        top = jnp.concatenate([a, jnp.zeros((r1, c2), jnp.float32)], axis=1)
        bot = jnp.concatenate([jnp.zeros((r2, c1), jnp.float32), b], axis=1)
        return jnp.concatenate([top, bot], axis=0)

    def row(parts):
        v = jnp.concatenate(parts)
        return jnp.pad(v, (0, VEC_W - v.shape[0]))

    acc = {k: [] for k in
           ('w_sa', 'w_pq', 'w_po', 'w_pkv', 'fe1', 'fe2', 'fp1', 'fp2', 'vec')}

    for lk in jax.random.split(key, num_layers):
        ks = jax.random.split(lk, 10)
        # 7 MHA modules (x @ W orientation):
        #   0 ent-self, 1 ent-cross, 2 so-self, 3 sub-mem, 4 sub-ent, 5 obj-mem, 6 obj-ent
        mw, mb = [], []
        for i in range(7):
            kk = jax.random.split(ks[i], 8)
            w = [u(kk[j], (d, d), s_d) for j in range(4)]       # Wq, Wk, Wv, Wo
            b = [u(kk[4 + j], (d,), s_d) for j in range(4)]     # bq, bk, bv, bo
            w[0] = w[0] * qs                                    # fold softmax scale into Q
            b[0] = b[0] * qs
            mw.append(w)
            mb.append(b)
        # 3 FFNs: 0 entity, 1 subject, 2 object
        fw, fb = [], []
        for i in range(3):
            kk = jax.random.split(ks[7 + i], 4)
            fw.append((u(kk[0], (d, f), s_d), u(kk[2], (f, d), s_f)))
            fb.append((u(kk[1], (f,), s_d), u(kk[3], (d,), s_f)))
        # 11 LayerNorms (identity init, like nn.LayerNorm)
        ln_g = [jnp.ones((d,), jnp.float32)] * 11
        ln_b = [jnp.zeros((d,), jnp.float32)] * 11

        pairs = [(3, 5), (4, 6)]         # (subject slot, object slot)
        acc['w_sa'].append(jnp.stack(
            [jnp.concatenate(mw[i], axis=1) for i in (0, 1, 2)], axis=0))
        acc['w_pq'].append(jnp.concatenate(
            [blkdiag(mw[s][0], mw[o][0]) for s, o in pairs], axis=1))
        acc['w_po'].append(jnp.concatenate(
            [blkdiag(mw[s][3], mw[o][3]) for s, o in pairs], axis=1))
        acc['w_pkv'].append(jnp.stack(
            [jnp.concatenate([mw[s][1], mw[o][1], mw[s][2], mw[o][2]], axis=1)
             for s, o in pairs], axis=0))
        acc['fe1'].append(fw[0][0])
        acc['fe2'].append(fw[0][1])
        acc['fp1'].append(blkdiag(fw[1][0], fw[2][0]))
        acc['fp2'].append(blkdiag(fw[1][1], fw[2][1]))

        rows = [row(mb[i]) for i in (0, 1, 2)]                   # rows 0..2
        for s, o in pairs:                                       # rows 3..6
            rows.append(row([mb[s][0], mb[o][0], mb[s][1], mb[o][1]]))
            rows.append(row([mb[s][2], mb[o][2], mb[s][3], mb[o][3]]))
        rows.append(row([fb[0][0], fb[0][1]]))                   # row 7
        rows.append(row([fb[1][0], fb[2][0]]))                   # row 8
        rows.append(row([fb[1][1], fb[2][1]]))                   # row 9
        for i in range(3):                                       # rows 10..12
            rows.append(row([ln_g[i], ln_b[i]]))
        for s, o in ((3, 4), (5, 8), (6, 9), (7, 10)):           # rows 13..16
            rows.append(row([ln_g[s], ln_g[o], ln_b[s], ln_b[o]]))
        acc['vec'].append(jnp.stack(rows, axis=0))               # (17, 128)

    out = {k: jnp.stack(v, axis=0) for k, v in acc.items()}
    for k in ('w_sa', 'w_pq', 'w_po', 'w_pkv', 'fe1', 'fe2', 'fp1', 'fp2'):
        out[k] = out[k].astype(jnp.bfloat16)       # bf16 MXU weights
    return out


# ----------------------------------------------------------------------------
if __name__ == "__main__":
    key = jax.random.PRNGKey(0)
    B, N_ENT, N_TRI, S_MEM = 2, 8, 8, 16           # small shapes; memory = flattened HW

    kx = jax.random.split(key, 8)
    entity      = jax.random.normal(kx[0], (B, N_ENT, D_MODEL), jnp.float32)
    triplet     = jax.random.normal(kx[1], (B, N_TRI, 2 * D_MODEL), jnp.float32)
    memory      = jax.random.normal(kx[2], (B, S_MEM, D_MODEL), jnp.float32)
    pos         = jax.random.normal(kx[3], (B, S_MEM, D_MODEL), jnp.float32)
    entity_pos  = jax.random.normal(kx[4], (B, N_ENT, D_MODEL), jnp.float32)
    triplet_pos = jax.random.normal(kx[5], (B, N_TRI, D_MODEL), jnp.float32)
    so_pos      = jax.random.normal(kx[6], (2, 1, D_MODEL), jnp.float32)

    params = init_params(kx[7], NUM_LAYERS, D_MODEL, DIM_FF, NHEAD)

    fwd = jax.jit(functools.partial(transformer_decoder, return_intermediate=True))
    out = jax.block_until_ready(
        fwd(params, entity, triplet, memory, pos, entity_pos, triplet_pos, so_pos))
    hs_e, hs_t, sub_maps, obj_maps = out

    assert hs_e.shape == (NUM_LAYERS, B, N_ENT, D_MODEL)
    assert hs_t.shape == (NUM_LAYERS, B, N_TRI, 2 * D_MODEL)
    assert sub_maps.shape == (NUM_LAYERS, B, N_TRI, S_MEM)
    assert obj_maps.shape == (NUM_LAYERS, B, N_TRI, S_MEM)
    assert bool(jnp.all(jnp.isfinite(hs_e))) and bool(jnp.all(jnp.isfinite(hs_t)))
    assert bool(jnp.all(jnp.isfinite(sub_maps))) and bool(jnp.all(jnp.isfinite(obj_maps)))
    # attention maps use exact softmax normalization: rows must sum to ~1
    assert bool(jnp.all(jnp.abs(jnp.sum(sub_maps, axis=-1) - 1.0) < 1e-2))
    assert bool(jnp.all(jnp.abs(jnp.sum(obj_maps, axis=-1) - 1.0) < 1e-2))

    print("KERNEL_OK")
</pallas_src>

<mosaic_0001>
module attributes {stable_mosaic.version = 11 : i64} {
  func.func @_decoder_kernel(%arg0: i32, %arg1: i32, %arg2: memref<1x8x32xf32, #tpu.memory_space<vmem>>, %arg3: memref<1x8x64xf32, #tpu.memory_space<vmem>>, %arg4: memref<1x16x32xf32, #tpu.memory_space<vmem>>, %arg5: memref<1x16x32xf32, #tpu.memory_space<vmem>>, %arg6: memref<1x8x32xf32, #tpu.memory_space<vmem>>, %arg7: memref<1x8x32xf32, #tpu.memory_space<vmem>>, %arg8: memref<2x1x32xf32, #tpu.memory_space<vmem>>, %arg9: memref<1x3x32x128xbf16, #tpu.memory_space<vmem>>, %arg10: memref<1x64x128xbf16, #tpu.memory_space<vmem>>, %arg11: memref<1x64x128xbf16, #tpu.memory_space<vmem>>, %arg12: memref<1x2x32x128xbf16, #tpu.memory_space<vmem>>, %arg13: memref<1x32x64xbf16, #tpu.memory_space<vmem>>, %arg14: memref<1x64x32xbf16, #tpu.memory_space<vmem>>, %arg15: memref<1x64x128xbf16, #tpu.memory_space<vmem>>, %arg16: memref<1x128x64xbf16, #tpu.memory_space<vmem>>, %arg17: memref<1x17x128xf32, #tpu.memory_space<vmem>>, %arg18: memref<1x1x8x128xf32, #tpu.memory_space<vmem>>, %arg19: memref<8x32xf32, #tpu.memory_space<vmem>>, %arg20: memref<8x64xf32, #tpu.memory_space<vmem>>, %arg21: memref<16x32xf32, #tpu.memory_space<vmem>>) attributes {dimension_semantics = [#tpu.dimension_semantics<parallel>, #tpu.dimension_semantics<arbitrary>], iteration_bounds = array<i64: 2, 2>, scalar_prefetch = 0 : i64, scratch_operands = 3 : i64, tpu.core_type = #tpu.core_type<tc>, window_params = [{transform_indices = @transform_0, window_bounds = array<i64: 1, 8, 32>}, {transform_indices = @transform_1, window_bounds = array<i64: 1, 8, 64>}, {transform_indices = @transform_2, window_bounds = array<i64: 1, 16, 32>}, {transform_indices = @transform_3, window_bounds = array<i64: 1, 16, 32>}, {transform_indices = @transform_4, window_bounds = array<i64: 1, 8, 32>}, {transform_indices = @transform_5, window_bounds = array<i64: 1, 8, 32>}, {pipeline_mode = #tpu.pipeline_mode<synchronous>, transform_indices = @transform_6, window_bounds = array<i64: 2, 1, 32>}, {transform_indices = @transform_7, window_bounds = array<i64: 1, 3, 32, 128>}, {transform_indices = @transform_8, window_bounds = array<i64: 1, 64, 128>}, {transform_indices = @transform_9, window_bounds = array<i64: 1, 64, 128>}, {transform_indices = @transform_10, window_bounds = array<i64: 1, 2, 32, 128>}, {transform_indices = @transform_11, window_bounds = array<i64: 1, 32, 64>}, {transform_indices = @transform_12, window_bounds = array<i64: 1, 64, 32>}, {transform_indices = @transform_13, window_bounds = array<i64: 1, 64, 128>}, {transform_indices = @transform_14, window_bounds = array<i64: 1, 128, 64>}, {transform_indices = @transform_15, window_bounds = array<i64: 1, 17, 128>}, {transform_indices = @transform_16, window_bounds = array<i64: 1, 1, 8, 128>}]} {
    %c0_i32 = arith.constant 0 : i32
    %0 = arith.cmpi eq, %arg1, %c0_i32 : i32
    %1 = arith.extui %0 : i1 to i32
    %c0_i32_0 = arith.constant 0 : i32
    %2 = arith.cmpi ne, %1, %c0_i32_0 : i32
    scf.if %2 {
      %c0_176 = arith.constant 0 : index
      %c0_177 = arith.constant 0 : index
      %c0_178 = arith.constant 0 : index
      %811 = vector.load %arg2[%c0_176, %c0_177, %c0_178] : memref<1x8x32xf32, #tpu.memory_space<vmem>>, vector<1x8x32xf32>
      %812 = vector.shape_cast %811 : vector<1x8x32xf32> to vector<8x32xf32>
      %c0_179 = arith.constant 0 : index
      %c0_180 = arith.constant 0 : index
      %813 = vector.load %arg19[%c0_179, %c0_180] : memref<8x32xf32, #tpu.memory_space<vmem>>, vector<8x32xf32>
      tpu.vector_store %arg19[%c0_179, %c0_180], %812 {strides = array<i32>} : memref<8x32xf32, #tpu.memory_space<vmem>>, vector<8x32xf32>,
      %c0_181 = arith.constant 0 : index
      %c0_182 = arith.constant 0 : index
      %c0_183 = arith.constant 0 : index
      %814 = vector.load %arg3[%c0_181, %c0_182, %c0_183] : memref<1x8x64xf32, #tpu.memory_space<vmem>>, vector<1x8x64xf32>
      %815 = vector.shape_cast %814 : vector<1x8x64xf32> to vector<8x64xf32>
      %c0_184 = arith.constant 0 : index
      %c0_185 = arith.constant 0 : index
      %816 = vector.load %arg20[%c0_184, %c0_185] : memref<8x64xf32, #tpu.memory_space<vmem>>, vector<8x64xf32>
      tpu.vector_store %arg20[%c0_184, %c0_185], %815 {strides = array<i32>} : memref<8x64xf32, #tpu.memory_space<vmem>>, vector<8x64xf32>,
      %c0_186 = arith.constant 0 : index
      %c0_187 = arith.constant 0 : index
      %c0_188 = arith.constant 0 : index
      %817 = vector.load %arg4[%c0_186, %c0_187, %c0_188] : memref<1x16x32xf32, #tpu.memory_space<vmem>>, vector<1x16x32xf32>
      %818 = vector.shape_cast %817 : vector<1x16x32xf32> to vector<16x32xf32>
      %c0_189 = arith.constant 0 : index
      %c0_190 = arith.constant 0 : index
      %c0_191 = arith.constant 0 : index
      %819 = vector.load %arg5[%c0_189, %c0_190, %c0_191] : memref<1x16x32xf32, #tpu.memory_space<vmem>>, vector<1x16x32xf32>
      %820 = vector.shape_cast %819 : vector<1x16x32xf32> to vector<16x32xf32>
      %821 = arith.addf %818, %820 : vector<16x32xf32>
      %c0_192 = arith.constant 0 : index
      %c0_193 = arith.constant 0 : index
      %822 = vector.load %arg21[%c0_192, %c0_193] : memref<16x32xf32, #tpu.memory_space<vmem>>, vector<16x32xf32>
      tpu.vector_store %arg21[%c0_192, %c0_193], %821 {strides = array<i32>} : memref<16x32xf32, #tpu.memory_space<vmem>>, vector<16x32xf32>,
    } else {
    }
    %c0 = arith.constant 0 : index
    %c0_1 = arith.constant 0 : index
    %3 = vector.load %arg19[%c0, %c0_1] : memref<8x32xf32, #tpu.memory_space<vmem>>, vector<8x32xf32>
    %c0_2 = arith.constant 0 : index
    %c0_3 = arith.constant 0 : index
    %4 = vector.load %arg20[%c0_2, %c0_3] : memref<8x64xf32, #tpu.memory_space<vmem>>, vector<8x64xf32>
    %c0_4 = arith.constant 0 : index
    %c0_5 = arith.constant 0 : index
    %c0_6 = arith.constant 0 : index
    %5 = vector.load %arg4[%c0_4, %c0_5, %c0_6] : memref<1x16x32xf32, #tpu.memory_space<vmem>>, vector<1x16x32xf32>
    %6 = vector.shape_cast %5 : vector<1x16x32xf32> to vector<16x32xf32>
    %c0_7 = arith.constant 0 : index
    %c0_8 = arith.constant 0 : index
    %7 = vector.load %arg21[%c0_7, %c0_8] : memref<16x32xf32, #tpu.memory_space<vmem>>, vector<16x32xf32>
    %c0_9 = arith.constant 0 : index
    %c0_10 = arith.constant 0 : index
    %c0_11 = arith.constant 0 : index
    %8 = vector.load %arg6[%c0_9, %c0_10, %c0_11] : memref<1x8x32xf32, #tpu.memory_space<vmem>>, vector<1x8x32xf32>
    %9 = vector.shape_cast %8 : vector<1x8x32xf32> to vector<8x32xf32>
    %c0_12 = arith.constant 0 : index
    %c0_13 = arith.constant 0 : index
    %c0_14 = arith.constant 0 : index
    %10 = vector.load %arg7[%c0_12, %c0_13, %c0_14] : memref<1x8x32xf32, #tpu.memory_space<vmem>>, vector<1x8x32xf32>
    %11 = vector.shape_cast %10 : vector<1x8x32xf32> to vector<8x32xf32>
    %c0_15 = arith.constant 0 : index
    %c0_16 = arith.constant 0 : index
    %c0_17 = arith.constant 0 : index
    %12 = vector.load %arg8[%c0_15, %c0_16, %c0_17] : memref<2x1x32xf32, #tpu.memory_space<vmem>>, vector<1x1x32xf32>
    %13 = vector.shape_cast %12 : vector<1x1x32xf32> to vector<1x32xf32>
    %c1 = arith.constant 1 : index
    %c0_18 = arith.constant 0 : index
    %c0_19 = arith.constant 0 : index
    %14 = vector.load %arg8[%c1, %c0_18, %c0_19] : memref<2x1x32xf32, #tpu.memory_space<vmem>>, vector<1x1x32xf32>
    %15 = vector.shape_cast %14 : vector<1x1x32xf32> to vector<1x32xf32>
    %c0_20 = arith.constant 0 : index
    %c0_21 = arith.constant 0 : index
    %c0_22 = arith.constant 0 : index
    %16 = vector.load %arg17[%c0_20, %c0_21, %c0_22] : memref<1x17x128xf32, #tpu.memory_space<vmem>>, vector<1x17x128xf32>
    %17 = vector.shape_cast %16 : vector<1x17x128xf32> to vector<17x128xf32>
    %18 = arith.addf %3, %9 : vector<8x32xf32>
    %c0_23 = arith.constant 0 : index
    %c0_24 = arith.constant 0 : index
    %c0_25 = arith.constant 0 : index
    %c0_26 = arith.constant 0 : index
    %19 = vector.load %arg9[%c0_23, %c0_24, %c0_25, %c0_26] : memref<1x3x32x128xbf16, #tpu.memory_space<vmem>>, vector<1x1x32x128xbf16>
    %20 = vector.shape_cast %19 : vector<1x1x32x128xbf16> to vector<32x128xbf16>
    %21 = vector.extract_strided_slice %17 {offsets = [0, 0], sizes = [1, 128], strides = [1, 1]} : vector<17x128xf32> to vector<1x128xf32>
    %22 = vector.extract_strided_slice %20 {offsets = [0, 0], sizes = [32, 64], strides = [1, 1]} : vector<32x128xbf16> to vector<32x64xbf16>
    %23 = arith.truncf %18 : vector<8x32xf32> to vector<8x32xbf16>
    %cst = arith.constant dense<0.000000e+00> : vector<8x64xf32>
    %24 = tpu.matmul %23, %22, %cst {dimension_numbers = #tpu.dot_dimension_numbers<[1], [0], [0], [1], [0, 0, 1, 1], [], []>} : vector<8x32xbf16>, vector<32x64xbf16>, vector<8x64xf32> -> vector<8x64xf32>
    %25 = vector.extract_strided_slice %21 {offsets = [0, 0], sizes = [1, 64], strides = [1, 1]} : vector<1x128xf32> to vector<1x64xf32>
    %26 = vector.broadcast %25 : vector<1x64xf32> to vector<8x64xf32>
    %27 = arith.addf %24, %26 : vector<8x64xf32>
    %28 = vector.extract_strided_slice %27 {offsets = [0, 0], sizes = [8, 32], strides = [1, 1]} : vector<8x64xf32> to vector<8x32xf32>
    %29 = vector.extract_strided_slice %27 {offsets = [0, 32], sizes = [8, 32], strides = [1, 1]} : vector<8x64xf32> to vector<8x32xf32>
    %30 = vector.extract_strided_slice %20 {offsets = [0, 64], sizes = [32, 32], strides = [1, 1]} : vector<32x128xbf16> to vector<32x32xbf16>
    %31 = arith.truncf %3 : vector<8x32xf32> to vector<8x32xbf16>
    %cst_27 = arith.constant dense<0.000000e+00> : vector<8x32xf32>
    %32 = tpu.matmul %31, %30, %cst_27 {dimension_numbers = #tpu.dot_dimension_numbers<[1], [0], [0], [1], [0, 0, 1, 1], [], []>} : vector<8x32xbf16>, vector<32x32xbf16>, vector<8x32xf32> -> vector<8x32xf32>
    %33 = vector.extract_strided_slice %21 {offsets = [0, 64], sizes = [1, 32], strides = [1, 1]} : vector<1x128xf32> to vector<1x32xf32>
    %34 = vector.broadcast %33 : vector<1x32xf32> to vector<8x32xf32>
    %35 = arith.addf %32, %34 : vector<8x32xf32>
    %36 = vector.extract_strided_slice %28 {offsets = [0, 0], sizes = [8, 8], strides = [1, 1]} : vector<8x32xf32> to vector<8x8xf32>
    %37 = vector.extract_strided_slice %28 {offsets = [0, 8], sizes = [8, 8], strides = [1, 1]} : vector<8x32xf32> to vector<8x8xf32>
    %38 = vector.extract_strided_slice %28 {offsets = [0, 16], sizes = [8, 8], strides = [1, 1]} : vector<8x32xf32> to vector<8x8xf32>
    %39 = vector.extract_strided_slice %28 {offsets = [0, 24], sizes = [8, 8], strides = [1, 1]} : vector<8x32xf32> to vector<8x8xf32>
    %40 = vector.shape_cast %36 : vector<8x8xf32> to vector<1x8x8xf32>
    %41 = vector.shape_cast %37 : vector<8x8xf32> to vector<1x8x8xf32>
    %42 = vector.shape_cast %38 : vector<8x8xf32> to vector<1x8x8xf32>
    %43 = vector.shape_cast %39 : vector<8x8xf32> to vector<1x8x8xf32>
    %44 = tpu.concatenate %40, %41, %42, %43 in 0 : vector<1x8x8xf32>, vector<1x8x8xf32>, vector<1x8x8xf32>, vector<1x8x8xf32> -> vector<4x8x8xf32>
    %45 = arith.truncf %44 : vector<4x8x8xf32> to vector<4x8x8xbf16>
    %46 = vector.extract_strided_slice %29 {offsets = [0, 0], sizes = [8, 8], strides = [1, 1]} : vector<8x32xf32> to vector<8x8xf32>
    %47 = vector.extract_strided_slice %29 {offsets = [0, 8], sizes = [8, 8], strides = [1, 1]} : vector<8x32xf32> to vector<8x8xf32>
    %48 = vector.extract_strided_slice %29 {offsets = [0, 16], sizes = [8, 8], strides = [1, 1]} : vector<8x32xf32> to vector<8x8xf32>
    %49 = vector.extract_strided_slice %29 {offsets = [0, 24], sizes = [8, 8], strides = [1, 1]} : vector<8x32xf32> to vector<8x8xf32>
    %50 = vector.shape_cast %46 : vector<8x8xf32> to vector<1x8x8xf32>
    %51 = vector.shape_cast %47 : vector<8x8xf32> to vector<1x8x8xf32>
    %52 = vector.shape_cast %48 : vector<8x8xf32> to vector<1x8x8xf32>
    %53 = vector.shape_cast %49 : vector<8x8xf32> to vector<1x8x8xf32>
    %54 = tpu.concatenate %50, %51, %52, %53 in 0 : vector<1x8x8xf32>, vector<1x8x8xf32>, vector<1x8x8xf32>, vector<1x8x8xf32> -> vector<4x8x8xf32>
    %55 = arith.truncf %54 : vector<4x8x8xf32> to vector<4x8x8xbf16>
    %56 = vector.extract_strided_slice %35 {offsets = [0, 0], sizes = [8, 8], strides = [1, 1]} : vector<8x32xf32> to vector<8x8xf32>
    %57 = vector.extract_strided_slice %35 {offsets = [0, 8], sizes = [8, 8], strides = [1, 1]} : vector<8x32xf32> to vector<8x8xf32>
    %58 = vector.extract_strided_slice %35 {offsets = [0, 16], sizes = [8, 8], strides = [1, 1]} : vector<8x32xf32> to vector<8x8xf32>
    %59 = vector.extract_strided_slice %35 {offsets = [0, 24], sizes = [8, 8], strides = [1, 1]} : vector<8x32xf32> to vector<8x8xf32>
    %60 = vector.shape_cast %56 : vector<8x8xf32> to vector<1x8x8xf32>
    %61 = vector.shape_cast %57 : vector<8x8xf32> to vector<1x8x8xf32>
    %62 = vector.shape_cast %58 : vector<8x8xf32> to vector<1x8x8xf32>
    %63 = vector.shape_cast %59 : vector<8x8xf32> to vector<1x8x8xf32>
    %64 = tpu.concatenate %60, %61, %62, %63 in 0 : vector<1x8x8xf32>, vector<1x8x8xf32>, vector<1x8x8xf32>, vector<1x8x8xf32> -> vector<4x8x8xf32>
    %65 = arith.truncf %64 : vector<4x8x8xf32> to vector<4x8x8xbf16>
    "tpu.trace_start"() <{level = 10 : i32, message = "hqd,hkd->hqk"}> : () -> ()
    %cst_28 = arith.constant dense<0.000000e+00> : vector<4x8x8xf32>
    %66 = tpu.matmul %45, %55, %cst_28 {dimension_numbers = #tpu.dot_dimension_numbers<[2], [2], [1], [1], [0, 0, 0, 1, 1, 1], [0], [0]>} : vector<4x8x8xbf16>, vector<4x8x8xbf16>, vector<4x8x8xf32> -> vector<4x8x8xf32>
    "tpu.trace_stop"() : () -> ()
    %cst_29 = arith.constant dense<0xFF800000> : vector<4x8xf32>
    %67 = vector.multi_reduction <maximumf>, %66, %cst_29 [2] : vector<4x8x8xf32> to vector<4x8xf32>
    %68 = vector.shape_cast %67 : vector<4x8xf32> to vector<4x8x1xf32>
    %69 = vector.broadcast %68 : vector<4x8x1xf32> to vector<4x8x8xf32>
    %70 = arith.subf %66, %69 : vector<4x8x8xf32>
    %71 = math.exp %70 : vector<4x8x8xf32>
    %cst_30 = arith.constant dense<0.000000e+00> : vector<4x8xf32>
    %72 = vector.multi_reduction <add>, %71, %cst_30 [2] : vector<4x8x8xf32> to vector<4x8xf32>
    %73 = vector.shape_cast %72 : vector<4x8xf32> to vector<4x8x1xf32>
    %74 = tpu.reciprocal %73 {approx = true} : vector<4x8x1xf32> -> vector<4x8x1xf32>
    %75 = vector.broadcast %74 : vector<4x8x1xf32> to vector<4x8x8xf32>
    %76 = arith.mulf %71, %75 : vector<4x8x8xf32>
    %77 = arith.truncf %76 : vector<4x8x8xf32> to vector<4x8x8xbf16>
    "tpu.trace_start"() <{level = 10 : i32, message = "hqk,hkd->hqd"}> : () -> ()
    %cst_31 = arith.constant dense<0.000000e+00> : vector<4x8x8xf32>
    %78 = tpu.matmul %77, %65, %cst_31 {dimension_numbers = #tpu.dot_dimension_numbers<[2], [1], [1], [2], [0, 0, 0, 1, 1, 2], [0], [0]>} : vector<4x8x8xbf16>, vector<4x8x8xbf16>, vector<4x8x8xf32> -> vector<4x8x8xf32>
    "tpu.trace_stop"() : () -> ()
    %79 = vector.extract_strided_slice %78 {offsets = [0, 0, 0], sizes = [1, 8, 8], strides = [1, 1, 1]} : vector<4x8x8xf32> to vector<1x8x8xf32>
    %80 = vector.shape_cast %79 : vector<1x8x8xf32> to vector<8x8xf32>
    %81 = vector.extract_strided_slice %78 {offsets = [1, 0, 0], sizes = [1, 8, 8], strides = [1, 1, 1]} : vector<4x8x8xf32> to vector<1x8x8xf32>
    %82 = vector.shape_cast %81 : vector<1x8x8xf32> to vector<8x8xf32>
    %83 = vector.extract_strided_slice %78 {offsets = [2, 0, 0], sizes = [1, 8, 8], strides = [1, 1, 1]} : vector<4x8x8xf32> to vector<1x8x8xf32>
    %84 = vector.shape_cast %83 : vector<1x8x8xf32> to vector<8x8xf32>
    %85 = vector.extract_strided_slice %78 {offsets = [3, 0, 0], sizes = [1, 8, 8], strides = [1, 1, 1]} : vector<4x8x8xf32> to vector<1x8x8xf32>
    %86 = vector.shape_cast %85 : vector<1x8x8xf32> to vector<8x8xf32>
    %87 = tpu.concatenate %80, %82, %84, %86 in 1 : vector<8x8xf32>, vector<8x8xf32>, vector<8x8xf32>, vector<8x8xf32> -> vector<8x32xf32>
    %88 = vector.extract_strided_slice %20 {offsets = [0, 96], sizes = [32, 32], strides = [1, 1]} : vector<32x128xbf16> to vector<32x32xbf16>
    %89 = arith.truncf %87 : vector<8x32xf32> to vector<8x32xbf16>
    %cst_32 = arith.constant dense<0.000000e+00> : vector<8x32xf32>
    %90 = tpu.matmul %89, %88, %cst_32 {dimension_numbers = #tpu.dot_dimension_numbers<[1], [0], [0], [1], [0, 0, 1, 1], [], []>} : vector<8x32xbf16>, vector<32x32xbf16>, vector<8x32xf32> -> vector<8x32xf32>
    %91 = vector.extract_strided_slice %21 {offsets = [0, 96], sizes = [1, 32], strides = [1, 1]} : vector<1x128xf32> to vector<1x32xf32>
    %92 = vector.broadcast %91 : vector<1x32xf32> to vector<8x32xf32>
    %93 = arith.addf %90, %92 : vector<8x32xf32>
    %94 = vector.extract_strided_slice %17 {offsets = [10, 0], sizes = [1, 128], strides = [1, 1]} : vector<17x128xf32> to vector<1x128xf32>
    %95 = arith.addf %3, %93 : vector<8x32xf32>
    %cst_33 = arith.constant dense<0.000000e+00> : vector<8xf32>
    %96 = vector.multi_reduction <add>, %95, %cst_33 [1] : vector<8x32xf32> to vector<8xf32>
    %97 = vector.shape_cast %96 : vector<8xf32> to vector<8x1xf32>
    %cst_34 = arith.constant 3.200000e+01 : f32
    %98 = vector.broadcast %cst_34 : f32 to vector<8x1xf32>
    %99 = arith.divf %97, %98 : vector<8x1xf32>
    %100 = vector.broadcast %99 : vector<8x1xf32> to vector<8x32xf32>
    %101 = arith.subf %95, %100 : vector<8x32xf32>
    %102 = arith.mulf %101, %101 : vector<8x32xf32>
    %cst_35 = arith.constant dense<0.000000e+00> : vector<8xf32>
    %103 = vector.multi_reduction <add>, %102, %cst_35 [1] : vector<8x32xf32> to vector<8xf32>
    %104 = vector.shape_cast %103 : vector<8xf32> to vector<8x1xf32>
    %cst_36 = arith.constant 3.200000e+01 : f32
    %105 = vector.broadcast %cst_36 : f32 to vector<8x1xf32>
    %106 = arith.divf %104, %105 : vector<8x1xf32>
    %107 = vector.broadcast %99 : vector<8x1xf32> to vector<8x32xf32>
    %108 = arith.subf %95, %107 : vector<8x32xf32>
    %cst_37 = arith.constant 9.99999974E-6 : f32
    %109 = vector.broadcast %cst_37 : f32 to vector<8x1xf32>
    %110 = arith.addf %106, %109 : vector<8x1xf32>
    %111 = math.rsqrt %110 : vector<8x1xf32>
    %112 = vector.broadcast %111 : vector<8x1xf32> to vector<8x32xf32>
    %113 = arith.mulf %108, %112 : vector<8x32xf32>
    %114 = vector.extract_strided_slice %94 {offsets = [0, 0], sizes = [1, 32], strides = [1, 1]} : vector<1x128xf32> to vector<1x32xf32>
    %115 = vector.broadcast %114 : vector<1x32xf32> to vector<8x32xf32>
    %116 = arith.mulf %113, %115 : vector<8x32xf32>
    %117 = vector.extract_strided_slice %94 {offsets = [0, 32], sizes = [1, 32], strides = [1, 1]} : vector<1x128xf32> to vector<1x32xf32>
    %118 = vector.broadcast %117 : vector<1x32xf32> to vector<8x32xf32>
    %119 = arith.addf %116, %118 : vector<8x32xf32>
    %120 = arith.addf %119, %9 : vector<8x32xf32>
    %c0_38 = arith.constant 0 : index
    %c1_39 = arith.constant 1 : index
    %c0_40 = arith.constant 0 : index
    %c0_41 = arith.constant 0 : index
    %121 = vector.load %arg9[%c0_38, %c1_39, %c0_40, %c0_41] : memref<1x3x32x128xbf16, #tpu.memory_space<vmem>>, vector<1x1x32x128xbf16>
    %122 = vector.shape_cast %121 : vector<1x1x32x128xbf16> to vector<32x128xbf16>
    %123 = vector.extract_strided_slice %17 {offsets = [1, 0], sizes = [1, 128], strides = [1, 1]} : vector<17x128xf32> to vector<1x128xf32>
    %124 = vector.extract_strided_slice %122 {offsets = [0, 0], sizes = [32, 32], strides = [1, 1]} : vector<32x128xbf16> to vector<32x32xbf16>
    %125 = arith.truncf %120 : vector<8x32xf32> to vector<8x32xbf16>
    %cst_42 = arith.constant dense<0.000000e+00> : vector<8x32xf32>
    %126 = tpu.matmul %125, %124, %cst_42 {dimension_numbers = #tpu.dot_dimension_numbers<[1], [0], [0], [1], [0, 0, 1, 1], [], []>} : vector<8x32xbf16>, vector<32x32xbf16>, vector<8x32xf32> -> vector<8x32xf32>
    %127 = vector.extract_strided_slice %123 {offsets = [0, 0], sizes = [1, 32], strides = [1, 1]} : vector<1x128xf32> to vector<1x32xf32>
    %128 = vector.broadcast %127 : vector<1x32xf32> to vector<8x32xf32>
    %129 = arith.addf %126, %128 : vector<8x32xf32>
    %130 = vector.extract_strided_slice %122 {offsets = [0, 32], sizes = [32, 32], strides = [1, 1]} : vector<32x128xbf16> to vector<32x32xbf16>
    %131 = arith.truncf %7 : vector<16x32xf32> to vector<16x32xbf16>
    %cst_43 = arith.constant dense<0.000000e+00> : vector<16x32xf32>
    %132 = tpu.matmul %131, %130, %cst_43 {dimension_numbers = #tpu.dot_dimension_numbers<[1], [0], [0], [1], [0, 0, 1, 1], [], []>} : vector<16x32xbf16>, vector<32x32xbf16>, vector<16x32xf32> -> vector<16x32xf32>
    %133 = vector.extract_strided_slice %123 {offsets = [0, 32], sizes = [1, 32], strides = [1, 1]} : vector<1x128xf32> to vector<1x32xf32>
    %134 = vector.broadcast %133 : vector<1x32xf32> to vector<16x32xf32>
    %135 = arith.addf %132, %134 : vector<16x32xf32>
    %136 = vector.extract_strided_slice %122 {offsets = [0, 64], sizes = [32, 32], strides = [1, 1]} : vector<32x128xbf16> to vector<32x32xbf16>
    %137 = arith.truncf %6 : vector<16x32xf32> to vector<16x32xbf16>
    %cst_44 = arith.constant dense<0.000000e+00> : vector<16x32xf32>
    %138 = tpu.matmul %137, %136, %cst_44 {dimension_numbers = #tpu.dot_dimension_numbers<[1], [0], [0], [1], [0, 0, 1, 1], [], []>} : vector<16x32xbf16>, vector<32x32xbf16>, vector<16x32xf32> -> vector<16x32xf32>
    %139 = vector.extract_strided_slice %123 {offsets = [0, 64], sizes = [1, 32], strides = [1, 1]} : vector<1x128xf32> to vector<1x32xf32>
    %140 = vector.broadcast %139 : vector<1x32xf32> to vector<16x32xf32>
    %141 = arith.addf %138, %140 : vector<16x32xf32>
    %142 = vector.extract_strided_slice %129 {offsets = [0, 0], sizes = [8, 8], strides = [1, 1]} : vector<8x32xf32> to vector<8x8xf32>
    %143 = vector.extract_strided_slice %129 {offsets = [0, 8], sizes = [8, 8], strides = [1, 1]} : vector<8x32xf32> to vector<8x8xf32>
    %144 = vector.extract_strided_slice %129 {offsets = [0, 16], sizes = [8, 8], strides = [1, 1]} : vector<8x32xf32> to vector<8x8xf32>
    %145 = vector.extract_strided_slice %129 {offsets = [0, 24], sizes = [8, 8], strides = [1, 1]} : vector<8x32xf32> to vector<8x8xf32>
    %146 = vector.shape_cast %142 : vector<8x8xf32> to vector<1x8x8xf32>
    %147 = vector.shape_cast %143 : vector<8x8xf32> to vector<1x8x8xf32>
    %148 = vector.shape_cast %144 : vector<8x8xf32> to vector<1x8x8xf32>
    %149 = vector.shape_cast %145 : vector<8x8xf32> to vector<1x8x8xf32>
    %150 = tpu.concatenate %146, %147, %148, %149 in 0 : vector<1x8x8xf32>, vector<1x8x8xf32>, vector<1x8x8xf32>, vector<1x8x8xf32> -> vector<4x8x8xf32>
    %151 = arith.truncf %150 : vector<4x8x8xf32> to vector<4x8x8xbf16>
    %152 = vector.extract_strided_slice %135 {offsets = [0, 0], sizes = [16, 8], strides = [1, 1]} : vector<16x32xf32> to vector<16x8xf32>
    %153 = vector.extract_strided_slice %135 {offsets = [0, 8], sizes = [16, 8], strides = [1, 1]} : vector<16x32xf32> to vector<16x8xf32>
    %154 = vector.extract_strided_slice %135 {offsets = [0, 16], sizes = [16, 8], strides = [1, 1]} : vector<16x32xf32> to vector<16x8xf32>
    %155 = vector.extract_strided_slice %135 {offsets = [0, 24], sizes = [16, 8], strides = [1, 1]} : vector<16x32xf32> to vector<16x8xf32>
    %156 = vector.shape_cast %152 : vector<16x8xf32> to vector<1x16x8xf32>
    %157 = vector.shape_cast %153 : vector<16x8xf32> to vector<1x16x8xf32>
    %158 = vector.shape_cast %154 : vector<16x8xf32> to vector<1x16x8xf32>
    %159 = vector.shape_cast %155 : vector<16x8xf32> to vector<1x16x8xf32>
    %160 = tpu.concatenate %156, %157, %158, %159 in 0 : vector<1x16x8xf32>, vector<1x16x8xf32>, vector<1x16x8xf32>, vector<1x16x8xf32> -> vector<4x16x8xf32>
    %161 = arith.truncf %160 : vector<4x16x8xf32> to vector<4x16x8xbf16>
    %162 = vector.extract_strided_slice %141 {offsets = [0, 0], sizes = [16, 8], strides = [1, 1]} : vector<16x32xf32> to vector<16x8xf32>
    %163 = vector.extract_strided_slice %141 {offsets = [0, 8], sizes = [16, 8], strides = [1, 1]} : vector<16x32xf32> to vector<16x8xf32>
    %164 = vector.extract_strided_slice %141 {offsets = [0, 16], sizes = [16, 8], strides = [1, 1]} : vector<16x32xf32> to vector<16x8xf32>
    %165 = vector.extract_strided_slice %141 {offsets = [0, 24], sizes = [16, 8], strides = [1, 1]} : vector<16x32xf32> to vector<16x8xf32>
    %166 = vector.shape_cast %162 : vector<16x8xf32> to vector<1x16x8xf32>
    %167 = vector.shape_cast %163 : vector<16x8xf32> to vector<1x16x8xf32>
    %168 = vector.shape_cast %164 : vector<16x8xf32> to vector<1x16x8xf32>
    %169 = vector.shape_cast %165 : vector<16x8xf32> to vector<1x16x8xf32>
    %170 = tpu.concatenate %166, %167, %168, %169 in 0 : vector<1x16x8xf32>, vector<1x16x8xf32>, vector<1x16x8xf32>, vector<1x16x8xf32> -> vector<4x16x8xf32>
    %171 = arith.truncf %170 : vector<4x16x8xf32> to vector<4x16x8xbf16>
    "tpu.trace_start"() <{level = 10 : i32, message = "hqd,hkd->hqk"}> : () -> ()
    %cst_45 = arith.constant dense<0.000000e+00> : vector<4x8x16xf32>
    %172 = tpu.matmul %151, %161, %cst_45 {dimension_numbers = #tpu.dot_dimension_numbers<[2], [2], [1], [1], [0, 0, 0, 1, 1, 1], [0], [0]>} : vector<4x8x8xbf16>, vector<4x16x8xbf16>, vector<4x8x16xf32> -> vector<4x8x16xf32>
    "tpu.trace_stop"() : () -> ()
    %cst_46 = arith.constant dense<0xFF800000> : vector<4x8xf32>
    %173 = vector.multi_reduction <maximumf>, %172, %cst_46 [2] : vector<4x8x16xf32> to vector<4x8xf32>
    %174 = vector.shape_cast %173 : vector<4x8xf32> to vector<4x8x1xf32>
    %175 = vector.broadcast %174 : vector<4x8x1xf32> to vector<4x8x16xf32>
    %176 = arith.subf %172, %175 : vector<4x8x16xf32>
    %177 = math.exp %176 : vector<4x8x16xf32>
    %cst_47 = arith.constant dense<0.000000e+00> : vector<4x8xf32>
    %178 = vector.multi_reduction <add>, %177, %cst_47 [2] : vector<4x8x16xf32> to vector<4x8xf32>
    %179 = vector.shape_cast %178 : vector<4x8xf32> to vector<4x8x1xf32>
    %180 = tpu.reciprocal %179 {approx = true} : vector<4x8x1xf32> -> vector<4x8x1xf32>
    %181 = vector.broadcast %180 : vector<4x8x1xf32> to vector<4x8x16xf32>
    %182 = arith.mulf %177, %181 : vector<4x8x16xf32>
    %183 = arith.truncf %182 : vector<4x8x16xf32> to vector<4x8x16xbf16>
    "tpu.trace_start"() <{level = 10 : i32, message = "hqk,hkd->hqd"}> : () -> ()
    %cst_48 = arith.constant dense<0.000000e+00> : vector<4x8x8xf32>
    %184 = tpu.matmul %183, %171, %cst_48 {dimension_numbers = #tpu.dot_dimension_numbers<[2], [1], [1], [2], [0, 0, 0, 1, 1, 2], [0], [0]>} : vector<4x8x16xbf16>, vector<4x16x8xbf16>, vector<4x8x8xf32> -> vector<4x8x8xf32>
    "tpu.trace_stop"() : () -> ()
    %185 = vector.extract_strided_slice %184 {offsets = [0, 0, 0], sizes = [1, 8, 8], strides = [1, 1, 1]} : vector<4x8x8xf32> to vector<1x8x8xf32>
    %186 = vector.shape_cast %185 : vector<1x8x8xf32> to vector<8x8xf32>
    %187 = vector.extract_strided_slice %184 {offsets = [1, 0, 0], sizes = [1, 8, 8], strides = [1, 1, 1]} : vector<4x8x8xf32> to vector<1x8x8xf32>
    %188 = vector.shape_cast %187 : vector<1x8x8xf32> to vector<8x8xf32>
    %189 = vector.extract_strided_slice %184 {offsets = [2, 0, 0], sizes = [1, 8, 8], strides = [1, 1, 1]} : vector<4x8x8xf32> to vector<1x8x8xf32>
    %190 = vector.shape_cast %189 : vector<1x8x8xf32> to vector<8x8xf32>
    %191 = vector.extract_strided_slice %184 {offsets = [3, 0, 0], sizes = [1, 8, 8], strides = [1, 1, 1]} : vector<4x8x8xf32> to vector<1x8x8xf32>
    %192 = vector.shape_cast %191 : vector<1x8x8xf32> to vector<8x8xf32>
    %193 = tpu.concatenate %186, %188, %190, %192 in 1 : vector<8x8xf32>, vector<8x8xf32>, vector<8x8xf32>, vector<8x8xf32> -> vector<8x32xf32>
    %194 = vector.extract_strided_slice %122 {offsets = [0, 96], sizes = [32, 32], strides = [1, 1]} : vector<32x128xbf16> to vector<32x32xbf16>
    %195 = arith.truncf %193 : vector<8x32xf32> to vector<8x32xbf16>
    %cst_49 = arith.constant dense<0.000000e+00> : vector<8x32xf32>
    %196 = tpu.matmul %195, %194, %cst_49 {dimension_numbers = #tpu.dot_dimension_numbers<[1], [0], [0], [1], [0, 0, 1, 1], [], []>} : vector<8x32xbf16>, vector<32x32xbf16>, vector<8x32xf32> -> vector<8x32xf32>
    %197 = vector.extract_strided_slice %123 {offsets = [0, 96], sizes = [1, 32], strides = [1, 1]} : vector<1x128xf32> to vector<1x32xf32>
    %198 = vector.broadcast %197 : vector<1x32xf32> to vector<8x32xf32>
    %199 = arith.addf %196, %198 : vector<8x32xf32>
    %200 = vector.extract_strided_slice %17 {offsets = [11, 0], sizes = [1, 128], strides = [1, 1]} : vector<17x128xf32> to vector<1x128xf32>
    %201 = arith.addf %119, %199 : vector<8x32xf32>
    %cst_50 = arith.constant dense<0.000000e+00> : vector<8xf32>
    %202 = vector.multi_reduction <add>, %201, %cst_50 [1] : vector<8x32xf32> to vector<8xf32>
    %203 = vector.shape_cast %202 : vector<8xf32> to vector<8x1xf32>
    %cst_51 = arith.constant 3.200000e+01 : f32
    %204 = vector.broadcast %cst_51 : f32 to vector<8x1xf32>
    %205 = arith.divf %203, %204 : vector<8x1xf32>
    %206 = vector.broadcast %205 : vector<8x1xf32> to vector<8x32xf32>
    %207 = arith.subf %201, %206 : vector<8x32xf32>
    %208 = arith.mulf %207, %207 : vector<8x32xf32>
    %cst_52 = arith.constant dense<0.000000e+00> : vector<8xf32>
    %209 = vector.multi_reduction <add>, %208, %cst_52 [1] : vector<8x32xf32> to vector<8xf32>
    %210 = vector.shape_cast %209 : vector<8xf32> to vector<8x1xf32>
    %cst_53 = arith.constant 3.200000e+01 : f32
    %211 = vector.broadcast %cst_53 : f32 to vector<8x1xf32>
    %212 = arith.divf %210, %211 : vector<8x1xf32>
    %213 = vector.broadcast %205 : vector<8x1xf32> to vector<8x32xf32>
    %214 = arith.subf %201, %213 : vector<8x32xf32>
    %cst_54 = arith.constant 9.99999974E-6 : f32
    %215 = vector.broadcast %cst_54 : f32 to vector<8x1xf32>
    %216 = arith.addf %212, %215 : vector<8x1xf32>
    %217 = math.rsqrt %216 : vector<8x1xf32>
    %218 = vector.broadcast %217 : vector<8x1xf32> to vector<8x32xf32>
    %219 = arith.mulf %214, %218 : vector<8x32xf32>
    %220 = vector.extract_strided_slice %200 {offsets = [0, 0], sizes = [1, 32], strides = [1, 1]} : vector<1x128xf32> to vector<1x32xf32>
    %221 = vector.broadcast %220 : vector<1x32xf32> to vector<8x32xf32>
    %222 = arith.mulf %219, %221 : vector<8x32xf32>
    %223 = vector.extract_strided_slice %200 {offsets = [0, 32], sizes = [1, 32], strides = [1, 1]} : vector<1x128xf32> to vector<1x32xf32>
    %224 = vector.broadcast %223 : vector<1x32xf32> to vector<8x32xf32>
    %225 = arith.addf %222, %224 : vector<8x32xf32>
    %226 = vector.extract_strided_slice %17 {offsets = [7, 0], sizes = [1, 128], strides = [1, 1]} : vector<17x128xf32> to vector<1x128xf32>
    %c0_55 = arith.constant 0 : index
    %c0_56 = arith.constant 0 : index
    %c0_57 = arith.constant 0 : index
    %227 = vector.load %arg13[%c0_55, %c0_56, %c0_57] : memref<1x32x64xbf16, #tpu.memory_space<vmem>>, vector<1x32x64xbf16>
    %228 = vector.shape_cast %227 : vector<1x32x64xbf16> to vector<32x64xbf16>
    %229 = arith.truncf %225 : vector<8x32xf32> to vector<8x32xbf16>
    %cst_58 = arith.constant dense<0.000000e+00> : vector<8x64xf32>
    %230 = tpu.matmul %229, %228, %cst_58 {dimension_numbers = #tpu.dot_dimension_numbers<[1], [0], [0], [1], [0, 0, 1, 1], [], []>} : vector<8x32xbf16>, vector<32x64xbf16>, vector<8x64xf32> -> vector<8x64xf32>
    %231 = vector.extract_strided_slice %226 {offsets = [0, 0], sizes = [1, 64], strides = [1, 1]} : vector<1x128xf32> to vector<1x64xf32>
    %232 = vector.broadcast %231 : vector<1x64xf32> to vector<8x64xf32>
    %233 = arith.addf %230, %232 : vector<8x64xf32>
    %cst_59 = arith.constant 0.000000e+00 : f32
    %234 = vector.broadcast %cst_59 : f32 to vector<8x64xf32>
    %235 = arith.maximumf %233, %234 : vector<8x64xf32>
    %c0_60 = arith.constant 0 : index
    %c0_61 = arith.constant 0 : index
    %c0_62 = arith.constant 0 : index
    %236 = vector.load %arg14[%c0_60, %c0_61, %c0_62] : memref<1x64x32xbf16, #tpu.memory_space<vmem>>, vector<1x64x32xbf16>
    %237 = vector.shape_cast %236 : vector<1x64x32xbf16> to vector<64x32xbf16>
    %238 = arith.truncf %235 : vector<8x64xf32> to vector<8x64xbf16>
    %cst_63 = arith.constant dense<0.000000e+00> : vector<8x32xf32>
    %239 = tpu.matmul %238, %237, %cst_63 {dimension_numbers = #tpu.dot_dimension_numbers<[1], [0], [0], [1], [0, 0, 1, 1], [], []>} : vector<8x64xbf16>, vector<64x32xbf16>, vector<8x32xf32> -> vector<8x32xf32>
    %240 = vector.extract_strided_slice %226 {offsets = [0, 64], sizes = [1, 32], strides = [1, 1]} : vector<1x128xf32> to vector<1x32xf32>
    %241 = vector.broadcast %240 : vector<1x32xf32> to vector<8x32xf32>
    %242 = arith.addf %239, %241 : vector<8x32xf32>
    %243 = vector.extract_strided_slice %17 {offsets = [12, 0], sizes = [1, 128], strides = [1, 1]} : vector<17x128xf32> to vector<1x128xf32>
    %244 = arith.addf %225, %242 : vector<8x32xf32>
    %cst_64 = arith.constant dense<0.000000e+00> : vector<8xf32>
    %245 = vector.multi_reduction <add>, %244, %cst_64 [1] : vector<8x32xf32> to vector<8xf32>
    %246 = vector.shape_cast %245 : vector<8xf32> to vector<8x1xf32>
    %cst_65 = arith.constant 3.200000e+01 : f32
    %247 = vector.broadcast %cst_65 : f32 to vector<8x1xf32>
    %248 = arith.divf %246, %247 : vector<8x1xf32>
    %249 = vector.broadcast %248 : vector<8x1xf32> to vector<8x32xf32>
    %250 = arith.subf %244, %249 : vector<8x32xf32>
    %251 = arith.mulf %250, %250 : vector<8x32xf32>
    %cst_66 = arith.constant dense<0.000000e+00> : vector<8xf32>
    %252 = vector.multi_reduction <add>, %251, %cst_66 [1] : vector<8x32xf32> to vector<8xf32>
    %253 = vector.shape_cast %252 : vector<8xf32> to vector<8x1xf32>
    %cst_67 = arith.constant 3.200000e+01 : f32
    %254 = vector.broadcast %cst_67 : f32 to vector<8x1xf32>
    %255 = arith.divf %253, %254 : vector<8x1xf32>
    %256 = vector.broadcast %248 : vector<8x1xf32> to vector<8x32xf32>
    %257 = arith.subf %244, %256 : vector<8x32xf32>
    %cst_68 = arith.constant 9.99999974E-6 : f32
    %258 = vector.broadcast %cst_68 : f32 to vector<8x1xf32>
    %259 = arith.addf %255, %258 : vector<8x1xf32>
    %260 = math.rsqrt %259 : vector<8x1xf32>
    %261 = vector.broadcast %260 : vector<8x1xf32> to vector<8x32xf32>
    %262 = arith.mulf %257, %261 : vector<8x32xf32>
    %263 = vector.extract_strided_slice %243 {offsets = [0, 0], sizes = [1, 32], strides = [1, 1]} : vector<1x128xf32> to vector<1x32xf32>
    %264 = vector.broadcast %263 : vector<1x32xf32> to vector<8x32xf32>
    %265 = arith.mulf %262, %264 : vector<8x32xf32>
    %266 = vector.extract_strided_slice %243 {offsets = [0, 32], sizes = [1, 32], strides = [1, 1]} : vector<1x128xf32> to vector<1x32xf32>
    %267 = vector.broadcast %266 : vector<1x32xf32> to vector<8x32xf32>
    %268 = arith.addf %265, %267 : vector<8x32xf32>
    %269 = vector.extract_strided_slice %4 {offsets = [0, 0], sizes = [8, 32], strides = [1, 1]} : vector<8x64xf32> to vector<8x32xf32>
    %270 = vector.extract_strided_slice %4 {offsets = [0, 32], sizes = [8, 32], strides = [1, 1]} : vector<8x64xf32> to vector<8x32xf32>
    %271 = vector.broadcast %13 : vector<1x32xf32> to vector<8x32xf32>
    %272 = arith.addf %11, %271 : vector<8x32xf32>
    %273 = vector.broadcast %15 : vector<1x32xf32> to vector<8x32xf32>
    %274 = arith.addf %11, %273 : vector<8x32xf32>
    %275 = arith.addf %269, %272 : vector<8x32xf32>
    %276 = arith.addf %270, %274 : vector<8x32xf32>
    %277 = tpu.concatenate %275, %276 in 0 : vector<8x32xf32>, vector<8x32xf32> -> vector<16x32xf32>
    %278 = tpu.concatenate %269, %270 in 0 : vector<8x32xf32>, vector<8x32xf32> -> vector<16x32xf32>
    %c0_69 = arith.constant 0 : index
    %c2 = arith.constant 2 : index
    %c0_70 = arith.constant 0 : index
    %c0_71 = arith.constant 0 : index
    %279 = vector.load %arg9[%c0_69, %c2, %c0_70, %c0_71] : memref<1x3x32x128xbf16, #tpu.memory_space<vmem>>, vector<1x1x32x128xbf16>
    %280 = vector.shape_cast %279 : vector<1x1x32x128xbf16> to vector<32x128xbf16>
    %281 = vector.extract_strided_slice %17 {offsets = [2, 0], sizes = [1, 128], strides = [1, 1]} : vector<17x128xf32> to vector<1x128xf32>
    %282 = vector.extract_strided_slice %280 {offsets = [0, 0], sizes = [32, 64], strides = [1, 1]} : vector<32x128xbf16> to vector<32x64xbf16>
    %283 = arith.truncf %277 : vector<16x32xf32> to vector<16x32xbf16>
    %cst_72 = arith.constant dense<0.000000e+00> : vector<16x64xf32>
    %284 = tpu.matmul %283, %282, %cst_72 {dimension_numbers = #tpu.dot_dimension_numbers<[1], [0], [0], [1], [0, 0, 1, 1], [], []>} : vector<16x32xbf16>, vector<32x64xbf16>, vector<16x64xf32> -> vector<16x64xf32>
    %285 = vector.extract_strided_slice %281 {offsets = [0, 0], sizes = [1, 64], strides = [1, 1]} : vector<1x128xf32> to vector<1x64xf32>
    %286 = vector.broadcast %285 : vector<1x64xf32> to vector<16x64xf32>
    %287 = arith.addf %284, %286 : vector<16x64xf32>
    %288 = vector.extract_strided_slice %287 {offsets = [0, 0], sizes = [16, 32], strides = [1, 1]} : vector<16x64xf32> to vector<16x32xf32>
    %289 = vector.extract_strided_slice %287 {offsets = [0, 32], sizes = [16, 32], strides = [1, 1]} : vector<16x64xf32> to vector<16x32xf32>
    %290 = vector.extract_strided_slice %280 {offsets = [0, 64], sizes = [32, 32], strides = [1, 1]} : vector<32x128xbf16> to vector<32x32xbf16>
    %291 = arith.truncf %278 : vector<16x32xf32> to vector<16x32xbf16>
    %cst_73 = arith.constant dense<0.000000e+00> : vector<16x32xf32>
    %292 = tpu.matmul %291, %290, %cst_73 {dimension_numbers = #tpu.dot_dimension_numbers<[1], [0], [0], [1], [0, 0, 1, 1], [], []>} : vector<16x32xbf16>, vector<32x32xbf16>, vector<16x32xf32> -> vector<16x32xf32>
    %293 = vector.extract_strided_slice %281 {offsets = [0, 64], sizes = [1, 32], strides = [1, 1]} : vector<1x128xf32> to vector<1x32xf32>
    %294 = vector.broadcast %293 : vector<1x32xf32> to vector<16x32xf32>
    %295 = arith.addf %292, %294 : vector<16x32xf32>
    %296 = vector.extract_strided_slice %288 {offsets = [0, 0], sizes = [16, 8], strides = [1, 1]} : vector<16x32xf32> to vector<16x8xf32>
    %297 = vector.extract_strided_slice %288 {offsets = [0, 8], sizes = [16, 8], strides = [1, 1]} : vector<16x32xf32> to vector<16x8xf32>
    %298 = vector.extract_strided_slice %288 {offsets = [0, 16], sizes = [16, 8], strides = [1, 1]} : vector<16x32xf32> to vector<16x8xf32>
    %299 = vector.extract_strided_slice %288 {offsets = [0, 24], sizes = [16, 8], strides = [1, 1]} : vector<16x32xf32> to vector<16x8xf32>
    %300 = vector.shape_cast %296 : vector<16x8xf32> to vector<1x16x8xf32>
    %301 = vector.shape_cast %297 : vector<16x8xf32> to vector<1x16x8xf32>
    %302 = vector.shape_cast %298 : vector<16x8xf32> to vector<1x16x8xf32>
    %303 = vector.shape_cast %299 : vector<16x8xf32> to vector<1x16x8xf32>
    %304 = tpu.concatenate %300, %301, %302, %303 in 0 : vector<1x16x8xf32>, vector<1x16x8xf32>, vector<1x16x8xf32>, vector<1x16x8xf32> -> vector<4x16x8xf32>
    %305 = arith.truncf %304 : vector<4x16x8xf32> to vector<4x16x8xbf16>
    %306 = vector.extract_strided_slice %289 {offsets = [0, 0], sizes = [16, 8], strides = [1, 1]} : vector<16x32xf32> to vector<16x8xf32>
    %307 = vector.extract_strided_slice %289 {offsets = [0, 8], sizes = [16, 8], strides = [1, 1]} : vector<16x32xf32> to vector<16x8xf32>
    %308 = vector.extract_strided_slice %289 {offsets = [0, 16], sizes = [16, 8], strides = [1, 1]} : vector<16x32xf32> to vector<16x8xf32>
    %309 = vector.extract_strided_slice %289 {offsets = [0, 24], sizes = [16, 8], strides = [1, 1]} : vector<16x32xf32> to vector<16x8xf32>
    %310 = vector.shape_cast %306 : vector<16x8xf32> to vector<1x16x8xf32>
    %311 = vector.shape_cast %307 : vector<16x8xf32> to vector<1x16x8xf32>
    %312 = vector.shape_cast %308 : vector<16x8xf32> to vector<1x16x8xf32>
    %313 = vector.shape_cast %309 : vector<16x8xf32> to vector<1x16x8xf32>
    %314 = tpu.concatenate %310, %311, %312, %313 in 0 : vector<1x16x8xf32>, vector<1x16x8xf32>, vector<1x16x8xf32>, vector<1x16x8xf32> -> vector<4x16x8xf32>
    %315 = arith.truncf %314 : vector<4x16x8xf32> to vector<4x16x8xbf16>
    %316 = vector.extract_strided_slice %295 {offsets = [0, 0], sizes = [16, 8], strides = [1, 1]} : vector<16x32xf32> to vector<16x8xf32>
    %317 = vector.extract_strided_slice %295 {offsets = [0, 8], sizes = [16, 8], strides = [1, 1]} : vector<16x32xf32> to vector<16x8xf32>
    %318 = vector.extract_strided_slice %295 {offsets = [0, 16], sizes = [16, 8], strides = [1, 1]} : vector<16x32xf32> to vector<16x8xf32>
    %319 = vector.extract_strided_slice %295 {offsets = [0, 24], sizes = [16, 8], strides = [1, 1]} : vector<16x32xf32> to vector<16x8xf32>
    %320 = vector.shape_cast %316 : vector<16x8xf32> to vector<1x16x8xf32>
    %321 = vector.shape_cast %317 : vector<16x8xf32> to vector<1x16x8xf32>
    %322 = vector.shape_cast %318 : vector<16x8xf32> to vector<1x16x8xf32>
    %323 = vector.shape_cast %319 : vector<16x8xf32> to vector<1x16x8xf32>
    %324 = tpu.concatenate %320, %321, %322, %323 in 0 : vector<1x16x8xf32>, vector<1x16x8xf32>, vector<1x16x8xf32>, vector<1x16x8xf32> -> vector<4x16x8xf32>
    %325 = arith.truncf %324 : vector<4x16x8xf32> to vector<4x16x8xbf16>
    "tpu.trace_start"() <{level = 10 : i32, message = "hqd,hkd->hqk"}> : () -> ()
    %cst_74 = arith.constant dense<0.000000e+00> : vector<4x16x16xf32>
    %326 = tpu.matmul %305, %315, %cst_74 {dimension_numbers = #tpu.dot_dimension_numbers<[2], [2], [1], [1], [0, 0, 0, 1, 1, 1], [0], [0]>} : vector<4x16x8xbf16>, vector<4x16x8xbf16>, vector<4x16x16xf32> -> vector<4x16x16xf32>
    "tpu.trace_stop"() : () -> ()
    %cst_75 = arith.constant dense<0xFF800000> : vector<4x16xf32>
    %327 = vector.multi_reduction <maximumf>, %326, %cst_75 [2] : vector<4x16x16xf32> to vector<4x16xf32>
    %328 = vector.shape_cast %327 : vector<4x16xf32> to vector<4x16x1xf32>
    %329 = vector.broadcast %328 : vector<4x16x1xf32> to vector<4x16x16xf32>
    %330 = arith.subf %326, %329 : vector<4x16x16xf32>
    %331 = math.exp %330 : vector<4x16x16xf32>
    %cst_76 = arith.constant dense<0.000000e+00> : vector<4x16xf32>
    %332 = vector.multi_reduction <add>, %331, %cst_76 [2] : vector<4x16x16xf32> to vector<4x16xf32>
    %333 = vector.shape_cast %332 : vector<4x16xf32> to vector<4x16x1xf32>
    %334 = tpu.reciprocal %333 {approx = true} : vector<4x16x1xf32> -> vector<4x16x1xf32>
    %335 = vector.broadcast %334 : vector<4x16x1xf32> to vector<4x16x16xf32>
    %336 = arith.mulf %331, %335 : vector<4x16x16xf32>
    %337 = arith.truncf %336 : vector<4x16x16xf32> to vector<4x16x16xbf16>
    "tpu.trace_start"() <{level = 10 : i32, message = "hqk,hkd->hqd"}> : () -> ()
    %cst_77 = arith.constant dense<0.000000e+00> : vector<4x16x8xf32>
    %338 = tpu.matmul %337, %325, %cst_77 {dimension_numbers = #tpu.dot_dimension_numbers<[2], [1], [1], [2], [0, 0, 0, 1, 1, 2], [0], [0]>} : vector<4x16x16xbf16>, vector<4x16x8xbf16>, vector<4x16x8xf32> -> vector<4x16x8xf32>
    "tpu.trace_stop"() : () -> ()
    %339 = vector.extract_strided_slice %338 {offsets = [0, 0, 0], sizes = [1, 16, 8], strides = [1, 1, 1]} : vector<4x16x8xf32> to vector<1x16x8xf32>
    %340 = vector.shape_cast %339 : vector<1x16x8xf32> to vector<16x8xf32>
    %341 = vector.extract_strided_slice %338 {offsets = [1, 0, 0], sizes = [1, 16, 8], strides = [1, 1, 1]} : vector<4x16x8xf32> to vector<1x16x8xf32>
    %342 = vector.shape_cast %341 : vector<1x16x8xf32> to vector<16x8xf32>
    %343 = vector.extract_strided_slice %338 {offsets = [2, 0, 0], sizes = [1, 16, 8], strides = [1, 1, 1]} : vector<4x16x8xf32> to vector<1x16x8xf32>
    %344 = vector.shape_cast %343 : vector<1x16x8xf32> to vector<16x8xf32>
    %345 = vector.extract_strided_slice %338 {offsets = [3, 0, 0], sizes = [1, 16, 8], strides = [1, 1, 1]} : vector<4x16x8xf32> to vector<1x16x8xf32>
    %346 = vector.shape_cast %345 : vector<1x16x8xf32> to vector<16x8xf32>
    %347 = tpu.concatenate %340, %342, %344, %346 in 1 : vector<16x8xf32>, vector<16x8xf32>, vector<16x8xf32>, vector<16x8xf32> -> vector<16x32xf32>
    %348 = vector.extract_strided_slice %280 {offsets = [0, 96], sizes = [32, 32], strides = [1, 1]} : vector<32x128xbf16> to vector<32x32xbf16>
    %349 = arith.truncf %347 : vector<16x32xf32> to vector<16x32xbf16>
    %cst_78 = arith.constant dense<0.000000e+00> : vector<16x32xf32>
    %350 = tpu.matmul %349, %348, %cst_78 {dimension_numbers = #tpu.dot_dimension_numbers<[1], [0], [0], [1], [0, 0, 1, 1], [], []>} : vector<16x32xbf16>, vector<32x32xbf16>, vector<16x32xf32> -> vector<16x32xf32>
    %351 = vector.extract_strided_slice %281 {offsets = [0, 96], sizes = [1, 32], strides = [1, 1]} : vector<1x128xf32> to vector<1x32xf32>
    %352 = vector.broadcast %351 : vector<1x32xf32> to vector<16x32xf32>
    %353 = arith.addf %350, %352 : vector<16x32xf32>
    %354 = vector.extract_strided_slice %353 {offsets = [0, 0], sizes = [8, 32], strides = [1, 1]} : vector<16x32xf32> to vector<8x32xf32>
    %355 = vector.extract_strided_slice %353 {offsets = [8, 0], sizes = [8, 32], strides = [1, 1]} : vector<16x32xf32> to vector<8x32xf32>
    %356 = tpu.concatenate %354, %355 in 1 : vector<8x32xf32>, vector<8x32xf32> -> vector<8x64xf32>
    %357 = vector.extract_strided_slice %17 {offsets = [13, 0], sizes = [1, 128], strides = [1, 1]} : vector<17x128xf32> to vector<1x128xf32>
    %358 = arith.addf %4, %356 : vector<8x64xf32>
    %359 = vector.extract_strided_slice %358 {offsets = [0, 0], sizes = [8, 32], strides = [1, 1]} : vector<8x64xf32> to vector<8x32xf32>
    %cst_79 = arith.constant dense<0.000000e+00> : vector<8xf32>
    %360 = vector.multi_reduction <add>, %359, %cst_79 [1] : vector<8x32xf32> to vector<8xf32>
    %361 = vector.shape_cast %360 : vector<8xf32> to vector<8x1xf32>
    %cst_80 = arith.constant 3.200000e+01 : f32
    %362 = vector.broadcast %cst_80 : f32 to vector<8x1xf32>
    %363 = arith.divf %361, %362 : vector<8x1xf32>
    %364 = vector.broadcast %363 : vector<8x1xf32> to vector<8x32xf32>
    %365 = arith.subf %359, %364 : vector<8x32xf32>
    %366 = arith.mulf %365, %365 : vector<8x32xf32>
    %cst_81 = arith.constant dense<0.000000e+00> : vector<8xf32>
    %367 = vector.multi_reduction <add>, %366, %cst_81 [1] : vector<8x32xf32> to vector<8xf32>
    %368 = vector.shape_cast %367 : vector<8xf32> to vector<8x1xf32>
    %cst_82 = arith.constant 3.200000e+01 : f32
    %369 = vector.broadcast %cst_82 : f32 to vector<8x1xf32>
    %370 = arith.divf %368, %369 : vector<8x1xf32>
    %371 = vector.broadcast %363 : vector<8x1xf32> to vector<8x32xf32>
    %372 = arith.subf %359, %371 : vector<8x32xf32>
    %cst_83 = arith.constant 9.99999974E-6 : f32
    %373 = vector.broadcast %cst_83 : f32 to vector<8x1xf32>
    %374 = arith.addf %370, %373 : vector<8x1xf32>
    %375 = math.rsqrt %374 : vector<8x1xf32>
    %376 = vector.broadcast %375 : vector<8x1xf32> to vector<8x32xf32>
    %377 = arith.mulf %372, %376 : vector<8x32xf32>
    %378 = vector.extract_strided_slice %358 {offsets = [0, 32], sizes = [8, 32], strides = [1, 1]} : vector<8x64xf32> to vector<8x32xf32>
    %cst_84 = arith.constant dense<0.000000e+00> : vector<8xf32>
    %379 = vector.multi_reduction <add>, %378, %cst_84 [1] : vector<8x32xf32> to vector<8xf32>
    %380 = vector.shape_cast %379 : vector<8xf32> to vector<8x1xf32>
    %cst_85 = arith.constant 3.200000e+01 : f32
    %381 = vector.broadcast %cst_85 : f32 to vector<8x1xf32>
    %382 = arith.divf %380, %381 : vector<8x1xf32>
    %383 = vector.broadcast %382 : vector<8x1xf32> to vector<8x32xf32>
    %384 = arith.subf %378, %383 : vector<8x32xf32>
    %385 = arith.mulf %384, %384 : vector<8x32xf32>
    %cst_86 = arith.constant dense<0.000000e+00> : vector<8xf32>
    %386 = vector.multi_reduction <add>, %385, %cst_86 [1] : vector<8x32xf32> to vector<8xf32>
    %387 = vector.shape_cast %386 : vector<8xf32> to vector<8x1xf32>
    %cst_87 = arith.constant 3.200000e+01 : f32
    %388 = vector.broadcast %cst_87 : f32 to vector<8x1xf32>
    %389 = arith.divf %387, %388 : vector<8x1xf32>
    %390 = vector.broadcast %382 : vector<8x1xf32> to vector<8x32xf32>
    %391 = arith.subf %378, %390 : vector<8x32xf32>
    %cst_88 = arith.constant 9.99999974E-6 : f32
    %392 = vector.broadcast %cst_88 : f32 to vector<8x1xf32>
    %393 = arith.addf %389, %392 : vector<8x1xf32>
    %394 = math.rsqrt %393 : vector<8x1xf32>
    %395 = vector.broadcast %394 : vector<8x1xf32> to vector<8x32xf32>
    %396 = arith.mulf %391, %395 : vector<8x32xf32>
    %397 = tpu.concatenate %377, %396 in 1 : vector<8x32xf32>, vector<8x32xf32> -> vector<8x64xf32>
    %398 = vector.extract_strided_slice %357 {offsets = [0, 0], sizes = [1, 64], strides = [1, 1]} : vector<1x128xf32> to vector<1x64xf32>
    %399 = vector.broadcast %398 : vector<1x64xf32> to vector<8x64xf32>
    %400 = arith.mulf %397, %399 : vector<8x64xf32>
    %401 = vector.extract_strided_slice %357 {offsets = [0, 64], sizes = [1, 64], strides = [1, 1]} : vector<1x128xf32> to vector<1x64xf32>
    %402 = vector.broadcast %401 : vector<1x64xf32> to vector<8x64xf32>
    %403 = arith.addf %400, %402 : vector<8x64xf32>
    %404 = tpu.concatenate %272, %274 in 1 : vector<8x32xf32>, vector<8x32xf32> -> vector<8x64xf32>
    %405 = arith.addf %403, %404 : vector<8x64xf32>
    %c0_89 = arith.constant 0 : index
    %c0_90 = arith.constant 0 : index
    %c0_91 = arith.constant 0 : index
    %406 = vector.load %arg10[%c0_89, %c0_90, %c0_91] : memref<1x64x128xbf16, #tpu.memory_space<vmem>>, vector<1x64x128xbf16>
    %407 = vector.shape_cast %406 : vector<1x64x128xbf16> to vector<64x128xbf16>
    %408 = vector.extract_strided_slice %407 {offsets = [0, 0], sizes = [64, 64], strides = [1, 1]} : vector<64x128xbf16> to vector<64x64xbf16>
    %c0_92 = arith.constant 0 : index
    %c0_93 = arith.constant 0 : index
    %c0_94 = arith.constant 0 : index
    %409 = vector.load %arg11[%c0_92, %c0_93, %c0_94] : memref<1x64x128xbf16, #tpu.memory_space<vmem>>, vector<1x64x128xbf16>
    %410 = vector.shape_cast %409 : vector<1x64x128xbf16> to vector<64x128xbf16>
    %411 = vector.extract_strided_slice %410 {offsets = [0, 0], sizes = [64, 64], strides = [1, 1]} : vector<64x128xbf16> to vector<64x64xbf16>
    %c0_95 = arith.constant 0 : index
    %c0_96 = arith.constant 0 : index
    %c0_97 = arith.constant 0 : index
    %c0_98 = arith.constant 0 : index
    %412 = vector.load %arg12[%c0_95, %c0_96, %c0_97, %c0_98] : memref<1x2x32x128xbf16, #tpu.memory_space<vmem>>, vector<1x1x32x128xbf16>
    %413 = vector.shape_cast %412 : vector<1x1x32x128xbf16> to vector<32x128xbf16>
    %414 = vector.extract_strided_slice %17 {offsets = [3, 0], sizes = [1, 128], strides = [1, 1]} : vector<17x128xf32> to vector<1x128xf32>
    %415 = vector.extract_strided_slice %17 {offsets = [4, 0], sizes = [1, 128], strides = [1, 1]} : vector<17x128xf32> to vector<1x128xf32>
    %416 = arith.truncf %405 : vector<8x64xf32> to vector<8x64xbf16>
    %cst_99 = arith.constant dense<0.000000e+00> : vector<8x64xf32>
    %417 = tpu.matmul %416, %408, %cst_99 {dimension_numbers = #tpu.dot_dimension_numbers<[1], [0], [0], [1], [0, 0, 1, 1], [], []>} : vector<8x64xbf16>, vector<64x64xbf16>, vector<8x64xf32> -> vector<8x64xf32>
    %418 = vector.extract_strided_slice %414 {offsets = [0, 0], sizes = [1, 64], strides = [1, 1]} : vector<1x128xf32> to vector<1x64xf32>
    %419 = vector.broadcast %418 : vector<1x64xf32> to vector<8x64xf32>
    %420 = arith.addf %417, %419 : vector<8x64xf32>
    %421 = vector.extract_strided_slice %413 {offsets = [0, 0], sizes = [32, 64], strides = [1, 1]} : vector<32x128xbf16> to vector<32x64xbf16>
    %422 = arith.truncf %7 : vector<16x32xf32> to vector<16x32xbf16>
    %cst_100 = arith.constant dense<0.000000e+00> : vector<16x64xf32>
    %423 = tpu.matmul %422, %421, %cst_100 {dimension_numbers = #tpu.dot_dimension_numbers<[1], [0], [0], [1], [0, 0, 1, 1], [], []>} : vector<16x32xbf16>, vector<32x64xbf16>, vector<16x64xf32> -> vector<16x64xf32>
    %424 = vector.extract_strided_slice %414 {offsets = [0, 64], sizes = [1, 64], strides = [1, 1]} : vector<1x128xf32> to vector<1x64xf32>
    %425 = vector.broadcast %424 : vector<1x64xf32> to vector<16x64xf32>
    %426 = arith.addf %423, %425 : vector<16x64xf32>
    %427 = vector.extract_strided_slice %413 {offsets = [0, 64], sizes = [32, 64], strides = [1, 1]} : vector<32x128xbf16> to vector<32x64xbf16>
    %428 = arith.truncf %6 : vector<16x32xf32> to vector<16x32xbf16>
    %cst_101 = arith.constant dense<0.000000e+00> : vector<16x64xf32>
    %429 = tpu.matmul %428, %427, %cst_101 {dimension_numbers = #tpu.dot_dimension_numbers<[1], [0], [0], [1], [0, 0, 1, 1], [], []>} : vector<16x32xbf16>, vector<32x64xbf16>, vector<16x64xf32> -> vector<16x64xf32>
    %430 = vector.extract_strided_slice %415 {offsets = [0, 0], sizes = [1, 64], strides = [1, 1]} : vector<1x128xf32> to vector<1x64xf32>
    %431 = vector.broadcast %430 : vector<1x64xf32> to vector<16x64xf32>
    %432 = arith.addf %429, %431 : vector<16x64xf32>
    %433 = vector.extract_strided_slice %420 {offsets = [0, 0], sizes = [8, 8], strides = [1, 1]} : vector<8x64xf32> to vector<8x8xf32>
    %434 = vector.extract_strided_slice %420 {offsets = [0, 8], sizes = [8, 8], strides = [1, 1]} : vector<8x64xf32> to vector<8x8xf32>
    %435 = vector.extract_strided_slice %420 {offsets = [0, 16], sizes = [8, 8], strides = [1, 1]} : vector<8x64xf32> to vector<8x8xf32>
    %436 = vector.extract_strided_slice %420 {offsets = [0, 24], sizes = [8, 8], strides = [1, 1]} : vector<8x64xf32> to vector<8x8xf32>
    %437 = vector.extract_strided_slice %420 {offsets = [0, 32], sizes = [8, 8], strides = [1, 1]} : vector<8x64xf32> to vector<8x8xf32>
    %438 = vector.extract_strided_slice %420 {offsets = [0, 40], sizes = [8, 8], strides = [1, 1]} : vector<8x64xf32> to vector<8x8xf32>
    %439 = vector.extract_strided_slice %420 {offsets = [0, 48], sizes = [8, 8], strides = [1, 1]} : vector<8x64xf32> to vector<8x8xf32>
    %440 = vector.extract_strided_slice %420 {offsets = [0, 56], sizes = [8, 8], strides = [1, 1]} : vector<8x64xf32> to vector<8x8xf32>
    %441 = vector.shape_cast %433 : vector<8x8xf32> to vector<1x8x8xf32>
    %442 = vector.shape_cast %434 : vector<8x8xf32> to vector<1x8x8xf32>
    %443 = vector.shape_cast %435 : vector<8x8xf32> to vector<1x8x8xf32>
    %444 = vector.shape_cast %436 : vector<8x8xf32> to vector<1x8x8xf32>
    %445 = vector.shape_cast %437 : vector<8x8xf32> to vector<1x8x8xf32>
    %446 = vector.shape_cast %438 : vector<8x8xf32> to vector<1x8x8xf32>
    %447 = vector.shape_cast %439 : vector<8x8xf32> to vector<1x8x8xf32>
    %448 = vector.shape_cast %440 : vector<8x8xf32> to vector<1x8x8xf32>
    %449 = tpu.concatenate %441, %442, %443, %444, %445, %446, %447, %448 in 0 : vector<1x8x8xf32>, vector<1x8x8xf32>, vector<1x8x8xf32>, vector<1x8x8xf32>, vector<1x8x8xf32>, vector<1x8x8xf32>, vector<1x8x8xf32>, vector<1x8x8xf32> -> vector<8x8x8xf32>
    %450 = arith.truncf %449 : vector<8x8x8xf32> to vector<8x8x8xbf16>
    %451 = vector.extract_strided_slice %426 {offsets = [0, 0], sizes = [16, 8], strides = [1, 1]} : vector<16x64xf32> to vector<16x8xf32>
    %452 = vector.extract_strided_slice %426 {offsets = [0, 8], sizes = [16, 8], strides = [1, 1]} : vector<16x64xf32> to vector<16x8xf32>
    %453 = vector.extract_strided_slice %426 {offsets = [0, 16], sizes = [16, 8], strides = [1, 1]} : vector<16x64xf32> to vector<16x8xf32>
    %454 = vector.extract_strided_slice %426 {offsets = [0, 24], sizes = [16, 8], strides = [1, 1]} : vector<16x64xf32> to vector<16x8xf32>
    %455 = vector.extract_strided_slice %426 {offsets = [0, 32], sizes = [16, 8], strides = [1, 1]} : vector<16x64xf32> to vector<16x8xf32>
    %456 = vector.extract_strided_slice %426 {offsets = [0, 40], sizes = [16, 8], strides = [1, 1]} : vector<16x64xf32> to vector<16x8xf32>
    %457 = vector.extract_strided_slice %426 {offsets = [0, 48], sizes = [16, 8], strides = [1, 1]} : vector<16x64xf32> to vector<16x8xf32>
    %458 = vector.extract_strided_slice %426 {offsets = [0, 56], sizes = [16, 8], strides = [1, 1]} : vector<16x64xf32> to vector<16x8xf32>
    %459 = vector.shape_cast %451 : vector<16x8xf32> to vector<1x16x8xf32>
    %460 = vector.shape_cast %452 : vector<16x8xf32> to vector<1x16x8xf32>
    %461 = vector.shape_cast %453 : vector<16x8xf32> to vector<1x16x8xf32>
    %462 = vector.shape_cast %454 : vector<16x8xf32> to vector<1x16x8xf32>
    %463 = vector.shape_cast %455 : vector<16x8xf32> to vector<1x16x8xf32>
    %464 = vector.shape_cast %456 : vector<16x8xf32> to vector<1x16x8xf32>
    %465 = vector.shape_cast %457 : vector<16x8xf32> to vector<1x16x8xf32>
    %466 = vector.shape_cast %458 : vector<16x8xf32> to vector<1x16x8xf32>
    %467 = tpu.concatenate %459, %460, %461, %462, %463, %464, %465, %466 in 0 : vector<1x16x8xf32>, vector<1x16x8xf32>, vector<1x16x8xf32>, vector<1x16x8xf32>, vector<1x16x8xf32>, vector<1x16x8xf32>, vector<1x16x8xf32>, vector<1x16x8xf32> -> vector<8x16x8xf32>
    %468 = arith.truncf %467 : vector<8x16x8xf32> to vector<8x16x8xbf16>
    %469 = vector.extract_strided_slice %432 {offsets = [0, 0], sizes = [16, 8], strides = [1, 1]} : vector<16x64xf32> to vector<16x8xf32>
    %470 = vector.extract_strided_slice %432 {offsets = [0, 8], sizes = [16, 8], strides = [1, 1]} : vector<16x64xf32> to vector<16x8xf32>
    %471 = vector.extract_strided_slice %432 {offsets = [0, 16], sizes = [16, 8], strides = [1, 1]} : vector<16x64xf32> to vector<16x8xf32>
    %472 = vector.extract_strided_slice %432 {offsets = [0, 24], sizes = [16, 8], strides = [1, 1]} : vector<16x64xf32> to vector<16x8xf32>
    %473 = vector.extract_strided_slice %432 {offsets = [0, 32], sizes = [16, 8], strides = [1, 1]} : vector<16x64xf32> to vector<16x8xf32>
    %474 = vector.extract_strided_slice %432 {offsets = [0, 40], sizes = [16, 8], strides = [1, 1]} : vector<16x64xf32> to vector<16x8xf32>
    %475 = vector.extract_strided_slice %432 {offsets = [0, 48], sizes = [16, 8], strides = [1, 1]} : vector<16x64xf32> to vector<16x8xf32>
    %476 = vector.extract_strided_slice %432 {offsets = [0, 56], sizes = [16, 8], strides = [1, 1]} : vector<16x64xf32> to vector<16x8xf32>
    %477 = vector.shape_cast %469 : vector<16x8xf32> to vector<1x16x8xf32>
    %478 = vector.shape_cast %470 : vector<16x8xf32> to vector<1x16x8xf32>
    %479 = vector.shape_cast %471 : vector<16x8xf32> to vector<1x16x8xf32>
    %480 = vector.shape_cast %472 : vector<16x8xf32> to vector<1x16x8xf32>
    %481 = vector.shape_cast %473 : vector<16x8xf32> to vector<1x16x8xf32>
    %482 = vector.shape_cast %474 : vector<16x8xf32> to vector<1x16x8xf32>
    %483 = vector.shape_cast %475 : vector<16x8xf32> to vector<1x16x8xf32>
    %484 = vector.shape_cast %476 : vector<16x8xf32> to vector<1x16x8xf32>
    %485 = tpu.concatenate %477, %478, %479, %480, %481, %482, %483, %484 in 0 : vector<1x16x8xf32>, vector<1x16x8xf32>, vector<1x16x8xf32>, vector<1x16x8xf32>, vector<1x16x8xf32>, vector<1x16x8xf32>, vector<1x16x8xf32>, vector<1x16x8xf32> -> vector<8x16x8xf32>
    %486 = arith.truncf %485 : vector<8x16x8xf32> to vector<8x16x8xbf16>
    "tpu.trace_start"() <{level = 10 : i32, message = "hqd,hkd->hqk"}> : () -> ()
    %cst_102 = arith.constant dense<0.000000e+00> : vector<8x8x16xf32>
    %487 = tpu.matmul %450, %468, %cst_102 {dimension_numbers = #tpu.dot_dimension_numbers<[2], [2], [1], [1], [0, 0, 0, 1, 1, 1], [0], [0]>} : vector<8x8x8xbf16>, vector<8x16x8xbf16>, vector<8x8x16xf32> -> vector<8x8x16xf32>
    "tpu.trace_stop"() : () -> ()
    %cst_103 = arith.constant dense<0xFF800000> : vector<8x8xf32>
    %488 = vector.multi_reduction <maximumf>, %487, %cst_103 [2] : vector<8x8x16xf32> to vector<8x8xf32>
    %489 = vector.shape_cast %488 : vector<8x8xf32> to vector<8x8x1xf32>
    %490 = vector.broadcast %489 : vector<8x8x1xf32> to vector<8x8x16xf32>
    %491 = arith.subf %487, %490 : vector<8x8x16xf32>
    %492 = math.exp %491 : vector<8x8x16xf32>
    %cst_104 = arith.constant dense<0.000000e+00> : vector<8x8xf32>
    %493 = vector.multi_reduction <add>, %492, %cst_104 [2] : vector<8x8x16xf32> to vector<8x8xf32>
    %494 = vector.shape_cast %493 : vector<8x8xf32> to vector<8x8x1xf32>
    %495 = vector.broadcast %494 : vector<8x8x1xf32> to vector<8x8x16xf32>
    %496 = arith.divf %492, %495 : vector<8x8x16xf32>
    %497 = arith.truncf %496 : vector<8x8x16xf32> to vector<8x8x16xbf16>
    "tpu.trace_start"() <{level = 10 : i32, message = "hqk,hkd->hqd"}> : () -> ()
    %cst_105 = arith.constant dense<0.000000e+00> : vector<8x8x8xf32>
    %498 = tpu.matmul %497, %486, %cst_105 {dimension_numbers = #tpu.dot_dimension_numbers<[2], [1], [1], [2], [0, 0, 0, 1, 1, 2], [0], [0]>} : vector<8x8x16xbf16>, vector<8x16x8xbf16>, vector<8x8x8xf32> -> vector<8x8x8xf32>
    "tpu.trace_stop"() : () -> ()
    %499 = vector.extract_strided_slice %498 {offsets = [0, 0, 0], sizes = [1, 8, 8], strides = [1, 1, 1]} : vector<8x8x8xf32> to vector<1x8x8xf32>
    %500 = vector.shape_cast %499 : vector<1x8x8xf32> to vector<8x8xf32>
    %501 = vector.extract_strided_slice %498 {offsets = [1, 0, 0], sizes = [1, 8, 8], strides = [1, 1, 1]} : vector<8x8x8xf32> to vector<1x8x8xf32>
    %502 = vector.shape_cast %501 : vector<1x8x8xf32> to vector<8x8xf32>
    %503 = vector.extract_strided_slice %498 {offsets = [2, 0, 0], sizes = [1, 8, 8], strides = [1, 1, 1]} : vector<8x8x8xf32> to vector<1x8x8xf32>
    %504 = vector.shape_cast %503 : vector<1x8x8xf32> to vector<8x8xf32>
    %505 = vector.extract_strided_slice %498 {offsets = [3, 0, 0], sizes = [1, 8, 8], strides = [1, 1, 1]} : vector<8x8x8xf32> to vector<1x8x8xf32>
    %506 = vector.shape_cast %505 : vector<1x8x8xf32> to vector<8x8xf32>
    %507 = vector.extract_strided_slice %498 {offsets = [4, 0, 0], sizes = [1, 8, 8], strides = [1, 1, 1]} : vector<8x8x8xf32> to vector<1x8x8xf32>
    %508 = vector.shape_cast %507 : vector<1x8x8xf32> to vector<8x8xf32>
    %509 = vector.extract_strided_slice %498 {offsets = [5, 0, 0], sizes = [1, 8, 8], strides = [1, 1, 1]} : vector<8x8x8xf32> to vector<1x8x8xf32>
    %510 = vector.shape_cast %509 : vector<1x8x8xf32> to vector<8x8xf32>
    %511 = vector.extract_strided_slice %498 {offsets = [6, 0, 0], sizes = [1, 8, 8], strides = [1, 1, 1]} : vector<8x8x8xf32> to vector<1x8x8xf32>
    %512 = vector.shape_cast %511 : vector<1x8x8xf32> to vector<8x8xf32>
    %513 = vector.extract_strided_slice %498 {offsets = [7, 0, 0], sizes = [1, 8, 8], strides = [1, 1, 1]} : vector<8x8x8xf32> to vector<1x8x8xf32>
    %514 = vector.shape_cast %513 : vector<1x8x8xf32> to vector<8x8xf32>
    %515 = tpu.concatenate %500, %502, %504, %506, %508, %510, %512, %514 in 1 : vector<8x8xf32>, vector<8x8xf32>, vector<8x8xf32>, vector<8x8xf32>, vector<8x8xf32>, vector<8x8xf32>, vector<8x8xf32>, vector<8x8xf32> -> vector<8x64xf32>
    %516 = arith.truncf %515 : vector<8x64xf32> to vector<8x64xbf16>
    %cst_106 = arith.constant dense<0.000000e+00> : vector<8x64xf32>
    %517 = tpu.matmul %516, %411, %cst_106 {dimension_numbers = #tpu.dot_dimension_numbers<[1], [0], [0], [1], [0, 0, 1, 1], [], []>} : vector<8x64xbf16>, vector<64x64xbf16>, vector<8x64xf32> -> vector<8x64xf32>
    %518 = vector.extract_strided_slice %415 {offsets = [0, 64], sizes = [1, 64], strides = [1, 1]} : vector<1x128xf32> to vector<1x64xf32>
    %519 = vector.broadcast %518 : vector<1x64xf32> to vector<8x64xf32>
    %520 = arith.addf %517, %519 : vector<8x64xf32>
    %521 = vector.extract_strided_slice %496 {offsets = [0, 0, 0], sizes = [4, 8, 16], strides = [1, 1, 1]} : vector<8x8x16xf32> to vector<4x8x16xf32>
    %cst_107 = arith.constant dense<0.000000e+00> : vector<8x16xf32>
    %522 = vector.multi_reduction <add>, %521, %cst_107 [0] : vector<4x8x16xf32> to vector<8x16xf32>
    %cst_108 = arith.constant 4.000000e+00 : f32
    %523 = vector.broadcast %cst_108 : f32 to vector<8x16xf32>
    %524 = arith.divf %522, %523 : vector<8x16xf32>
    %525 = vector.extract_strided_slice %496 {offsets = [4, 0, 0], sizes = [4, 8, 16], strides = [1, 1, 1]} : vector<8x8x16xf32> to vector<4x8x16xf32>
    %cst_109 = arith.constant dense<0.000000e+00> : vector<8x16xf32>
    %526 = vector.multi_reduction <add>, %525, %cst_109 [0] : vector<4x8x16xf32> to vector<8x16xf32>
    %cst_110 = arith.constant 4.000000e+00 : f32
    %527 = vector.broadcast %cst_110 : f32 to vector<8x16xf32>
    %528 = arith.divf %526, %527 : vector<8x16xf32>
    %529 = vector.extract_strided_slice %17 {offsets = [14, 0], sizes = [1, 128], strides = [1, 1]} : vector<17x128xf32> to vector<1x128xf32>
    %530 = arith.addf %403, %520 : vector<8x64xf32>
    %531 = vector.extract_strided_slice %530 {offsets = [0, 0], sizes = [8, 32], strides = [1, 1]} : vector<8x64xf32> to vector<8x32xf32>
    %cst_111 = arith.constant dense<0.000000e+00> : vector<8xf32>
    %532 = vector.multi_reduction <add>, %531, %cst_111 [1] : vector<8x32xf32> to vector<8xf32>
    %533 = vector.shape_cast %532 : vector<8xf32> to vector<8x1xf32>
    %cst_112 = arith.constant 3.200000e+01 : f32
    %534 = vector.broadcast %cst_112 : f32 to vector<8x1xf32>
    %535 = arith.divf %533, %534 : vector<8x1xf32>
    %536 = vector.broadcast %535 : vector<8x1xf32> to vector<8x32xf32>
    %537 = arith.subf %531, %536 : vector<8x32xf32>
    %538 = arith.mulf %537, %537 : vector<8x32xf32>
    %cst_113 = arith.constant dense<0.000000e+00> : vector<8xf32>
    %539 = vector.multi_reduction <add>, %538, %cst_113 [1] : vector<8x32xf32> to vector<8xf32>
    %540 = vector.shape_cast %539 : vector<8xf32> to vector<8x1xf32>
    %cst_114 = arith.constant 3.200000e+01 : f32
    %541 = vector.broadcast %cst_114 : f32 to vector<8x1xf32>
    %542 = arith.divf %540, %541 : vector<8x1xf32>
    %543 = vector.broadcast %535 : vector<8x1xf32> to vector<8x32xf32>
    %544 = arith.subf %531, %543 : vector<8x32xf32>
    %cst_115 = arith.constant 9.99999974E-6 : f32
    %545 = vector.broadcast %cst_115 : f32 to vector<8x1xf32>
    %546 = arith.addf %542, %545 : vector<8x1xf32>
    %547 = math.rsqrt %546 : vector<8x1xf32>
    %548 = vector.broadcast %547 : vector<8x1xf32> to vector<8x32xf32>
    %549 = arith.mulf %544, %548 : vector<8x32xf32>
    %550 = vector.extract_strided_slice %530 {offsets = [0, 32], sizes = [8, 32], strides = [1, 1]} : vector<8x64xf32> to vector<8x32xf32>
    %cst_116 = arith.constant dense<0.000000e+00> : vector<8xf32>
    %551 = vector.multi_reduction <add>, %550, %cst_116 [1] : vector<8x32xf32> to vector<8xf32>
    %552 = vector.shape_cast %551 : vector<8xf32> to vector<8x1xf32>
    %cst_117 = arith.constant 3.200000e+01 : f32
    %553 = vector.broadcast %cst_117 : f32 to vector<8x1xf32>
    %554 = arith.divf %552, %553 : vector<8x1xf32>
    %555 = vector.broadcast %554 : vector<8x1xf32> to vector<8x32xf32>
    %556 = arith.subf %550, %555 : vector<8x32xf32>
    %557 = arith.mulf %556, %556 : vector<8x32xf32>
    %cst_118 = arith.constant dense<0.000000e+00> : vector<8xf32>
    %558 = vector.multi_reduction <add>, %557, %cst_118 [1] : vector<8x32xf32> to vector<8xf32>
    %559 = vector.shape_cast %558 : vector<8xf32> to vector<8x1xf32>
    %cst_119 = arith.constant 3.200000e+01 : f32
    %560 = vector.broadcast %cst_119 : f32 to vector<8x1xf32>
    %561 = arith.divf %559, %560 : vector<8x1xf32>
    %562 = vector.broadcast %554 : vector<8x1xf32> to vector<8x32xf32>
    %563 = arith.subf %550, %562 : vector<8x32xf32>
    %cst_120 = arith.constant 9.99999974E-6 : f32
    %564 = vector.broadcast %cst_120 : f32 to vector<8x1xf32>
    %565 = arith.addf %561, %564 : vector<8x1xf32>
    %566 = math.rsqrt %565 : vector<8x1xf32>
    %567 = vector.broadcast %566 : vector<8x1xf32> to vector<8x32xf32>
    %568 = arith.mulf %563, %567 : vector<8x32xf32>
    %569 = tpu.concatenate %549, %568 in 1 : vector<8x32xf32>, vector<8x32xf32> -> vector<8x64xf32>
    %570 = vector.extract_strided_slice %529 {offsets = [0, 0], sizes = [1, 64], strides = [1, 1]} : vector<1x128xf32> to vector<1x64xf32>
    %571 = vector.broadcast %570 : vector<1x64xf32> to vector<8x64xf32>
    %572 = arith.mulf %569, %571 : vector<8x64xf32>
    %573 = vector.extract_strided_slice %529 {offsets = [0, 64], sizes = [1, 64], strides = [1, 1]} : vector<1x128xf32> to vector<1x64xf32>
    %574 = vector.broadcast %573 : vector<1x64xf32> to vector<8x64xf32>
    %575 = arith.addf %572, %574 : vector<8x64xf32>
    %576 = tpu.concatenate %11, %11 in 1 : vector<8x32xf32>, vector<8x32xf32> -> vector<8x64xf32>
    %577 = arith.addf %575, %576 : vector<8x64xf32>
    %578 = arith.addf %268, %9 : vector<8x32xf32>
    %c0_121 = arith.constant 0 : index
    %c0_122 = arith.constant 0 : index
    %c0_123 = arith.constant 0 : index
    %579 = vector.load %arg10[%c0_121, %c0_122, %c0_123] : memref<1x64x128xbf16, #tpu.memory_space<vmem>>, vector<1x64x128xbf16>
    %580 = vector.shape_cast %579 : vector<1x64x128xbf16> to vector<64x128xbf16>
    %581 = vector.extract_strided_slice %580 {offsets = [0, 64], sizes = [64, 64], strides = [1, 1]} : vector<64x128xbf16> to vector<64x64xbf16>
    %c0_124 = arith.constant 0 : index
    %c0_125 = arith.constant 0 : index
    %c0_126 = arith.constant 0 : index
    %582 = vector.load %arg11[%c0_124, %c0_125, %c0_126] : memref<1x64x128xbf16, #tpu.memory_space<vmem>>, vector<1x64x128xbf16>
    %583 = vector.shape_cast %582 : vector<1x64x128xbf16> to vector<64x128xbf16>
    %584 = vector.extract_strided_slice %583 {offsets = [0, 64], sizes = [64, 64], strides = [1, 1]} : vector<64x128xbf16> to vector<64x64xbf16>
    %c0_127 = arith.constant 0 : index
    %c1_128 = arith.constant 1 : index
    %c0_129 = arith.constant 0 : index
    %c0_130 = arith.constant 0 : index
    %585 = vector.load %arg12[%c0_127, %c1_128, %c0_129, %c0_130] : memref<1x2x32x128xbf16, #tpu.memory_space<vmem>>, vector<1x1x32x128xbf16>
    %586 = vector.shape_cast %585 : vector<1x1x32x128xbf16> to vector<32x128xbf16>
    %587 = vector.extract_strided_slice %17 {offsets = [5, 0], sizes = [1, 128], strides = [1, 1]} : vector<17x128xf32> to vector<1x128xf32>
    %588 = vector.extract_strided_slice %17 {offsets = [6, 0], sizes = [1, 128], strides = [1, 1]} : vector<17x128xf32> to vector<1x128xf32>
    %589 = arith.truncf %577 : vector<8x64xf32> to vector<8x64xbf16>
    %cst_131 = arith.constant dense<0.000000e+00> : vector<8x64xf32>
    %590 = tpu.matmul %589, %581, %cst_131 {dimension_numbers = #tpu.dot_dimension_numbers<[1], [0], [0], [1], [0, 0, 1, 1], [], []>} : vector<8x64xbf16>, vector<64x64xbf16>, vector<8x64xf32> -> vector<8x64xf32>
    %591 = vector.extract_strided_slice %587 {offsets = [0, 0], sizes = [1, 64], strides = [1, 1]} : vector<1x128xf32> to vector<1x64xf32>
    %592 = vector.broadcast %591 : vector<1x64xf32> to vector<8x64xf32>
    %593 = arith.addf %590, %592 : vector<8x64xf32>
    %594 = vector.extract_strided_slice %586 {offsets = [0, 0], sizes = [32, 64], strides = [1, 1]} : vector<32x128xbf16> to vector<32x64xbf16>
    %595 = arith.truncf %578 : vector<8x32xf32> to vector<8x32xbf16>
    %cst_132 = arith.constant dense<0.000000e+00> : vector<8x64xf32>
    %596 = tpu.matmul %595, %594, %cst_132 {dimension_numbers = #tpu.dot_dimension_numbers<[1], [0], [0], [1], [0, 0, 1, 1], [], []>} : vector<8x32xbf16>, vector<32x64xbf16>, vector<8x64xf32> -> vector<8x64xf32>
    %597 = vector.extract_strided_slice %587 {offsets = [0, 64], sizes = [1, 64], strides = [1, 1]} : vector<1x128xf32> to vector<1x64xf32>
    %598 = vector.broadcast %597 : vector<1x64xf32> to vector<8x64xf32>
    %599 = arith.addf %596, %598 : vector<8x64xf32>
    %600 = vector.extract_strided_slice %586 {offsets = [0, 64], sizes = [32, 64], strides = [1, 1]} : vector<32x128xbf16> to vector<32x64xbf16>
    %601 = arith.truncf %268 : vector<8x32xf32> to vector<8x32xbf16>
    %cst_133 = arith.constant dense<0.000000e+00> : vector<8x64xf32>
    %602 = tpu.matmul %601, %600, %cst_133 {dimension_numbers = #tpu.dot_dimension_numbers<[1], [0], [0], [1], [0, 0, 1, 1], [], []>} : vector<8x32xbf16>, vector<32x64xbf16>, vector<8x64xf32> -> vector<8x64xf32>
    %603 = vector.extract_strided_slice %588 {offsets = [0, 0], sizes = [1, 64], strides = [1, 1]} : vector<1x128xf32> to vector<1x64xf32>
    %604 = vector.broadcast %603 : vector<1x64xf32> to vector<8x64xf32>
    %605 = arith.addf %602, %604 : vector<8x64xf32>
    %606 = vector.extract_strided_slice %593 {offsets = [0, 0], sizes = [8, 8], strides = [1, 1]} : vector<8x64xf32> to vector<8x8xf32>
    %607 = vector.extract_strided_slice %593 {offsets = [0, 8], sizes = [8, 8], strides = [1, 1]} : vector<8x64xf32> to vector<8x8xf32>
    %608 = vector.extract_strided_slice %593 {offsets = [0, 16], sizes = [8, 8], strides = [1, 1]} : vector<8x64xf32> to vector<8x8xf32>
    %609 = vector.extract_strided_slice %593 {offsets = [0, 24], sizes = [8, 8], strides = [1, 1]} : vector<8x64xf32> to vector<8x8xf32>
    %610 = vector.extract_strided_slice %593 {offsets = [0, 32], sizes = [8, 8], strides = [1, 1]} : vector<8x64xf32> to vector<8x8xf32>
    %611 = vector.extract_strided_slice %593 {offsets = [0, 40], sizes = [8, 8], strides = [1, 1]} : vector<8x64xf32> to vector<8x8xf32>
    %612 = vector.extract_strided_slice %593 {offsets = [0, 48], sizes = [8, 8], strides = [1, 1]} : vector<8x64xf32> to vector<8x8xf32>
    %613 = vector.extract_strided_slice %593 {offsets = [0, 56], sizes = [8, 8], strides = [1, 1]} : vector<8x64xf32> to vector<8x8xf32>
    %614 = vector.shape_cast %606 : vector<8x8xf32> to vector<1x8x8xf32>
    %615 = vector.shape_cast %607 : vector<8x8xf32> to vector<1x8x8xf32>
    %616 = vector.shape_cast %608 : vector<8x8xf32> to vector<1x8x8xf32>
    %617 = vector.shape_cast %609 : vector<8x8xf32> to vector<1x8x8xf32>
    %618 = vector.shape_cast %610 : vector<8x8xf32> to vector<1x8x8xf32>
    %619 = vector.shape_cast %611 : vector<8x8xf32> to vector<1x8x8xf32>
    %620 = vector.shape_cast %612 : vector<8x8xf32> to vector<1x8x8xf32>
    %621 = vector.shape_cast %613 : vector<8x8xf32> to vector<1x8x8xf32>
    %622 = tpu.concatenate %614, %615, %616, %617, %618, %619, %620, %621 in 0 : vector<1x8x8xf32>, vector<1x8x8xf32>, vector<1x8x8xf32>, vector<1x8x8xf32>, vector<1x8x8xf32>, vector<1x8x8xf32>, vector<1x8x8xf32>, vector<1x8x8xf32> -> vector<8x8x8xf32>
    %623 = arith.truncf %622 : vector<8x8x8xf32> to vector<8x8x8xbf16>
    %624 = vector.extract_strided_slice %599 {offsets = [0, 0], sizes = [8, 8], strides = [1, 1]} : vector<8x64xf32> to vector<8x8xf32>
    %625 = vector.extract_strided_slice %599 {offsets = [0, 8], sizes = [8, 8], strides = [1, 1]} : vector<8x64xf32> to vector<8x8xf32>
    %626 = vector.extract_strided_slice %599 {offsets = [0, 16], sizes = [8, 8], strides = [1, 1]} : vector<8x64xf32> to vector<8x8xf32>
    %627 = vector.extract_strided_slice %599 {offsets = [0, 24], sizes = [8, 8], strides = [1, 1]} : vector<8x64xf32> to vector<8x8xf32>
    %628 = vector.extract_strided_slice %599 {offsets = [0, 32], sizes = [8, 8], strides = [1, 1]} : vector<8x64xf32> to vector<8x8xf32>
    %629 = vector.extract_strided_slice %599 {offsets = [0, 40], sizes = [8, 8], strides = [1, 1]} : vector<8x64xf32> to vector<8x8xf32>
    %630 = vector.extract_strided_slice %599 {offsets = [0, 48], sizes = [8, 8], strides = [1, 1]} : vector<8x64xf32> to vector<8x8xf32>
    %631 = vector.extract_strided_slice %599 {offsets = [0, 56], sizes = [8, 8], strides = [1, 1]} : vector<8x64xf32> to vector<8x8xf32>
    %632 = vector.shape_cast %624 : vector<8x8xf32> to vector<1x8x8xf32>
    %633 = vector.shape_cast %625 : vector<8x8xf32> to vector<1x8x8xf32>
    %634 = vector.shape_cast %626 : vector<8x8xf32> to vector<1x8x8xf32>
    %635 = vector.shape_cast %627 : vector<8x8xf32> to vector<1x8x8xf32>
    %636 = vector.shape_cast %628 : vector<8x8xf32> to vector<1x8x8xf32>
    %637 = vector.shape_cast %629 : vector<8x8xf32> to vector<1x8x8xf32>
    %638 = vector.shape_cast %630 : vector<8x8xf32> to vector<1x8x8xf32>
    %639 = vector.shape_cast %631 : vector<8x8xf32> to vector<1x8x8xf32>
    %640 = tpu.concatenate %632, %633, %634, %635, %636, %637, %638, %639 in 0 : vector<1x8x8xf32>, vector<1x8x8xf32>, vector<1x8x8xf32>, vector<1x8x8xf32>, vector<1x8x8xf32>, vector<1x8x8xf32>, vector<1x8x8xf32>, vector<1x8x8xf32> -> vector<8x8x8xf32>
    %641 = arith.truncf %640 : vector<8x8x8xf32> to vector<8x8x8xbf16>
    %642 = vector.extract_strided_slice %605 {offsets = [0, 0], sizes = [8, 8], strides = [1, 1]} : vector<8x64xf32> to vector<8x8xf32>
    %643 = vector.extract_strided_slice %605 {offsets = [0, 8], sizes = [8, 8], strides = [1, 1]} : vector<8x64xf32> to vector<8x8xf32>
    %644 = vector.extract_strided_slice %605 {offsets = [0, 16], sizes = [8, 8], strides = [1, 1]} : vector<8x64xf32> to vector<8x8xf32>
    %645 = vector.extract_strided_slice %605 {offsets = [0, 24], sizes = [8, 8], strides = [1, 1]} : vector<8x64xf32> to vector<8x8xf32>
    %646 = vector.extract_strided_slice %605 {offsets = [0, 32], sizes = [8, 8], strides = [1, 1]} : vector<8x64xf32> to vector<8x8xf32>
    %647 = vector.extract_strided_slice %605 {offsets = [0, 40], sizes = [8, 8], strides = [1, 1]} : vector<8x64xf32> to vector<8x8xf32>
    %648 = vector.extract_strided_slice %605 {offsets = [0, 48], sizes = [8, 8], strides = [1, 1]} : vector<8x64xf32> to vector<8x8xf32>
    %649 = vector.extract_strided_slice %605 {offsets = [0, 56], sizes = [8, 8], strides = [1, 1]} : vector<8x64xf32> to vector<8x8xf32>
    %650 = vector.shape_cast %642 : vector<8x8xf32> to vector<1x8x8xf32>
    %651 = vector.shape_cast %643 : vector<8x8xf32> to vector<1x8x8xf32>
    %652 = vector.shape_cast %644 : vector<8x8xf32> to vector<1x8x8xf32>
    %653 = vector.shape_cast %645 : vector<8x8xf32> to vector<1x8x8xf32>
    %654 = vector.shape_cast %646 : vector<8x8xf32> to vector<1x8x8xf32>
    %655 = vector.shape_cast %647 : vector<8x8xf32> to vector<1x8x8xf32>
    %656 = vector.shape_cast %648 : vector<8x8xf32> to vector<1x8x8xf32>
    %657 = vector.shape_cast %649 : vector<8x8xf32> to vector<1x8x8xf32>
    %658 = tpu.concatenate %650, %651, %652, %653, %654, %655, %656, %657 in 0 : vector<1x8x8xf32>, vector<1x8x8xf32>, vector<1x8x8xf32>, vector<1x8x8xf32>, vector<1x8x8xf32>, vector<1x8x8xf32>, vector<1x8x8xf32>, vector<1x8x8xf32> -> vector<8x8x8xf32>
    %659 = arith.truncf %658 : vector<8x8x8xf32> to vector<8x8x8xbf16>
    "tpu.trace_start"() <{level = 10 : i32, message = "hqd,hkd->hqk"}> : () -> ()
    %cst_134 = arith.constant dense<0.000000e+00> : vector<8x8x8xf32>
    %660 = tpu.matmul %623, %641, %cst_134 {dimension_numbers = #tpu.dot_dimension_numbers<[2], [2], [1], [1], [0, 0, 0, 1, 1, 1], [0], [0]>} : vector<8x8x8xbf16>, vector<8x8x8xbf16>, vector<8x8x8xf32> -> vector<8x8x8xf32>
    "tpu.trace_stop"() : () -> ()
    %cst_135 = arith.constant dense<0xFF800000> : vector<8x8xf32>
    %661 = vector.multi_reduction <maximumf>, %660, %cst_135 [2] : vector<8x8x8xf32> to vector<8x8xf32>
    %662 = vector.shape_cast %661 : vector<8x8xf32> to vector<8x8x1xf32>
    %663 = vector.broadcast %662 : vector<8x8x1xf32> to vector<8x8x8xf32>
    %664 = arith.subf %660, %663 : vector<8x8x8xf32>
    %665 = math.exp %664 : vector<8x8x8xf32>
    %cst_136 = arith.constant dense<0.000000e+00> : vector<8x8xf32>
    %666 = vector.multi_reduction <add>, %665, %cst_136 [2] : vector<8x8x8xf32> to vector<8x8xf32>
    %667 = vector.shape_cast %666 : vector<8x8xf32> to vector<8x8x1xf32>
    %668 = tpu.reciprocal %667 {approx = true} : vector<8x8x1xf32> -> vector<8x8x1xf32>
    %669 = vector.broadcast %668 : vector<8x8x1xf32> to vector<8x8x8xf32>
    %670 = arith.mulf %665, %669 : vector<8x8x8xf32>
    %671 = arith.truncf %670 : vector<8x8x8xf32> to vector<8x8x8xbf16>
    "tpu.trace_start"() <{level = 10 : i32, message = "hqk,hkd->hqd"}> : () -> ()
    %cst_137 = arith.constant dense<0.000000e+00> : vector<8x8x8xf32>
    %672 = tpu.matmul %671, %659, %cst_137 {dimension_numbers = #tpu.dot_dimension_numbers<[2], [1], [1], [2], [0, 0, 0, 1, 1, 2], [0], [0]>} : vector<8x8x8xbf16>, vector<8x8x8xbf16>, vector<8x8x8xf32> -> vector<8x8x8xf32>
    "tpu.trace_stop"() : () -> ()
    %673 = vector.extract_strided_slice %672 {offsets = [0, 0, 0], sizes = [1, 8, 8], strides = [1, 1, 1]} : vector<8x8x8xf32> to vector<1x8x8xf32>
    %674 = vector.shape_cast %673 : vector<1x8x8xf32> to vector<8x8xf32>
    %675 = vector.extract_strided_slice %672 {offsets = [1, 0, 0], sizes = [1, 8, 8], strides = [1, 1, 1]} : vector<8x8x8xf32> to vector<1x8x8xf32>
    %676 = vector.shape_cast %675 : vector<1x8x8xf32> to vector<8x8xf32>
    %677 = vector.extract_strided_slice %672 {offsets = [2, 0, 0], sizes = [1, 8, 8], strides = [1, 1, 1]} : vector<8x8x8xf32> to vector<1x8x8xf32>
    %678 = vector.shape_cast %677 : vector<1x8x8xf32> to vector<8x8xf32>
    %679 = vector.extract_strided_slice %672 {offsets = [3, 0, 0], sizes = [1, 8, 8], strides = [1, 1, 1]} : vector<8x8x8xf32> to vector<1x8x8xf32>
    %680 = vector.shape_cast %679 : vector<1x8x8xf32> to vector<8x8xf32>
    %681 = vector.extract_strided_slice %672 {offsets = [4, 0, 0], sizes = [1, 8, 8], strides = [1, 1, 1]} : vector<8x8x8xf32> to vector<1x8x8xf32>
    %682 = vector.shape_cast %681 : vector<1x8x8xf32> to vector<8x8xf32>
    %683 = vector.extract_strided_slice %672 {offsets = [5, 0, 0], sizes = [1, 8, 8], strides = [1, 1, 1]} : vector<8x8x8xf32> to vector<1x8x8xf32>
    %684 = vector.shape_cast %683 : vector<1x8x8xf32> to vector<8x8xf32>
    %685 = vector.extract_strided_slice %672 {offsets = [6, 0, 0], sizes = [1, 8, 8], strides = [1, 1, 1]} : vector<8x8x8xf32> to vector<1x8x8xf32>
    %686 = vector.shape_cast %685 : vector<1x8x8xf32> to vector<8x8xf32>
    %687 = vector.extract_strided_slice %672 {offsets = [7, 0, 0], sizes = [1, 8, 8], strides = [1, 1, 1]} : vector<8x8x8xf32> to vector<1x8x8xf32>
    %688 = vector.shape_cast %687 : vector<1x8x8xf32> to vector<8x8xf32>
    %689 = tpu.concatenate %674, %676, %678, %680, %682, %684, %686, %688 in 1 : vector<8x8xf32>, vector<8x8xf32>, vector<8x8xf32>, vector<8x8xf32>, vector<8x8xf32>, vector<8x8xf32>, vector<8x8xf32>, vector<8x8xf32> -> vector<8x64xf32>
    %690 = arith.truncf %689 : vector<8x64xf32> to vector<8x64xbf16>
    %cst_138 = arith.constant dense<0.000000e+00> : vector<8x64xf32>
    %691 = tpu.matmul %690, %584, %cst_138 {dimension_numbers = #tpu.dot_dimension_numbers<[1], [0], [0], [1], [0, 0, 1, 1], [], []>} : vector<8x64xbf16>, vector<64x64xbf16>, vector<8x64xf32> -> vector<8x64xf32>
    %692 = vector.extract_strided_slice %588 {offsets = [0, 64], sizes = [1, 64], strides = [1, 1]} : vector<1x128xf32> to vector<1x64xf32>
    %693 = vector.broadcast %692 : vector<1x64xf32> to vector<8x64xf32>
    %694 = arith.addf %691, %693 : vector<8x64xf32>
    %695 = vector.extract_strided_slice %17 {offsets = [15, 0], sizes = [1, 128], strides = [1, 1]} : vector<17x128xf32> to vector<1x128xf32>
    %696 = arith.addf %575, %694 : vector<8x64xf32>
    %697 = vector.extract_strided_slice %696 {offsets = [0, 0], sizes = [8, 32], strides = [1, 1]} : vector<8x64xf32> to vector<8x32xf32>
    %cst_139 = arith.constant dense<0.000000e+00> : vector<8xf32>
    %698 = vector.multi_reduction <add>, %697, %cst_139 [1] : vector<8x32xf32> to vector<8xf32>
    %699 = vector.shape_cast %698 : vector<8xf32> to vector<8x1xf32>
    %cst_140 = arith.constant 3.200000e+01 : f32
    %700 = vector.broadcast %cst_140 : f32 to vector<8x1xf32>
    %701 = arith.divf %699, %700 : vector<8x1xf32>
    %702 = vector.broadcast %701 : vector<8x1xf32> to vector<8x32xf32>
    %703 = arith.subf %697, %702 : vector<8x32xf32>
    %704 = arith.mulf %703, %703 : vector<8x32xf32>
    %cst_141 = arith.constant dense<0.000000e+00> : vector<8xf32>
    %705 = vector.multi_reduction <add>, %704, %cst_141 [1] : vector<8x32xf32> to vector<8xf32>
    %706 = vector.shape_cast %705 : vector<8xf32> to vector<8x1xf32>
    %cst_142 = arith.constant 3.200000e+01 : f32
    %707 = vector.broadcast %cst_142 : f32 to vector<8x1xf32>
    %708 = arith.divf %706, %707 : vector<8x1xf32>
    %709 = vector.broadcast %701 : vector<8x1xf32> to vector<8x32xf32>
    %710 = arith.subf %697, %709 : vector<8x32xf32>
    %cst_143 = arith.constant 9.99999974E-6 : f32
    %711 = vector.broadcast %cst_143 : f32 to vector<8x1xf32>
    %712 = arith.addf %708, %711 : vector<8x1xf32>
    %713 = math.rsqrt %712 : vector<8x1xf32>
    %714 = vector.broadcast %713 : vector<8x1xf32> to vector<8x32xf32>
    %715 = arith.mulf %710, %714 : vector<8x32xf32>
    %716 = vector.extract_strided_slice %696 {offsets = [0, 32], sizes = [8, 32], strides = [1, 1]} : vector<8x64xf32> to vector<8x32xf32>
    %cst_144 = arith.constant dense<0.000000e+00> : vector<8xf32>
    %717 = vector.multi_reduction <add>, %716, %cst_144 [1] : vector<8x32xf32> to vector<8xf32>
    %718 = vector.shape_cast %717 : vector<8xf32> to vector<8x1xf32>
    %cst_145 = arith.constant 3.200000e+01 : f32
    %719 = vector.broadcast %cst_145 : f32 to vector<8x1xf32>
    %720 = arith.divf %718, %719 : vector<8x1xf32>
    %721 = vector.broadcast %720 : vector<8x1xf32> to vector<8x32xf32>
    %722 = arith.subf %716, %721 : vector<8x32xf32>
    %723 = arith.mulf %722, %722 : vector<8x32xf32>
    %cst_146 = arith.constant dense<0.000000e+00> : vector<8xf32>
    %724 = vector.multi_reduction <add>, %723, %cst_146 [1] : vector<8x32xf32> to vector<8xf32>
    %725 = vector.shape_cast %724 : vector<8xf32> to vector<8x1xf32>
    %cst_147 = arith.constant 3.200000e+01 : f32
    %726 = vector.broadcast %cst_147 : f32 to vector<8x1xf32>
    %727 = arith.divf %725, %726 : vector<8x1xf32>
    %728 = vector.broadcast %720 : vector<8x1xf32> to vector<8x32xf32>
    %729 = arith.subf %716, %728 : vector<8x32xf32>
    %cst_148 = arith.constant 9.99999974E-6 : f32
    %730 = vector.broadcast %cst_148 : f32 to vector<8x1xf32>
    %731 = arith.addf %727, %730 : vector<8x1xf32>
    %732 = math.rsqrt %731 : vector<8x1xf32>
    %733 = vector.broadcast %732 : vector<8x1xf32> to vector<8x32xf32>
    %734 = arith.mulf %729, %733 : vector<8x32xf32>
    %735 = tpu.concatenate %715, %734 in 1 : vector<8x32xf32>, vector<8x32xf32> -> vector<8x64xf32>
    %736 = vector.extract_strided_slice %695 {offsets = [0, 0], sizes = [1, 64], strides = [1, 1]} : vector<1x128xf32> to vector<1x64xf32>
    %737 = vector.broadcast %736 : vector<1x64xf32> to vector<8x64xf32>
    %738 = arith.mulf %735, %737 : vector<8x64xf32>
    %739 = vector.extract_strided_slice %695 {offsets = [0, 64], sizes = [1, 64], strides = [1, 1]} : vector<1x128xf32> to vector<1x64xf32>
    %740 = vector.broadcast %739 : vector<1x64xf32> to vector<8x64xf32>
    %741 = arith.addf %738, %740 : vector<8x64xf32>
    %c0_149 = arith.constant 0 : index
    %c0_150 = arith.constant 0 : index
    %c0_151 = arith.constant 0 : index
    %742 = vector.load %arg15[%c0_149, %c0_150, %c0_151] : memref<1x64x128xbf16, #tpu.memory_space<vmem>>, vector<1x64x128xbf16>
    %743 = vector.shape_cast %742 : vector<1x64x128xbf16> to vector<64x128xbf16>
    %744 = arith.truncf %741 : vector<8x64xf32> to vector<8x64xbf16>
    %cst_152 = arith.constant dense<0.000000e+00> : vector<8x128xf32>
    %745 = tpu.matmul %744, %743, %cst_152 {dimension_numbers = #tpu.dot_dimension_numbers<[1], [0], [0], [1], [0, 0, 1, 1], [], []>} : vector<8x64xbf16>, vector<64x128xbf16>, vector<8x128xf32> -> vector<8x128xf32>
    %746 = vector.extract_strided_slice %17 {offsets = [8, 0], sizes = [1, 128], strides = [1, 1]} : vector<17x128xf32> to vector<1x128xf32>
    %747 = vector.broadcast %746 : vector<1x128xf32> to vector<8x128xf32>
    %748 = arith.addf %745, %747 : vector<8x128xf32>
    %cst_153 = arith.constant 0.000000e+00 : f32
    %749 = vector.broadcast %cst_153 : f32 to vector<8x128xf32>
    %750 = arith.maximumf %748, %749 : vector<8x128xf32>
    %c0_154 = arith.constant 0 : index
    %c0_155 = arith.constant 0 : index
    %c0_156 = arith.constant 0 : index
    %751 = vector.load %arg16[%c0_154, %c0_155, %c0_156] : memref<1x128x64xbf16, #tpu.memory_space<vmem>>, vector<1x128x64xbf16>
    %752 = vector.shape_cast %751 : vector<1x128x64xbf16> to vector<128x64xbf16>
    %753 = arith.truncf %750 : vector<8x128xf32> to vector<8x128xbf16>
    %cst_157 = arith.constant dense<0.000000e+00> : vector<8x64xf32>
    %754 = tpu.matmul %753, %752, %cst_157 {dimension_numbers = #tpu.dot_dimension_numbers<[1], [0], [0], [1], [0, 0, 1, 1], [], []>} : vector<8x128xbf16>, vector<128x64xbf16>, vector<8x64xf32> -> vector<8x64xf32>
    %755 = vector.extract_strided_slice %17 {offsets = [9, 0], sizes = [1, 64], strides = [1, 1]} : vector<17x128xf32> to vector<1x64xf32>
    %756 = vector.broadcast %755 : vector<1x64xf32> to vector<8x64xf32>
    %757 = arith.addf %754, %756 : vector<8x64xf32>
    %758 = vector.extract_strided_slice %17 {offsets = [16, 0], sizes = [1, 128], strides = [1, 1]} : vector<17x128xf32> to vector<1x128xf32>
    %759 = arith.addf %741, %757 : vector<8x64xf32>
    %760 = vector.extract_strided_slice %759 {offsets = [0, 0], sizes = [8, 32], strides = [1, 1]} : vector<8x64xf32> to vector<8x32xf32>
    %cst_158 = arith.constant dense<0.000000e+00> : vector<8xf32>
    %761 = vector.multi_reduction <add>, %760, %cst_158 [1] : vector<8x32xf32> to vector<8xf32>
    %762 = vector.shape_cast %761 : vector<8xf32> to vector<8x1xf32>
    %cst_159 = arith.constant 3.200000e+01 : f32
    %763 = vector.broadcast %cst_159 : f32 to vector<8x1xf32>
    %764 = arith.divf %762, %763 : vector<8x1xf32>
    %765 = vector.broadcast %764 : vector<8x1xf32> to vector<8x32xf32>
    %766 = arith.subf %760, %765 : vector<8x32xf32>
    %767 = arith.mulf %766, %766 : vector<8x32xf32>
    %cst_160 = arith.constant dense<0.000000e+00> : vector<8xf32>
    %768 = vector.multi_reduction <add>, %767, %cst_160 [1] : vector<8x32xf32> to vector<8xf32>
    %769 = vector.shape_cast %768 : vector<8xf32> to vector<8x1xf32>
    %cst_161 = arith.constant 3.200000e+01 : f32
    %770 = vector.broadcast %cst_161 : f32 to vector<8x1xf32>
    %771 = arith.divf %769, %770 : vector<8x1xf32>
    %772 = vector.broadcast %764 : vector<8x1xf32> to vector<8x32xf32>
    %773 = arith.subf %760, %772 : vector<8x32xf32>
    %cst_162 = arith.constant 9.99999974E-6 : f32
    %774 = vector.broadcast %cst_162 : f32 to vector<8x1xf32>
    %775 = arith.addf %771, %774 : vector<8x1xf32>
    %776 = math.rsqrt %775 : vector<8x1xf32>
    %777 = vector.broadcast %776 : vector<8x1xf32> to vector<8x32xf32>
    %778 = arith.mulf %773, %777 : vector<8x32xf32>
    %779 = vector.extract_strided_slice %759 {offsets = [0, 32], sizes = [8, 32], strides = [1, 1]} : vector<8x64xf32> to vector<8x32xf32>
    %cst_163 = arith.constant dense<0.000000e+00> : vector<8xf32>
    %780 = vector.multi_reduction <add>, %779, %cst_163 [1] : vector<8x32xf32> to vector<8xf32>
    %781 = vector.shape_cast %780 : vector<8xf32> to vector<8x1xf32>
    %cst_164 = arith.constant 3.200000e+01 : f32
    %782 = vector.broadcast %cst_164 : f32 to vector<8x1xf32>
    %783 = arith.divf %781, %782 : vector<8x1xf32>
    %784 = vector.broadcast %783 : vector<8x1xf32> to vector<8x32xf32>
    %785 = arith.subf %779, %784 : vector<8x32xf32>
    %786 = arith.mulf %785, %785 : vector<8x32xf32>
    %cst_165 = arith.constant dense<0.000000e+00> : vector<8xf32>
    %787 = vector.multi_reduction <add>, %786, %cst_165 [1] : vector<8x32xf32> to vector<8xf32>
    %788 = vector.shape_cast %787 : vector<8xf32> to vector<8x1xf32>
    %cst_166 = arith.constant 3.200000e+01 : f32
    %789 = vector.broadcast %cst_166 : f32 to vector<8x1xf32>
    %790 = arith.divf %788, %789 : vector<8x1xf32>
    %791 = vector.broadcast %783 : vector<8x1xf32> to vector<8x32xf32>
    %792 = arith.subf %779, %791 : vector<8x32xf32>
    %cst_167 = arith.constant 9.99999974E-6 : f32
    %793 = vector.broadcast %cst_167 : f32 to vector<8x1xf32>
    %794 = arith.addf %790, %793 : vector<8x1xf32>
    %795 = math.rsqrt %794 : vector<8x1xf32>
    %796 = vector.broadcast %795 : vector<8x1xf32> to vector<8x32xf32>
    %797 = arith.mulf %792, %796 : vector<8x32xf32>
    %798 = tpu.concatenate %778, %797 in 1 : vector<8x32xf32>, vector<8x32xf32> -> vector<8x64xf32>
    %799 = vector.extract_strided_slice %758 {offsets = [0, 0], sizes = [1, 64], strides = [1, 1]} : vector<1x128xf32> to vector<1x64xf32>
    %800 = vector.broadcast %799 : vector<1x64xf32> to vector<8x64xf32>
    %801 = arith.mulf %798, %800 : vector<8x64xf32>
    %802 = vector.extract_strided_slice %758 {offsets = [0, 64], sizes = [1, 64], strides = [1, 1]} : vector<1x128xf32> to vector<1x64xf32>
    %803 = vector.broadcast %802 : vector<1x64xf32> to vector<8x64xf32>
    %804 = arith.addf %801, %803 : vector<8x64xf32>
    %c0_168 = arith.constant 0 : index
    %c0_169 = arith.constant 0 : index
    %805 = vector.load %arg19[%c0_168, %c0_169] : memref<8x32xf32, #tpu.memory_space<vmem>>, vector<8x32xf32>
    tpu.vector_store %arg19[%c0_168, %c0_169], %268 {strides = array<i32>} : memref<8x32xf32, #tpu.memory_space<vmem>>, vector<8x32xf32>,
    %c0_170 = arith.constant 0 : index
    %c0_171 = arith.constant 0 : index
    %806 = vector.load %arg20[%c0_170, %c0_171] : memref<8x64xf32, #tpu.memory_space<vmem>>, vector<8x64xf32>
    tpu.vector_store %arg20[%c0_170, %c0_171], %804 {strides = array<i32>} : memref<8x64xf32, #tpu.memory_space<vmem>>, vector<8x64xf32>,
    %807 = tpu.concatenate %268, %804, %524, %528 in 1 : vector<8x32xf32>, vector<8x64xf32>, vector<8x16xf32>, vector<8x16xf32> -> vector<8x128xf32>
    %c0_172 = arith.constant 0 : index
    %c0_173 = arith.constant 0 : index
    %c0_174 = arith.constant 0 : index
    %c0_175 = arith.constant 0 : index
    %808 = vector.load %arg18[%c0_172, %c0_173, %c0_174, %c0_175] : memref<1x1x8x128xf32, #tpu.memory_space<vmem>>, vector<1x1x8x128xf32>
    %809 = vector.shape_cast %808 : vector<1x1x8x128xf32> to vector<8x128xf32>
    %810 = vector.shape_cast %807 : vector<8x128xf32> to vector<1x1x8x128xf32>
    tpu.vector_store %arg18[%c0_172, %c0_173, %c0_174, %c0_175], %810 {strides = array<i32>} : memref<1x1x8x128xf32, #tpu.memory_space<vmem>>, vector<1x1x8x128xf32>,
    return
  }
  func.func @transform_0(%arg0: i32, %arg1: i32) -> (i32, i32, i32) {
    %c0_i32 = arith.constant 0 : i32
    %c0_i32_0 = arith.constant 0 : i32
    %c0_i32_1 = arith.constant 0 : i32
    return %arg0, %c0_i32, %c0_i32_0 : i32, i32, i32
  }
  func.func @transform_1(%arg0: i32, %arg1: i32) -> (i32, i32, i32) {
    %c0_i32 = arith.constant 0 : i32
    %c0_i32_0 = arith.constant 0 : i32
    %c0_i32_1 = arith.constant 0 : i32
    return %arg0, %c0_i32, %c0_i32_0 : i32, i32, i32
  }
  func.func @transform_2(%arg0: i32, %arg1: i32) -> (i32, i32, i32) {
    %c0_i32 = arith.constant 0 : i32
    %c0_i32_0 = arith.constant 0 : i32
    %c0_i32_1 = arith.constant 0 : i32
    return %arg0, %c0_i32, %c0_i32_0 : i32, i32, i32
  }
  func.func @transform_3(%arg0: i32, %arg1: i32) -> (i32, i32, i32) {
    %c0_i32 = arith.constant 0 : i32
    %c0_i32_0 = arith.constant 0 : i32
    %c0_i32_1 = arith.constant 0 : i32
    return %arg0, %c0_i32, %c0_i32_0 : i32, i32, i32
  }
  func.func @transform_4(%arg0: i32, %arg1: i32) -> (i32, i32, i32) {
    %c0_i32 = arith.constant 0 : i32
    %c0_i32_0 = arith.constant 0 : i32
    %c0_i32_1 = arith.constant 0 : i32
    return %arg0, %c0_i32, %c0_i32_0 : i32, i32, i32
  }
  func.func @transform_5(%arg0: i32, %arg1: i32) -> (i32, i32, i32) {
    %c0_i32 = arith.constant 0 : i32
    %c0_i32_0 = arith.constant 0 : i32
    %c0_i32_1 = arith.constant 0 : i32
    return %arg0, %c0_i32, %c0_i32_0 : i32, i32, i32
  }
  func.func @transform_6(%arg0: i32, %arg1: i32) -> (i32, i32, i32) {
    %c0_i32 = arith.constant 0 : i32
    %c0_i32_0 = arith.constant 0 : i32
    %c0_i32_1 = arith.constant 0 : i32
    %c0_i32_2 = arith.constant 0 : i32
    return %c0_i32, %c0_i32_0, %c0_i32_1 : i32, i32, i32
  }
  func.func @transform_7(%arg0: i32, %arg1: i32) -> (i32, i32, i32, i32) {
    %c0_i32 = arith.constant 0 : i32
    %c0_i32_0 = arith.constant 0 : i32
    %c0_i32_1 = arith.constant 0 : i32
    %c0_i32_2 = arith.constant 0 : i32
    return %arg1, %c0_i32, %c0_i32_0, %c0_i32_1 : i32, i32, i32, i32
  }
  func.func @transform_8(%arg0: i32, %arg1: i32) -> (i32, i32, i32) {
    %c0_i32 = arith.constant 0 : i32
    %c0_i32_0 = arith.constant 0 : i32
    %c0_i32_1 = arith.constant 0 : i32
    return %arg1, %c0_i32, %c0_i32_0 : i32, i32, i32
  }
  func.func @transform_9(%arg0: i32, %arg1: i32) -> (i32, i32, i32) {
    %c0_i32 = arith.constant 0 : i32
    %c0_i32_0 = arith.constant 0 : i32
    %c0_i32_1 = arith.constant 0 : i32
    return %arg1, %c0_i32, %c0_i32_0 : i32, i32, i32
  }
  func.func @transform_10(%arg0: i32, %arg1: i32) -> (i32, i32, i32, i32) {
    %c0_i32 = arith.constant 0 : i32
    %c0_i32_0 = arith.constant 0 : i32
    %c0_i32_1 = arith.constant 0 : i32
    %c0_i32_2 = arith.constant 0 : i32
    return %arg1, %c0_i32, %c0_i32_0, %c0_i32_1 : i32, i32, i32, i32
  }
  func.func @transform_11(%arg0: i32, %arg1: i32) -> (i32, i32, i32) {
    %c0_i32 = arith.constant 0 : i32
    %c0_i32_0 = arith.constant 0 : i32
    %c0_i32_1 = arith.constant 0 : i32
    return %arg1, %c0_i32, %c0_i32_0 : i32, i32, i32
  }
  func.func @transform_12(%arg0: i32, %arg1: i32) -> (i32, i32, i32) {
    %c0_i32 = arith.constant 0 : i32
    %c0_i32_0 = arith.constant 0 : i32
    %c0_i32_1 = arith.constant 0 : i32
    return %arg1, %c0_i32, %c0_i32_0 : i32, i32, i32
  }
  func.func @transform_13(%arg0: i32, %arg1: i32) -> (i32, i32, i32) {
    %c0_i32 = arith.constant 0 : i32
    %c0_i32_0 = arith.constant 0 : i32
    %c0_i32_1 = arith.constant 0 : i32
    return %arg1, %c0_i32, %c0_i32_0 : i32, i32, i32
  }
  func.func @transform_14(%arg0: i32, %arg1: i32) -> (i32, i32, i32) {
    %c0_i32 = arith.constant 0 : i32
    %c0_i32_0 = arith.constant 0 : i32
    %c0_i32_1 = arith.constant 0 : i32
    return %arg1, %c0_i32, %c0_i32_0 : i32, i32, i32
  }
  func.func @transform_15(%arg0: i32, %arg1: i32) -> (i32, i32, i32) {
    %c0_i32 = arith.constant 0 : i32
    %c0_i32_0 = arith.constant 0 : i32
    %c0_i32_1 = arith.constant 0 : i32
    return %arg1, %c0_i32, %c0_i32_0 : i32, i32, i32
  }
  func.func @transform_16(%arg0: i32, %arg1: i32) -> (i32, i32, i32, i32) {
    %c0_i32 = arith.constant 0 : i32
    %c0_i32_0 = arith.constant 0 : i32
    %c0_i32_1 = arith.constant 0 : i32
    return %arg1, %arg0, %c0_i32, %c0_i32_0 : i32, i32, i32, i32
  }
}

</mosaic_0001>

<bundles_post_ra>
// kernel: transformer_decoder.1
= control target key start
LH: loop header
LB: loop body
LE: loop exit
PB: predicated region body
PF: predicated region fallthrough
CT: control target
= control target key end

     0   :  { %s9769_s0 = inlined_call_operand.vmem [shape: f32[2,8,32], index: 0, kind: input, shape index: {}]   ;;  %s9770_s1 = inlined_call_operand.hbm [shape: f32[2,8,64], index: 1, kind: input, shape index: {}]   ;;  %s9771_s2 = inlined_call_operand.vmem [shape: f32[2,16,32], index: 2, kind: input, shape index: {}]   ;;  %s9772_s3 = inlined_call_operand.hbm [shape: f32[2,16,32], index: 3, kind: input, shape index: {}]   ;;  %s9773_s4 = inlined_call_operand.hbm [shape: f32[2,8,32], index: 4, kind: input, shape index: {}]   ;;  %s9774_s5 = inlined_call_operand.vmem [shape: f32[2,8,32], index: 5, kind: input, shape index: {}]   ;;  %s9775_s6 = inlined_call_operand.vmem [shape: f32[2,1,32], index: 6, kind: input, shape index: {}]   ;;  %s9776_s7 = inlined_call_operand.vmem [shape: bf16[2,3,32,128], index: 7, kind: input, shape index: {}]   ;;  %s9777_s8 = inlined_call_operand.vmem [shape: bf16[2,64,128], index: 8, kind: input, shape index: {}]   ;;  %s9778_s9 = inlined_call_operand.vmem [shape: bf16[2,64,128], index: 9, kind: input, shape index: {}]   ;;  %s9779_s10 = inlined_call_operand.vmem [shape: bf16[2,2,32,128], index: 10, kind: input, shape index: {}]   ;;  %s9780_s11 = inlined_call_operand.hbm [shape: bf16[2,32,64], index: 11, kind: input, shape index: {}]   ;;  %s9781_s12 = inlined_call_operand.vmem [shape: bf16[2,64,32], index: 12, kind: input, shape index: {}]   ;;  %s9782_s13 = inlined_call_operand.hbm [shape: bf16[2,64,128], index: 13, kind: input, shape index: {}]   ;;  %s9783_s14 = inlined_call_operand.vmem [shape: bf16[2,128,64], index: 14, kind: input, shape index: {}]   ;;  %s9784_s15 = inlined_call_operand.vmem [shape: f32[2,17,128], index: 15, kind: input, shape index: {}]   ;;  %s9785_s16 = inlined_call_operand.vmem [shape: f32[2,2,8,128], index: 16, kind: output, shape index: {}]  }
   0x1   :  { %9821 = sst [smem:[#allocation35_spill]] %s9769_s0 }
   0x2   :  { %9822 = sst [smem:[#allocation36_spill]] %s9770_s1 }
   0x3   :  { %9823 = sst [smem:[#allocation37_spill]] %s9771_s2 }
   0x4   :  { %9824 = sst [smem:[#allocation38_spill]] %s9772_s3 }
   0x5   :  { %9825 = sst [smem:[#allocation39_spill]] %s9773_s4 }
   0x6   :  { %9826 = sst [smem:[#allocation40_spill]] %s9774_s5 }
   0x7   :  { %9827 = sst [smem:[#allocation41_spill]] %s9775_s6 }
   0x8   :  { %9828 = sst [smem:[#allocation42_spill]] %s9776_s7 }
   0x9   :  { %9829 = sst [smem:[#allocation43_spill]] %s9777_s8 }
   0xa   :  { %9830 = sst [smem:[#allocation44_spill]] %s9778_s9 }
   0xb   :  { %9831 = sst [smem:[#allocation45_spill]] %s9779_s10 }
   0xc   :  { %9832 = sst [smem:[#allocation46_spill]] %s9780_s11 }
   0xd   :  { %9833 = sst [smem:[#allocation47_spill]] %s9781_s12 }
   0xe   :  { %9834 = sst [smem:[#allocation48_spill]] %s9782_s13 }
   0xf   :  { %9835 = sst [smem:[#allocation49_spill]] %s9783_s14 }
  0x10   :  { %9836 = sst [smem:[#allocation50_spill]] %s9784_s15 }
  0x11   :  { %9837 = sst [smem:[#allocation51_spill]] %s9785_s16 }
  0x12   :  { %21 = vsyncpa [#allocation6], 0 }
  0x13   :  { %23 = vsyncpa [#allocation6 + $0x1], 0 }
  0x14   :  { %24 = vsyncpa [#allocation8], 0 }
  0x15   :  { %26 = vsyncpa [#allocation8 + $0x1], 0 }
  0x16   :  { %27 = vsyncpa [#allocation11], 0 }
  0x17   :  { %29 = vsyncpa [#allocation11 + $0x1], 0  ;;  %s8268_s21 = smov 0   ;;  %s8270_s22 = smov 0  }
  0x18   :  { %s8272_s23 = smov 0   ;;  %s8274_s24 = smov 0  }
  0x19   :  { %s8276_s25 = smov 0   ;;  %s8278_s26 = smov 0  }
  0x1a   :  { %s8280_s27 = smov 0   ;;  %s8282_s28 = smov 0  }
  0x1b   :  { %s8284_s29 = smov 0   ;;  %s8286_s30 = smov 0  }
  0x1c   :  { %s8288_s0 = smov 0  }
  0x1d LB: > { %9838 = sst [smem:[#allocation16_spill]] %s8119_s22  ;;  %s9787_s17 = sadd.s32 4294967295, %s8155_s0   ;;  %s8155_s0 = sphi %s8288_s0, %s35_s0   ;;  %s8151_s30 = sphi %s8286_s30, %s9920_s30   ;;  %s8147_s29 = sphi %s8284_s29, %s9919_s29   ;;  %s8143_s28 = sphi %s8282_s28, %s9918_s28   ;;  %s8139_s27 = sphi %s8280_s27, %s9917_s27   ;;  %s8135_s26 = sphi %s8278_s26, %s9916_s26   ;;  %s8131_s25 = sphi %s8276_s25, %s9915_s25   ;;  %s8127_s24 = sphi %s8274_s24, %s9914_s24   ;;  %s8123_s23 = sphi %s8272_s23, %s9913_s23   ;;  %s8119_s22 = sphi %s8270_s22, %s9912_s22   ;;  %s8115_s21 = sphi %s8268_s21, %s9911_s21  }
  0x1e   : > { %9839 = sst [smem:[#allocation17_spill]] %s8123_s23  ;;  %p87_p0 = scmp.ne.s32.totalorder %s8135_s26, %s8131_s25 }
  0x1f   : > { %9840 = sst [smem:[#allocation18_spill]] %s8131_s25  ;;  %p9790_p1 = scmp.eq.s32.totalorder %s8155_s0, 0 }
  0x20   : > { %9841 = sst [smem:[#allocation19_spill]] %s8135_s26  ;;  %p93_p2 = scmp.ne.s32.totalorder %s8131_s25, %s8127_s24 }
  0x21   : > { %9842 = sst [smem:[#allocation20_spill]] %s8139_s27  ;;  %p8330_p3 = scmp.eq.s32.totalorder %s9787_s17, 0 }
  0x22   : > { %9843 = sst [smem:[#allocation21_spill]] %s8143_s28  ;;  %p89_p4 = por %p9790_p1, %p87_p0 }
  0x23   : > { %9844 = sst [smem:[#allocation22_spill]] %s8147_s29  ;;  %p9788_p5 = scmp.lt.s32.totalorder %s8155_s0, 4 }
  0x24   : > { %9845 = sst [smem:[#allocation23_spill]] %s8151_s30  ;;  %p8339_p6 = por %p8330_p3, %p93_p2 }
  0x25   : > { %9846 = sst [smem:[#allocation24_spill]] %s8155_s0  ;;  %s8344_s18 = sand.u32 1, %s8135_s26  }
  0x26   : > { %s9847_s20 = scalar_select %p8330_p3, 1, 0 }
  0x27   : > { %s9848_s6 = scalar_select %p8339_p6, 1, 0 }
  0x28   : > { %p8348_p7 = pnand %p9788_p5, %p89_p4  ;;  %s9789_s17 = sand.u32 1, %s8155_s0  }
  0x29   : > { %s6495_s19 = sshll.u32 %s8344_s18, 4  ;;  %s6670_s16 = sshll.u32 %s8151_s30, 8 }
  0x2a   : > { %s9849_s24 = scalar_select %p8348_p7, 1, 0 }
  0x2b   : > { %s544_s15 = scalar_lea.vmem [#allocation7], %s6495_s19  ;;  %s9850_s3 = sld [smem:[#allocation38_spill]] }
  0x2c   : > { %s551_s14 = sshll.u32 %s544_s15, 4  ;;  %s8364_s8 = scalar_lea.sflag [#allocation8], %s9789_s17  ;;  %s8360_s14 = int_to_ptr.vmem [resolvable:$true] %s551_s14 }
  0x2d   : > { %p8370_p9 = pneg %p8348_p7 }
  0x31   : > { %s8358_s9 = scalar_lea.hbm %s9850_s3, %s6670_s16  ;;  %s7912_s15 = scalar_lea.hbm %s9850_s3, 512 }
  0x32   : > { %s7907_s7 = scalar_lea.hbm %s8358_s9, 256  ;;  %p7913_p12 = scmp.lt.u32.totalorder %s8358_s9, %s9850_s3 }
  0x33   : > { %p7908_p8 = scmp.ne.s32.totalorder %s8358_s9, %s7907_s7  ;;  %p7914_p13 = scmp.lt.u32.totalorder %s7912_s15, %s7907_s7 }
  0x34   : > { %p7916_p2 = scmp.lt.u32.totalorder %s7907_s7, %s8358_s9 }
  0x35   : > { %p7910_p10 = pnand %p8370_p9, %p7908_p8  ;;  %p7915_p0 = por %p7914_p13, %p7913_p12 }
  0x37   : > { %p7911_p11 = pneg %p7910_p10  ;;  %p7917_p4 = por %p7916_p2, %p7915_p0 }
  0x39   : > { %p7918_p5 = pnand %p7917_p4, %p7911_p11 }
  0x3b   : > { %7921 = shalt.err (!%p7918_p5)
}
  0x3c   : > { %s7922_s17 = scalar_lea.vmem %s8360_s14, 256  ;;  %s8157_s10 = smov [#allocation7]  }
  0x3d   : > { %p7923_p8 = scmp.ne.s32.totalorder %s8360_s14, %s7922_s17  ;;  %s7927_s12 = sshll.u32 %s8157_s10, 4  ;;  %s7928_s12 = int_to_ptr.vmem [resolvable:$false] %s7927_s12 }
  0x3e   : > { %s7929_s5 = scalar_lea.vmem %s7928_s12, 512  ;;  %p7930_p6 = scmp.lt.s32.totalorder %s8360_s14, %s7928_s12 }
  0x3f   : > { %p7925_p10 = pnand %p7923_p8, %p8370_p9  ;;  %p7931_p3 = scmp.lt.s32.totalorder %s7929_s5, %s7922_s17 }
  0x41   : > { %p7926_p1 = pneg %p7925_p10  ;;  %p7932_p12 = por %p7931_p3, %p7930_p6 }
  0x43   : > { %p7933_p13 = pnand %p7932_p12, %p7926_p1 }
  0x45   : > { %7936 = shalt.err (!%p7933_p13)
}
  0x46   : > { %s8158_s7 = smov 128   ;;  %s8159_s17 = smov 8  }
  0x47   : > { %7441 = dma.hbm_to_vmem [thread:$0]  (!%p8348_p7), %s8358_s9, 256, %s8360_s14, %s8364_s8, %s8158_s7, %s8158_s7, %s8159_s17  }
  0x48   : > { %p6506_p1 = scmp.ge.s32.totalorder %s8155_s0, 1  ;;  %p682_p3 = scmp.lt.s32.totalorder %s8155_s0, 5 }
  0x49   : > { %s44_s16 = sadd.s32 1, %s8147_s29  ;;  %s335_s10 = sadd.s32 1, %s8123_s23 }
  0x4a   : > { %p8396_p5 = pnand %p6506_p1, %p682_p3  ;;  %p45_p6 = scmp.ge.s32.totalorder %s44_s16, 2 }
  0x4b   : > { %p342_p11 = scmp.ne.s32.totalorder %s8123_s23, %s8119_s22  ;;  %p348_p0 = scmp.ne.s32.totalorder %s8119_s22, %s8115_s21 }
  0x4c   : > { %s9852_s15 = scalar_select %p8396_p5, 1, 0 }
  0x4d   : > { %s9922_s16 = smov (%p45_p6, %s44_s16), 0  ;;  %s9854_s9 = sadd.s32 1, %s8151_s30 }
  0x4e   : > { %9853 = sst [smem:[#allocation25_spill]] %s9922_s16  ;;  %s9924_s9 = smov (!%p45_p6, %s9854_s9), %s8151_s30 }
  0x4f   : > { %s332_s14 = ssub.s32 %s8147_s29, %s9922_s16  ;;  %p9855_p2 = scmp.eq.s32.totalorder %s8155_s0, 0 }
  0x50   : > { %p49_p8 = scmp.ge.s32.totalorder %s9924_s9, 2  ;;  %p333_p10 = scmp.eq.s32.totalorder %s332_s14, 0 }
  0x51   : > { %p8415_p4 = por %p342_p11, %p9855_p2  ;;  %p9857_p12 = scmp.ne.s32.totalorder %s9847_s20, 0 }
  0x52   : > { %s9926_s9 = smov (%p49_p8, %s9924_s9), 0  ;;  %s620_s17 = sand.u32 1, %s8123_s23  }
  0x53   : > { %p8421_p13 = por %p348_p0, %p9857_p12  ;;  %9860 = sst [smem:[#allocation27_spill]] %s9926_s9 }
  0x54   : > { %s8428_s21 = scalar_select %p333_p10, %s8123_s23, %s335_s10  }
  0x55   : > { %s9858_s5 = scalar_select %p8421_p13, 1, 0 }
  0x56   : > { %9861 = sst [smem:[#allocation28_spill]] %s8428_s21  ;;  %s77_s7 = ssub.s32 %s8151_s30, %s9926_s9 }
  0x57   : > { %9859 = sst [smem:[#allocation26_spill]] %s9858_s5  ;;  %p78_p1 = scmp.eq.s32.totalorder %s77_s7, 0 }
  0x58   : > { %s6500_s3 = sshll.u32 %s620_s17, 4  ;;  %s6671_s16 = sshll.u32 %s8147_s29, 8 }
  0x59   : > { %s9862_s2 = sadd.s32 1, %s8135_s26  ;;  %s9864_s11 = sld [smem:[#allocation46_spill]] }
  0x5a   : > { %s8437_s27 = scalar_select %p78_p1, %s8135_s26, %s9862_s2  }
  0x5b   : > { %s622_s5 = scalar_lea.vmem [#allocation10], %s6500_s3  ;;  %p9865_p3 = scmp.lt.s32.totalorder %s8155_s0, 4 }
  0x5c   : > { %9863 = sst [smem:[#allocation29_spill]] %s8437_s27  ;;  %s629_s10 = sshll.u32 %s622_s5, 4  ;;  %s8444_s10 = int_to_ptr.vmem [resolvable:$true] %s629_s10 }
  0x5d   : > { %p8450_p6 = pnand %p9865_p3, %p8415_p4  ;;  %s8454_s2 = sshll.u32 %s620_s17, 5 }
  0x5f   : > { %s8442_s28 = scalar_lea.hbm %s9864_s11, %s6671_s16  ;;  %s9867_s16 = sand.u32 1, %s8155_s0  }
  0x60   : > { %s9866_s7 = scalar_select %p8450_p6, 1, 0 }
  0x61   : > { %s8458_s14 = scalar_lea.sflag [#allocation11], %s9867_s16  ;;  %s7937_s20 = scalar_lea.hbm %s8442_s28, 256 }
  0x62   : > { %p7938_p11 = scmp.ne.s32.totalorder %s8442_s28, %s7937_s20  ;;  %p9806_p0 = pneg %p8450_p6 }
  0x63   : > { %s7942_s5 = scalar_lea.hbm %s9864_s11, 512  ;;  %p7943_p4 = scmp.lt.u32.totalorder %s8442_s28, %s9864_s11 }
  0x64   : > { %p7940_p2 = pnand %p9806_p0, %p7938_p11  ;;  %p7944_p10 = scmp.lt.u32.totalorder %s7942_s5, %s7937_s20 }
  0x65   : > { %p7946_p1 = scmp.lt.u32.totalorder %s7937_s20, %s8442_s28 }
  0x66   : > { %p7941_p8 = pneg %p7940_p2  ;;  %p7945_p12 = por %p7944_p10, %p7943_p4 }
  0x68   : > { %p7947_p3 = por %p7946_p1, %p7945_p12 }
  0x6a   : > { %p7948_p13 = pnand %p7947_p3, %p7941_p8 }
  0x6c   : > { %7951 = shalt.err (!%p7948_p13)
}
  0x6d   : > { %s7952_s17 = scalar_lea.vmem %s8444_s10, 256  ;;  %s8160_s16 = smov [#allocation10]  }
  0x6e   : > { %p7953_p11 = scmp.ne.s32.totalorder %s8444_s10, %s7952_s17  ;;  %s7957_s3 = sshll.u32 %s8160_s16, 4  ;;  %s7958_s3 = int_to_ptr.vmem [resolvable:$false] %s7957_s3 }
  0x6f   : > { %s7959_s27 = scalar_lea.vmem %s7958_s3, 512  ;;  %p7960_p7 = scmp.lt.s32.totalorder %s8444_s10, %s7958_s3 }
  0x70   : > { %p7955_p2 = pnand %p7953_p11, %p9806_p0  ;;  %p7961_p4 = scmp.lt.s32.totalorder %s7959_s27, %s7952_s17 }
  0x72   : > { %p7956_p5 = pneg %p7955_p2  ;;  %p7962_p10 = por %p7961_p4, %p7960_p7 }
  0x74   : > { %p7963_p12 = pnand %p7962_p10, %p7956_p5 }
  0x76   : > { %7966 = shalt.err (!%p7963_p12)
}
  0x77   : > { %s9803_s9 = smov 64   ;;  %s9804_s20 = smov 4  }
  0x78   : > { %7447 = dma.hbm_to_vmem [thread:$0]  (!%p8450_p6), %s8442_s28, 256, %s8444_s10, %s8458_s14, %s9803_s9, %s9803_s9, %s9804_s20  }
  0x79   : > { %s651_s12 = scalar_lea.vmem [#allocation12], %s8454_s2  ;;  %s9805_s17 = sshll.u32 %s8344_s18, 3 }
  0x7a   : > { %s8490_s5 = sshll.u32 %s651_s12, 4  ;;  %s6494_s16 = sshll.u32 %s8151_s30, 7  ;;  %s8555_s5 = int_to_ptr.vmem [resolvable:$true] %s8490_s5 }
  0x7b   : > { %s9868_s1 = sld [smem:[#allocation36_spill]]  ;;  %s518_s26 = scalar_lea.vmem [#allocation5], %s9805_s17 }
  0x7c   : > { %s525_s21 = sshll.u32 %s518_s26, 4  ;;  %s515_s28 = scalar_lea.sflag [#allocation6], %s8344_s18  ;;  %s526_s21 = int_to_ptr.vmem [resolvable:$true] %s525_s21 }
  0x81   : > { %s8499_s11 = scalar_lea.hbm %s9868_s1, %s6494_s16  ;;  %s7972_s3 = scalar_lea.hbm %s9868_s1, 256 }
  0x82   : > { %s7967_s10 = scalar_lea.hbm %s8499_s11, 128  ;;  %p7973_p8 = scmp.lt.u32.totalorder %s8499_s11, %s9868_s1 }
  0x83   : > { %p7968_p7 = scmp.ne.s32.totalorder %s8499_s11, %s7967_s10  ;;  %p7974_p1 = scmp.lt.u32.totalorder %s7972_s3, %s7967_s10 }
  0x84   : > { %p7976_p11 = scmp.lt.u32.totalorder %s7967_s10, %s8499_s11 }
  0x85   : > { %p7970_p5 = pnand %p7968_p7, %p8370_p9  ;;  %p7975_p3 = por %p7974_p1, %p7973_p8 }
  0x87   : > { %p7971_p13 = pneg %p7970_p5  ;;  %p7977_p2 = por %p7976_p11, %p7975_p3 }
  0x89   : > { %p7978_p4 = pnand %p7977_p2, %p7971_p13 }
  0x8b   : > { %7981 = shalt.err (!%p7978_p4)
}
  0x8c   : > { %s7982_s26 = scalar_lea.vmem %s526_s21, 128  ;;  %s8163_s20 = smov [#allocation5]  }
  0x8d   : > { %p7983_p10 = scmp.ne.s32.totalorder %s526_s21, %s7982_s26  ;;  %s7987_s17 = sshll.u32 %s8163_s20, 4  ;;  %s7988_s17 = int_to_ptr.vmem [resolvable:$false] %s7987_s17 }
  0x8e   : > { %s7989_s2 = scalar_lea.vmem %s7988_s17, 256  ;;  %p7990_p5 = scmp.lt.s32.totalorder %s526_s21, %s7988_s17 }
  0x8f   : > { %p7985_p12 = pnand %p7983_p10, %p8370_p9  ;;  %p7991_p0 = scmp.lt.s32.totalorder %s7989_s2, %s7982_s26 }
  0x91   : > { %p7986_p7 = pneg %p7985_p12  ;;  %p7992_p6 = por %p7991_p0, %p7990_p5 }
  0x93   : > { %p7993_p1 = pnand %p7992_p6, %p7986_p7 }
  0x95   : > { %7996 = shalt.err (!%p7993_p1)
}
  0x96   : > { %p9869_p8 = scmp.ne.s32.totalorder %s9849_s24, 0  ;;  %s9870_s4 = sld [smem:[#allocation39_spill]] }
  0x97   : > { %s9871_s12 = sshll.u32 %s8344_s18, 3  ;;  %s6672_s27 = sshll.u32 %s8147_s29, 9 }
  0x98   : > { %7438 = dma.hbm_to_vmem [thread:$0]  (!%p9869_p8), %s8499_s11, 128, %s526_s21, %s515_s28  }
  0x99   : > { %s565_s17 = scalar_lea.vmem [#allocation9], %s9871_s12 }
  0x9a   : > { %s572_s3 = sshll.u32 %s565_s17, 4  ;;  %s573_s3 = int_to_ptr.vmem [resolvable:$true] %s572_s3 }
  0x9c   : > { %s8526_s20 = scalar_lea.hbm %s9870_s4, %s6494_s16  ;;  %s8002_s28 = scalar_lea.hbm %s9870_s4, 256 }
  0x9d   : > { %s7997_s26 = scalar_lea.hbm %s8526_s20, 128  ;;  %p8003_p3 = scmp.lt.u32.totalorder %s8526_s20, %s9870_s4 }
  0x9e   : > { %p7998_p6 = scmp.ne.s32.totalorder %s8526_s20, %s7997_s26  ;;  %p8004_p11 = scmp.lt.u32.totalorder %s8002_s28, %s7997_s26 }
  0x9f   : > { %p8006_p4 = scmp.lt.u32.totalorder %s7997_s26, %s8526_s20 }
  0xa0   : > { %p8000_p0 = pnand %p7998_p6, %p8370_p9  ;;  %p8005_p2 = por %p8004_p11, %p8003_p3 }
  0xa2   : > { %p8001_p13 = pneg %p8000_p0  ;;  %p8007_p10 = por %p8006_p4, %p8005_p2 }
  0xa4   : > { %p8008_p12 = pnand %p8007_p10, %p8001_p13 }
  0xa6   : > { %8011 = shalt.err (!%p8008_p12)
}
  0xa7   : > { %s8012_s18 = scalar_lea.vmem %s573_s3, 128  ;;  %s8164_s9 = smov [#allocation9]  }
  0xa8   : > { %p8013_p7 = scmp.ne.s32.totalorder %s573_s3, %s8012_s18  ;;  %s8017_s10 = sshll.u32 %s8164_s9, 4  ;;  %s8018_s10 = int_to_ptr.vmem [resolvable:$false] %s8017_s10 }
  0xa9   : > { %s8019_s12 = scalar_lea.vmem %s8018_s10, 256  ;;  %p8020_p6 = scmp.lt.s32.totalorder %s573_s3, %s8018_s10 }
  0xaa   : > { %p8015_p5 = pnand %p8013_p7, %p8370_p9  ;;  %p8021_p0 = scmp.lt.s32.totalorder %s8019_s12, %s8012_s18 }
  0xac   : > { %p8016_p1 = pneg %p8015_p5  ;;  %p8022_p8 = por %p8021_p0, %p8020_p6 }
  0xae   : > { %p8023_p3 = pnand %p8022_p8, %p8016_p1 }
  0xb0   : > { %8026 = shalt.err (!%p8023_p3)
}
  0xb1   : > { %p9872_p11 = scmp.ne.s32.totalorder %s9849_s24, 0  ;;  %s9873_s13 = sld [smem:[#allocation48_spill]] }
  0xb2   : > { %p9874_p8 = scmp.ne.s32.totalorder %s9866_s7, 0 }
  0xb3   : > { %7444 = dma.hbm_to_vmem [thread:$0]  (!%p9872_p11), %s8526_s20, 128, %s573_s3, %s8364_s8  }
  0xb4   : > { %p9875_p13 = pneg %p9874_p8 }
  0xb7   : > { %s8552_s26 = scalar_lea.hbm %s9873_s13, %s6672_s27  ;;  %s8032_s8 = scalar_lea.hbm %s9873_s13, 1024 }
  0xb8   : > { %s8027_s11 = scalar_lea.hbm %s8552_s26, 512  ;;  %p8033_p10 = scmp.lt.u32.totalorder %s8552_s26, %s9873_s13 }
  0xb9   : > { %p8028_p9 = scmp.ne.s32.totalorder %s8552_s26, %s8027_s11  ;;  %p8034_p12 = scmp.lt.u32.totalorder %s8032_s8, %s8027_s11 }
  0xba   : > { %p8036_p5 = scmp.lt.u32.totalorder %s8027_s11, %s8552_s26 }
  0xbb   : > { %p8030_p2 = pnand %p8028_p9, %p9875_p13  ;;  %p8035_p7 = por %p8034_p12, %p8033_p10 }
  0xbd   : > { %p8031_p4 = pneg %p8030_p2  ;;  %p8037_p1 = por %p8036_p5, %p8035_p7 }
  0xbf   : > { %p8038_p6 = pnand %p8037_p1, %p8031_p4 }
  0xc1   : > { %8041 = shalt.err (!%p8038_p6)
}
  0xc2   : > { %s8042_s27 = scalar_lea.vmem %s8555_s5, 512  ;;  %p9876_p3 = pmov %p9875_p13 }
  0xc3   : > { %p8043_p0 = scmp.ne.s32.totalorder %s8555_s5, %s8042_s27  ;;  %s8165_s28 = smov [#allocation12]  }
  0xc4   : > { %s8047_s16 = sshll.u32 %s8165_s28, 4  ;;  %s8048_s16 = int_to_ptr.vmem [resolvable:$false] %s8047_s16 }
  0xc5   : > { %p8045_p11 = pnand %p8043_p0, %p9876_p3  ;;  %s8049_s2 = scalar_lea.vmem %s8048_s16, 1024 }
  0xc6   : > { %p8050_p13 = scmp.lt.s32.totalorder %s8555_s5, %s8048_s16  ;;  %p8051_p2 = scmp.lt.s32.totalorder %s8049_s2, %s8042_s27 }
  0xc7   : > { %p8046_p9 = pneg %p8045_p11 }
  0xc8   : > { %p8052_p10 = por %p8051_p2, %p8050_p13 }
  0xca   : > { %p8053_p12 = pnand %p8052_p10, %p8046_p9 }
  0xcc   : > { %8056 = shalt.err (!%p8053_p12)
}
  0xcd   : > { %s9877_s18 = smov 4   ;;  %s9878_s9 = smov 64  }
  0xce   : > { %7450 = dma.hbm_to_vmem [thread:$0]  (!%p9874_p8), %s8552_s26, 512, %s8555_s5, %s8458_s14, %s9878_s9, %s9878_s9, %s9877_s18  }
  0xcf   : > { %p9879_p4 = scmp.ne.s32.totalorder %s9852_s15, 0 }
  0xd1   : > { %686 = sbr.rel (%p9879_p4) target bundleno = 11221 (0x2bd5), region = 84 }
  0xd8   : > { %s688_s10 = sand.u32 1, %s8131_s25   ;;  %p9880_p7 = scmp.ne.s32.totalorder %s9848_s6, 0 }
  0xd9   : > { %s6507_s12 = sshll.u32 %s688_s10, 3  ;;  %s689_s17 = scalar_lea.sflag [#allocation6], %s688_s10 }
  0xda   : > { %s8587_s19 = scalar_lea.vmem [#allocation5], %s6507_s12 }
  0xdb   : > { %8102 = dma.done.wait (%p9880_p7), %s689_s17, 128  }
  0xdc   : > { %8104 = vsyncadd (%p9880_p7), %s689_s17, 4294967168  ;;  %s9881_s7 = sadd.s32 4294967295, %s8155_s0   ;;  %s6508_s14 = sshll.u32 %s688_s10, 4 }
  0xdd   : > { %s697_s11 = sand.u32 1, %s9881_s7   ;;  %s8595_s15 = scalar_lea.vmem [#allocation7], %s6508_s14 }
  0xde   : > { %s698_s5 = scalar_lea.sflag [#allocation8], %s697_s11 }
  0xdf   : > { %8106 = dma.done.wait (%p9880_p7), %s698_s5, 384  }
  0xe0   : > { %8108 = vsyncadd (%p9880_p7), %s698_s5, 4294966912  ;;  %s9882_s26 = sld [smem:[#allocation26_spill]]  ;;  %s717_s24 = sand.u32 1, %s8119_s22  }
  0xe1   : > { %s8602_s21 = sshll.u32 %s717_s24, 4  ;;  %s8604_s8 = scalar_lea.vmem [#allocation9], %s6507_s12 }
  0xe2   : > { %9883 = sst [smem:[#allocation30_spill]] %s8602_s21  ;;  %s716_s20 = scalar_lea.sflag [#allocation11], %s697_s11 }
  0xe6   : > { %p9884_p8 = scmp.ne.s32.totalorder %s9882_s26, 0 }
  0xe8   : > { %8110 = dma.done.wait (%p9884_p8), %s716_s20, 768  }
  0xe9   : > { %8112 = vsyncadd (%p9884_p8), %s716_s20, 4294966528  ;;  %s9885_s27 = sld [smem:[#allocation21_spill]]  ;;  %s9886_s28 = sld [smem:[#allocation20_spill]] }
  0xea   : > { %s6511_s6 = sshll.u32 %s717_s24, 5  ;;  %s9887_s12 = sld [smem:[#allocation35_spill]] }
  0xeb   : > { %s9888_s14 = sld [smem:[#allocation37_spill]]  ;;  %s9889_s3 = sld [smem:[#allocation40_spill]] }
  0xec   : > { %s9891_s25 = sld [smem:[#allocation42_spill]]  ;;  %s9894_s11 = sld [smem:[#allocation44_spill]] }
  0xed   : > { %s9896_s26 = sld [smem:[#allocation45_spill]]  ;;  %s9898_s29 = sld [smem:[#allocation47_spill]] }
  0xee   : > { %s9899_s9 = sld [smem:[#allocation49_spill]] }
  0xef   : > { %p848_p5 = scmp.lt.s32.totalorder %s9885_s27, 1  ;;  %p861_p1 = scmp.lt.s32.totalorder %s9886_s28, 1 }
  0xf0   : > { %p6530_p6 = scmp.ne.s32.totalorder %s9886_s28, 0 }
  0xf1   : > { %s9928_s27 = smov (!%p848_p5, %s9885_s27), 1  ;;  %vm910_vm0 = vcmask (!%p6530_p6), 261120   ;;  %v912_v1 = vld [vmem:[%s8587_s19] sm:$0xff] (!%p6530_p6)  ;;  %vm913_vm1 = vcmask (!%p6530_p6), 523264   ;;  %v917_v3 = vld [vmem:[%s8595_s15] sm:$0xff] (!%p6530_p6) }
  0xf2   : > { %s862_s16 = scalar_select %p861_p1, %s9886_s28, 1 }
  0xf3   : > { %s6512_s2 = sshll.u32 %s9928_s27, 3  ;;  %s6673_s18 = sshll.u32 %s9928_s27, 4  ;;  %914 = vst.msk [vmem:[#allocation3] sm:$0xff] (!%p6530_p6), %vm913_vm1, %v912_v1  ;;  %v918_v5 = vld [vmem:[%s8595_s15 + $0x8] sm:$0xff] (!%p6530_p6) }
  0xf4   : > { %s851_s17 = scalar_lea.vmem %s9887_s12, %s6512_s2  ;;  %s8621_s5 = scalar_lea.vmem %s9888_s14, %s6673_s18 }
  0xf5   : > { %s8626_s1 = scalar_lea.vmem %s9889_s3, %s6512_s2  ;;  %s7423_s24 = smul.u32 48, %s862_s16  ;;  %v909_v0 = vld [vmem:[%s851_s17] sm:$0xff] (!%p6530_p6)  ;;  %v916_v4 = vld [vmem:[%s8621_s5 + $0x8] sm:$0xff] (!%p6530_p6) }
  0xf6   : > { %9890 = sst [smem:[#allocation31_spill]] %s8626_s1  ;;  %s6674_s4 = sshll.u32 %s862_s16, 5  ;;  %v915_v2 = vld [vmem:[%s8621_s5] sm:$0xff] (!%p6530_p6)  ;;  %911 = vst.msk [vmem:[#allocation2] sm:$0xff] (!%p6530_p6), %vm910_vm0, %v909_v0  ;;  %v920_v7 = vadd.f32 (!%p6530_p6), %v918_v5, %v916_v4 }
  0xf7   : > { %s6678_s13 = sshll.u32 %s862_s16, 6  ;;  %s8631_s23 = scalar_lea.vmem %s9891_s25, %s7423_s24  ;;  %v919_v6 = vadd.f32 (!%p6530_p6), %v917_v3, %v915_v2 }
  0xf8   : > { %s9892_s12 = sld [smem:[#allocation43_spill]]  ;;  %s8641_s14 = scalar_lea.vmem %s9894_s11, %s6674_s4  ;;  %922 = vst.msk [vmem:[#allocation4 + $0x8] sm:$0xff] (!%p6530_p6), %vm910_vm0, %v920_v7 }
  0xf9   : > { %9895 = sst [smem:[#allocation33_spill]] %s8641_s14  ;;  %s8646_s20 = scalar_lea.vmem %s9896_s26, %s6674_s4  ;;  %921 = vst.msk [vmem:[#allocation4] sm:$0xff] (!%p6530_p6), %vm910_vm0, %v919_v6 }
  0xfa   : > { %9897 = sst [smem:[#allocation34_spill]] %s8646_s20  ;;  %s8651_s25 = scalar_lea.vmem %s9898_s29, %s6674_s4 }
  0xfb   : > { %s8656_s10 = scalar_lea.vmem %s9899_s9, %s6678_s13  ;;  %s9900_s14 = sld [smem:[#allocation50_spill]] }
  0xfc   : > { %s9901_s20 = sld [smem:[#allocation51_spill]]  ;;  %908 = sbr.rel (%p6530_p6) target bundleno = 259 (0x103), region = 108 }
  0xfe   : > { %s8636_s22 = scalar_lea.vmem %s9892_s12, %s6674_s4  ;;  %s7424_s12 = smul.u32 24, %s862_s16 }
  0xff   : > { %9893 = sst [smem:[#allocation32_spill]] %s8636_s22  ;;  %s6528_s22 = sshll.u32 %s862_s16, 1 }
 0x100   : > { %s901_s18 = sadd.s32 %s6528_s22, %s9928_s27  ;;  %s8668_s4 = scalar_lea.vmem [#allocation12], %s6511_s6 }
 0x101   : > { %s8661_s1 = scalar_lea.vmem %s9900_s14, %s7424_s12  ;;  %s6529_s3 = sshll.u32 %s901_s18, 3 }
 0x102   : > { %s8666_s0 = scalar_lea.vmem %s9901_s20, %s6529_s3 }
 0x103 PF: > { %v8677_v8 = vld [vmem:[%s8631_s23] sm:$0xff]   ;;  %v8166_v9 = vmov 0.0   ;;  %v8683_v10 = vld [vmem:[%s8631_s23 + $0x8] sm:$0xff]   ;;  %vm8167_vm2 = vmmov 0   ;;  %v8690_v12 = vld [vmem:[%s8604_s8] sm:$0xff]  ;;  %vm959_vm3 = vcmask 261120   ;;  %v943_v15 = vlaneseq }
 0x104   : > { %6875 = vmatprep.subr.bf16.mxu0 %v8166_v9  ;;  %6897 = vmatprep.subr.bf16.mxu1 %v8166_v9  ;;  %v8687_v11 = vld [vmem:[#allocation2] sm:$0xff]  ;;  %s8168_s13 = smov 104   ;;  %s8169_s22 = smov 120   ;;  %vm1088_vm4 = vcmask 64512   ;;  %vm1333_vm5 = vcmask 1043456   ;;  %vm1528_vm6 = vcmask 130048  }
 0x105   : > { %6876 = vmatpush3.bf16.msra.mxu0 %v8677_v8  ;;  %6879 = vmatprep.mubr.msk.bf16.mxu0 %vm8167_vm2, %v8166_v9  ;;  %v937_v13 = vadd.f32 %v8690_v12, %v8687_v11  ;;  %v8702_v16 = vshrl.u32 %v943_v15, 7  ;;  %v8706_v18 = vld [vmem:[%s8661_s1] sm:$0xff]  ;;  %s8170_s19 = smov 64   ;;  %s8171_s15 = smov 112   ;;  %v1003_v34 = vpack.c.bf16 %v8687_v11, %v8687_v11  ;;  %vm1530_vm7 = vcmask 195584  }
 0x106   : > { %6877 = vmatprep.subr.bf16.mxu0 %v8166_v9  ;;  %6899 = vmatprep.mubr.msk.bf16.mxu1 %vm8167_vm2, %v8166_v9  ;;  %s8172_s21 = smov 96   ;;  %s8173_s27 = smov 32   ;;  %vm2445_vm8 = vcmask 523264   ;;  %vm4489_vm9 = vcmask 326656   ;;  %vm4491_vm10 = vcmask 392192   ;;  %vm4493_vm11 = vcmask 457728  }
 0x107   : > { %v942_v14 = vpack.c.bf16 %v937_v13, %v937_v13  ;;  %v945_v17 = vsub.s32 0, %v8702_v16  ;;  %s8174_s28 = smov 8   ;;  %s8175_s6 = smov 16   ;;  %vm6186_vm12 = vcmask 785408   ;;  %vm6188_vm13 = vcmask 916480  }
 0x108   : > { %s8176_s16 = smov 24   ;;  %s9902_s17 = sld [smem:[#allocation31_spill]] }
 0x109   : > { %6878 = vmatpush3.bf16.msra.mxu0 %v8683_v10  ;;  %v8711_v19 = vrot.slane %v8706_v18, %v945_v17  ;;  %s9903_s20 = sld [smem:[#allocation41_spill]]  ;;  %s9904_s29 = sld [smem:[#allocation30_spill]] }
 0x10a   : > { %6883 = vmatprep.subr.bf16.mxu0 %v8166_v9  ;;  %s8177_s18 = smov 88   ;;  %s8178_s7 = smov 80  }
 0x10b   : > { %s8179_s11 = smov 72   ;;  %s9909_s3 = sld [smem:[#allocation33_spill]] }
 0x10c   : > { %6880 = vmatmul.mubr.msk.bf16.vlgmr.msra.gmra.mrb[0].mxu0 %vm959_vm3, %v942_v14  ;;  %s8180_s2 = smov 48   ;;  %s8181_s26 = smov 40  }
 0x10d   : > { %6887 = vmatprep.mubr.msk.bf16.mxu0 %vm8167_vm2, %v8166_v9 }
 0x10f   : > { %s9905_s30 = scalar_lea.vmem [#allocation10], %s9904_s29 }
 0x110   : > { %s9906_s24 = smov %s9905_s30 }
 0x1df   : > { %v997_v20 = vpop.f32.mrb[0].mxu0 }
 0x1e0   : > { %v998_v21 = vadd.f32 %v997_v20, %v8711_v19  ;;  %v6881_v22 = vpop.f32.mrb[1].mxu0 }
 0x1e1   : > { %v1000_v23 = vpop.f32.mrb[2].mxu0 }
 0x1e2   : > { %1064 = vrot.lane.b32.xlu1 %v998_v21, %s8168_s13  ;;  %1058 = vrot.lane.b32.xlu0 %v998_v21, %s8169_s22  ;;  %v6882_v24 = vpop.f32.mrb[3].mxu0  ;;  %v1067_v25 = vpack.c.bf16 %v998_v21, %v998_v21 }
 0x1e6   : > { %1004 = vrot.lane.b32.xlu1 %v8677_v8, %s8170_s19  ;;  %1061 = vrot.lane.b32.xlu0 %v998_v21, %s8171_s15 }
 0x1ea   : > { %1006 = vrot.lane.b32.xlu0 %v8683_v10, %s8170_s19  ;;  %1086 = vrot.lane.b32.xlu1 %v1067_v25, %s8172_s21 }
 0x254   : > { %v1065_v26 = vpop.permute.xlu1 %1064  ;;  %v1059_v27 = vpop.permute.xlu0 %1058 }
 0x255   : > { %v1068_v28 = vpack.c.bf16 %v1059_v27, %v1059_v27  ;;  %v1070_v31 = vpack.c.bf16 %v1065_v26, %v1065_v26 }
 0x257   : > { %1136 = vrot.lane.b32.xlu0 %v1068_v28, %s8172_s21 }
 0x258   : > { %v1005_v29 = vpop.permute.xlu1 %1004  ;;  %v1062_v30 = vpop.permute.xlu0 %1061 }
 0x259   : > { %v1069_v32 = vpack.c.bf16 %v1062_v30, %v1062_v30  ;;  %6884 = vmatpush3.bf16.msra.mxu0 %v1005_v29 }
 0x25a   : > { %6885 = vmatprep.subr.bf16.mxu0 %v8166_v9 }
 0x25b   : > { %1234 = vrot.lane.b32.xlu0 %v1070_v31, %s8172_s21  ;;  %1185 = vrot.lane.b32.xlu1 %v1069_v32, %s8172_s21 }
 0x25c   : > { %v1007_v33 = vpop.permute.xlu0 %1006  ;;  %v1087_v35 = vpop.permute.xlu1 %1086 }
 0x25d   : > { %6886 = vmatpush3.bf16.msra.mxu0 %v1007_v33  ;;  %v1093_v36 = vsel %vm1088_vm4, %v1087_v35, 0 }
 0x25e   : > { %6891 = vmatprep.subr.bf16.mxu0 %v8166_v9 }
 0x260   : > { %6888 = vmatmul.mubr.msk.bf16.vlgmr.msra.gmra.mrb[4].mxu0 %vm959_vm3, %v1003_v34 }
 0x261   : > { %6893 = vmatprep.mubr.msk.bf16.mxu0 %vm8167_vm2, %v8166_v9 }
 0x266   : > { %6892 = vmatpush3.bf16.xpose.msra.mxu0 %v1093_v36 }
 0x267   : > { %6903 = vmatprep.subr.bf16.mxu0 %v8166_v9 }
 0x26d   : > { %6894 = vmatmul.mubr.msk.bf16.vlgmr.msra.gmra.mrb[8].mxu0 %vm1088_vm4, %v1067_v25 }
 0x26e   : > { %6905 = vmatprep.mubr.msk.bf16.mxu0 %vm8167_vm2, %v8166_v9 }
 0x2c9   : > { %v1137_v37 = vpop.permute.xlu0 %1136 }
 0x2ca   : > { %v1142_v38 = vsel %vm1088_vm4, %v1137_v37, 0 }
 0x2cb   : > { %6898 = vmatpush3.bf16.xpose.msra.mxu1 %v1142_v38 }
 0x2cc   : > { %6909 = vmatprep.subr.bf16.mxu1 %v8166_v9 }
 0x2cd   : > { %v1186_v39 = vpop.permute.xlu1 %1185  ;;  %v1235_v41 = vpop.permute.xlu0 %1234 }
 0x2ce   : > { %v1191_v40 = vsel %vm1088_vm4, %v1186_v39, 0  ;;  %v1240_v42 = vsel %vm1088_vm4, %v1235_v41, 0 }
 0x2cf   : > { %6904 = vmatpush3.bf16.xpose.msra.mxu0 %v1191_v40 }
 0x2d0   : > { %6915 = vmatprep.subr.bf16.mxu0 %v8166_v9 }
 0x2d2   : > { %6900 = vmatmul.mubr.msk.bf16.vlgmr.msra.gmra.mrb[0].mxu1 %vm1088_vm4, %v1068_v28 }
 0x2d3   : > { %6910 = vmatpush3.bf16.xpose.msra.mxu1 %v1240_v42  ;;  %6911 = vmatprep.mubr.msk.bf16.mxu1 %vm8167_vm2, %v8166_v9 }
 0x2d4   : > { %6921 = vmatprep.subr.bf16.mxu1 %v8166_v9 }
 0x2d6   : > { %6906 = vmatmul.mubr.msk.bf16.vlgmr.msra.gmra.mrb[12].mxu0 %vm1088_vm4, %v1069_v32 }
 0x2d7   : > { %6917 = vmatprep.mubr.msk.bf16.mxu0 %vm8167_vm2, %v8166_v9 }
 0x2da   : > { %6912 = vmatmul.mubr.msk.bf16.vlgmr.msra.gmra.mrb[4].mxu1 %vm1088_vm4, %v1070_v31 }
 0x2db   : > { %6923 = vmatprep.mubr.msk.bf16.mxu1 %vm8167_vm2, %v8166_v9 }
 0x333   : > { %v1051_v43 = vpop.f32.mrb[4].mxu0 }
 0x334   : > { %v6889_v44 = vpop.f32.mrb[5].mxu0 }
 0x335   : > { %v1054_v45 = vpop.f32.mrb[6].mxu0 }
 0x336   : > { %v6890_v46 = vpop.f32.mrb[7].mxu0 }
 0x340   : > { %v1129_v47 = vpop.f32.mrb[8].mxu0 }
 0x341   : > { %v6895_v48 = vpop.f32.mrb[9].mxu0  ;;  %v1282_v49 = vsel %vm1088_vm4, %v1129_v47, -inf }
 0x342   : > { %1283 = vmax.xlane.f32.xlu1 %v1282_v49  ;;  %v1132_v50 = vpop.f32.mrb[10].mxu0 }
 0x343   : > { %v6896_v51 = vpop.f32.mrb[11].mxu0 }
 0x3a5   : > { %v1178_v52 = vpop.f32.mrb[0].mxu1 }
 0x3a6   : > { %v6901_v53 = vpop.f32.mrb[1].mxu1  ;;  %v1285_v54 = vsel %vm1088_vm4, %v1178_v52, -inf }
 0x3a7   : > { %1286 = vmax.xlane.f32.xlu0 %v1285_v54  ;;  %v1181_v55 = vpop.f32.mrb[2].mxu1 }
 0x3a8   : > { %v6902_v56 = vpop.f32.mrb[3].mxu1 }
 0x3a9   : > { %v1227_v57 = vpop.f32.mrb[12].mxu0 }
 0x3aa   : > { %v6907_v58 = vpop.f32.mrb[13].mxu0  ;;  %v1288_v59 = vsel %vm1088_vm4, %v1227_v57, -inf }
 0x3ab   : > { %1289 = vmax.xlane.f32.xlu0 %v1288_v59  ;;  %v1230_v60 = vpop.f32.mrb[14].mxu0 }
 0x3ac   : > { %v6908_v61 = vpop.f32.mrb[15].mxu0 }
 0x3ad   : > { %v1276_v62 = vpop.f32.mrb[4].mxu1 }
 0x3ae   : > { %v6913_v63 = vpop.f32.mrb[5].mxu1  ;;  %v1291_v0 = vsel %vm1088_vm4, %v1276_v62, -inf }
 0x3af   : > { %v1279_v1 = vpop.f32.mrb[6].mxu1  ;;  %1292 = vmax.xlane.f32.xlu1 %v1291_v0 }
 0x3b0   : > { %v6914_v2 = vpop.f32.mrb[7].mxu1 }
 0x3c1   : > { %1011 = vrot.lane.b32.xlu0 %v8711_v19, %s8170_s19 }
 0x3cf   : > { %v1284_v3 = vpop.xlane.xlu1 %1283 }
 0x3d0   : > { %v1294_v4 = vsub.f32 %v1129_v47, %v1284_v3 }
 0x3d2   : > { %v1298_v5 = vmul.f32 1.442695, %v1294_v4 }
 0x3d4   : > { %7750 = vpow2.f32 %v1298_v5 }
 0x3de   : > { %v7751_v6 = vpop.eup %7750 }
 0x3df   : > { %v1306_v7 = vsel %vm1088_vm4, %v7751_v6, 0.0 }
 0x3e0   : > { %1307 = vadd.xlane.f32.xlu1 %v1306_v7 }
 0x434   : > { %v1287_v13 = vpop.xlane.xlu0 %1286 }
 0x435   : > { %v1295_v14 = vsub.f32 %v1178_v52, %v1287_v13 }
 0x437   : > { %v1300_v15 = vmul.f32 1.442695, %v1295_v14 }
 0x438   : > { %v1290_v20 = vpop.xlane.xlu0 %1289 }
 0x439   : > { %7752 = vpow2.f32 %v1300_v15  ;;  %v1296_v21 = vsub.f32 %v1227_v57, %v1290_v20 }
 0x43b   : > { %v1302_v22 = vmul.f32 1.442695, %v1296_v21 }
 0x43c   : > { %v1293_v23 = vpop.xlane.xlu1 %1292  ;;  %v1012_v24 = vpop.permute.xlu0 %1011 }
 0x43d   : > { %7754 = vpow2.f32 %v1302_v22  ;;  %v1297_v25 = vsub.f32 %v1276_v62, %v1293_v23  ;;  %v1052_v26 = vadd.f32 %v1051_v43, %v1012_v24 }
 0x43f   : > { %v1304_v27 = vmul.f32 1.442695, %v1297_v25  ;;  %1075 = vrot.lane.b32.xlu0 %v1052_v26, %s8171_s15  ;;  %v1081_v28 = vpack.c.bf16 %v1052_v26, %v1052_v26 }
 0x441   : > { %7756 = vpow2.f32 %v1304_v27  ;;  %v1335_v29 = vsel %vm1333_vm5, %v1081_v28, 0 }
 0x442   : > { %6916 = vmatpush3.bf16.msra.mxu0 %v1335_v29 }
 0x443   : > { %v7753_v30 = vpop.eup %7752  ;;  %1078 = vrot.lane.b32.xlu0 %v1052_v26, %s8168_s13  ;;  %6927 = vmatprep.subr.bf16.mxu0 %v8166_v9 }
 0x444   : > { %v1309_v31 = vsel %vm1088_vm4, %v7753_v30, 0.0 }
 0x445   : > { %1310 = vadd.xlane.f32.xlu1 %v1309_v31 }
 0x447   : > { %v7755_v32 = vpop.eup %7754  ;;  %1533 = vrot.lane.b32.xlu0 %v8677_v8, %s8173_s27 }
 0x448   : > { %v1312_v33 = vsel %vm1088_vm4, %v7755_v32, 0.0 }
 0x449   : > { %1313 = vadd.xlane.f32.xlu1 %v1312_v33 }
 0x44b   : > { %v7757_v34 = vpop.eup %7756 }
 0x44c   : > { %v1315_v35 = vsel %vm1088_vm4, %v7757_v34, 0.0 }
 0x44d   : > { %1316 = vadd.xlane.f32.xlu1 %v1315_v35 }
 0x45e   : > { %1072 = vrot.lane.b32.xlu1 %v1052_v26, %s8169_s22 }
 0x46d   : > { %v1308_v36 = vpop.xlane.xlu1 %1307 }
 0x46e   : > { %7758 = vrcp.f32 %v1308_v36  ;;  %v8805_v36 = vld [vmem:[%s8631_s23 + $0x10] sm:$0xff]  }
 0x478   : > { %v7759_v37 = vpop.eup %7758 }
 0x479   : > { %v1322_v38 = vmul.f32 %v7759_v37, %v7751_v6  ;;  %v8810_v37 = vld [vmem:[%s8631_s23 + $0x18] sm:$0xff]  }
 0x47b   : > { %v1326_v39 = vpack.c.bf16 %v1322_v38, %v1322_v38  ;;  %v8813_v38 = vld [vmem:[%s8661_s1 + $0x8] sm:$0xff] }
 0x47d   : > { %6918 = vmatmul.mubr.msk.bf16.vlgmr.msra.gmra.mrb[16].mxu0 %vm1088_vm4, %v1326_v39  ;;  %v1602_v39 = vsub.s32 2, %v8702_v16 }
 0x47e   : > { %6929 = vmatprep.mubr.msk.bf16.mxu0 %vm8167_vm2, %v8166_v9 }
 0x4b1   : > { %v1076_v40 = vpop.permute.xlu0 %1075 }
 0x4b2   : > { %v1083_v41 = vpack.c.bf16 %v1076_v40, %v1076_v40 }
 0x4b4   : > { %v1427_v42 = vsel %vm1333_vm5, %v1083_v41, 0 }
 0x4b5   : > { %6928 = vmatpush3.bf16.msra.mxu0 %v1427_v42  ;;  %v1079_v47 = vpop.permute.xlu0 %1078 }
 0x4b6   : > { %6939 = vmatprep.subr.bf16.mxu0 %v8166_v9  ;;  %v1084_v52 = vpack.c.bf16 %v1079_v47, %v1079_v47 }
 0x4b8   : > { %v1473_v57 = vsel %vm1333_vm5, %v1084_v52, 0  ;;  %v928_v52 = vld [vmem:[#allocation4 + $0x8] sm:$0xff] }
 0x4b9   : > { %v1534_v60 = vpop.permute.xlu0 %1533 }
 0x4d2   : > { %v1311_v43 = vpop.xlane.xlu1 %1310 }
 0x4d3   : > { %7760 = vrcp.f32 %v1311_v43 }
 0x4d6   : > { %v1314_v44 = vpop.xlane.xlu1 %1313 }
 0x4d7   : > { %7762 = vrcp.f32 %v1314_v44 }
 0x4da   : > { %v1317_v45 = vpop.xlane.xlu1 %1316 }
 0x4db   : > { %7764 = vrcp.f32 %v1317_v45  ;;  %v1619_v45 = vsub.s32 1, %v8702_v16 }
 0x4dd   : > { %v7761_v46 = vpop.eup %7760 }
 0x4de   : > { %v1073_v48 = vpop.permute.xlu1 %1072  ;;  %v1323_v50 = vmul.f32 %v7761_v46, %v7753_v30  ;;  %v8833_v46 = vrot.slane %v8706_v18, %v1619_v45 }
 0x4df   : > { %v1082_v49 = vpack.c.bf16 %v1073_v48, %v1073_v48 }
 0x4e0   : > { %v1327_v55 = vpack.c.bf16 %v1323_v50, %v1323_v50 }
 0x4e1   : > { %v7763_v51 = vpop.eup %7762  ;;  %v1381_v53 = vsel %vm1333_vm5, %v1082_v49, 0 }
 0x4e2   : > { %6922 = vmatpush3.bf16.msra.mxu1 %v1381_v53  ;;  %v1324_v54 = vmul.f32 %v7763_v51, %v7755_v32  ;;  %v927_v51 = vld [vmem:[#allocation4] sm:$0xff] }
 0x4e3   : > { %6933 = vmatprep.subr.bf16.mxu1 %v8166_v9 }
 0x4e4   : > { %v1328_v56 = vpack.c.bf16 %v1324_v54, %v1324_v54  ;;  %v8840_v54 = vpack.c.bf16 %v928_v52, %v927_v51 }
 0x4e5   : > { %v7765_v8 = vpop.eup %7764  ;;  %6924 = vmatmul.mubr.msk.bf16.vlgmr.msra.gmra.mrb[8].mxu1 %vm1088_vm4, %v1327_v55 }
 0x4e6   : > { %6930 = vmatmul.mubr.msk.bf16.vlgmr.msra.gmra.mrb[20].mxu0 %vm1088_vm4, %v1328_v56  ;;  %6934 = vmatpush3.bf16.msra.mxu1 %v1473_v57  ;;  %v1325_v58 = vmul.f32 %v7765_v8, %v7757_v34 }
 0x4e7   : > { %6935 = vmatprep.mubr.msk.bf16.mxu1 %vm8167_vm2, %v8166_v9  ;;  %6943 = vmatprep.mubr.msk.bf16.mxu0 %vm8167_vm2, %v8166_v9 }
 0x4e8   : > { %6947 = vmatprep.subr.bf16.mxu1 %v8166_v9  ;;  %v1329_v59 = vpack.c.bf16 %v1325_v58, %v1325_v58  ;;  %6940 = vmatpush3.bf16.msra.mxu0 %v1534_v60 }
 0x4e9   : > { %6941 = vmatprep.subr.bf16.mxu0 %v8166_v9 }
 0x4ed   : > { %6936 = vmatmul.mubr.msk.bf16.vlgmr.msra.gmra.mrb[12].mxu1 %vm1088_vm4, %v1329_v59 }
 0x4ee   : > { %6951 = vmatprep.mubr.msk.bf16.mxu1 %vm8167_vm2, %v8166_v9  ;;  %6948 = vmatpush3.bf16.msra.mxu1 %v8805_v36 }
 0x4ef   : > { %6949 = vmatprep.subr.bf16.mxu1 %v8166_v9 }
 0x4f2   : > { %6950 = vmatpush3.bf16.msra.mxu1 %v8810_v37 }
 0x4f3   : > { %6963 = vmatprep.subr.bf16.mxu1 %v8166_v9 }
 0x550   : > { %v1371_v61 = vpop.f32.mrb[16].mxu0 }
 0x551   : > { %v6919_v62 = vpop.f32.mrb[17].mxu0 }
 0x552   : > { %v1374_v63 = vpop.f32.mrb[18].mxu0 }
 0x553   : > { %v6920_v0 = vpop.f32.mrb[19].mxu0  ;;  %v925_v63 = vld [vmem:[%s8621_s5] sm:$0xff] }
 0x554   : > { %v926_v0 = vld [vmem:[%s8621_s5 + $0x8] sm:$0xff]  ;;  %s8182_s5 = smov 56  }
 0x5b8   : > { %v1417_v1 = vpop.f32.mrb[8].mxu1 }
 0x5b9   : > { %1516 = vrot.lane.b32.xlu0 %v1417_v1, %s8174_s28  ;;  %v6925_v2 = vpop.f32.mrb[9].mxu1  ;;  %v1463_v3 = vpop.f32.mrb[20].mxu0  ;;  %v8858_v1 = vpack.c.bf16 %v926_v0, %v925_v63 }
 0x5ba   : > { %v1420_v4 = vpop.f32.mrb[10].mxu1  ;;  %1520 = vrot.lane.b32.xlu1 %v1463_v3, %s8175_s6  ;;  %v6931_v5 = vpop.f32.mrb[21].mxu0 }
 0x5bb   : > { %v6926_v6 = vpop.f32.mrb[11].mxu1  ;;  %v1466_v7 = vpop.f32.mrb[22].mxu0 }
 0x5bc   : > { %v6932_v13 = vpop.f32.mrb[23].mxu0 }
 0x5be   : > { %1535 = vrot.lane.b32.xlu1 %v8683_v10, %s8173_s27 }
 0x5c0   : > { %v1509_v14 = vpop.f32.mrb[12].mxu1 }
 0x5c1   : > { %1524 = vrot.lane.b32.xlu0 %v1509_v14, %s8176_s16  ;;  %v6937_v15 = vpop.f32.mrb[13].mxu1 }
 0x5c2   : > { %v1512_v20 = vpop.f32.mrb[14].mxu1 }
 0x5c3   : > { %v6938_v21 = vpop.f32.mrb[15].mxu1 }
 0x5c5   : > { %1539 = vrot.lane.b32.xlu0 %v8711_v19, %s8173_s27 }
 0x62b   : > { %v1517_v23 = vpop.permute.xlu0 %1516 }
 0x62c   : > { %v1521_v22 = vpop.permute.xlu1 %1520  ;;  %v1527_v24 = vsel %vm1088_vm4, %v1371_v61, %v1517_v23 }
 0x62d   : > { %v1529_v10 = vsel %vm1528_vm6, %v1527_v24, %v1521_v22 }
 0x630   : > { %v1536_v25 = vpop.permute.xlu1 %1535 }
 0x631   : > { %6942 = vmatpush3.bf16.msra.mxu0 %v1536_v25 }
 0x632   : > { %6955 = vmatprep.subr.bf16.mxu0 %v8166_v9 }
 0x633   : > { %v1525_v26 = vpop.permute.xlu0 %1524 }
 0x634   : > { %v1531_v27 = vsel %vm1530_vm7, %v1529_v10, %v1525_v26 }
 0x635   : > { %v1532_v28 = vpack.c.bf16 %v1531_v27, %v1531_v27 }
 0x637   : > { %6944 = vmatmul.mubr.msk.bf16.vlgmr.msra.gmra.mrb[24].mxu0 %vm959_vm3, %v1532_v28  ;;  %v1540_v19 = vpop.permute.xlu0 %1539 }
 0x638   : > { %6959 = vmatprep.mubr.msk.bf16.mxu0 %vm8167_vm2, %v8166_v9 }
 0x70a   : > { %v1579_v29 = vpop.f32.mrb[24].mxu0 }
 0x70b   : > { %v1580_v30 = vadd.f32 %v1579_v29, %v1540_v19  ;;  %v6945_v31 = vpop.f32.mrb[25].mxu0 }
 0x70c   : > { %v1582_v32 = vpop.f32.mrb[26].mxu0 }
 0x70d   : > { %v6946_v33 = vpop.f32.mrb[27].mxu0  ;;  %v1585_v34 = vadd.f32 %v1580_v30, %v8687_v11  ;;  %v1603_v11 = vrot.slane %v8813_v38, %v1602_v39 }
 0x70f   : > { %v1586_v35 = vsel %vm959_vm3, %v1585_v34, 0.0 }
 0x710   : > { %1587 = vadd.xlane.f32.xlu1 %v1586_v35 }
 0x721   : > { %1679 = vrot.lane.b32.xlu1 %v8810_v37, %s8172_s21 }
 0x725   : > { %1606 = vrot.lane.b32.xlu1 %v1603_v11, %s8172_s21 }
 0x729   : > { %1732 = vrot.lane.b32.xlu1 %v8805_v36, %s8170_s19 }
 0x79d   : > { %v1588_v40 = vpop.xlane.xlu1 %1587 }
 0x79e   : > { %v1590_v41 = vmul.f32 0.03125, %v1588_v40 }
 0x7a0   : > { %v1591_v42 = vsub.f32 %v1585_v34, %v1590_v41 }
 0x7a1   : > { %v1680_v53 = vpop.permute.xlu1 %1679 }
 0x7a2   : > { %v1592_v43 = vmul.f32 %v1591_v42, %v1591_v42 }
 0x7a4   : > { %v1593_v44 = vsel %vm959_vm3, %v1592_v43, 0.0 }
 0x7a5   : > { %1594 = vadd.xlane.f32.xlu0 %v1593_v44  ;;  %v1607_v56 = vpop.permute.xlu1 %1606 }
 0x7a9   : > { %v1733_v61 = vpop.permute.xlu1 %1732 }
 0x7bb   : > { %1677 = vrot.lane.b32.xlu0 %v8805_v36, %s8172_s21 }
 0x7bf   : > { %1684 = vrot.lane.b32.xlu0 %v8833_v46, %s8172_s21 }
 0x7c3   : > { %1734 = vrot.lane.b32.xlu0 %v8810_v37, %s8170_s19 }
 0x832   : > { %v1595_v47 = vpop.xlane.xlu0 %1594 }
 0x833   : > { %v1596_v48 = vmul.f32 0.03125, %v1595_v47 }
 0x835   : > { %v1597_v49 = vadd.f32 1e-05, %v1596_v48 }
 0x836   : > { %v1678_v50 = vpop.permute.xlu0 %1677 }
 0x837   : > { %7766 = vrsqrt.f32 %v1597_v49  ;;  %6956 = vmatpush3.bf16.msra.mxu0 %v1678_v50 }
 0x838   : > { %6957 = vmatprep.subr.bf16.mxu0 %v8166_v9 }
 0x83a   : > { %v1685_v60 = vpop.permute.xlu0 %1684 }
 0x83b   : > { %6958 = vmatpush3.bf16.msra.mxu0 %v1680_v53 }
 0x83c   : > { %6971 = vmatprep.subr.bf16.mxu0 %v8166_v9 }
 0x83e   : > { %6960 = vmatmul.mubr.msk.bf16.vlgmr.msra.gmra.mrb[28].mxu0 %vm959_vm3, %v8840_v54  ;;  %v1735_v62 = vpop.permute.xlu0 %1734 }
 0x83f   : > { %6973 = vmatprep.mubr.msk.bf16.mxu0 %vm8167_vm2, %v8166_v9 }
 0x841   : > { %v7767_v18 = vpop.eup %7766 }
 0x842   : > { %v1599_v55 = vmul.f32 %v7767_v18, %v1591_v42 }
 0x844   : > { %v1604_v8 = vmul.f32 %v1603_v11, %v1599_v55 }
 0x846   : > { %v8847_v57 = vadd.f32 %v1607_v56, %v1604_v8 }
 0x848   : > { %v1610_v58 = vadd.f32 %v8847_v57, %v8690_v12 }
 0x84a   : > { %v1616_v59 = vpack.c.bf16 %v1610_v58, %v1610_v58 }
 0x84c   : > { %6952 = vmatmul.mubr.msk.bf16.vlgmr.msra.gmra.mrb[16].mxu1 %vm959_vm3, %v1616_v59 }
 0x84d   : > { %6967 = vmatprep.mubr.msk.bf16.mxu1 %vm8167_vm2, %v8166_v9  ;;  %6964 = vmatpush3.bf16.msra.mxu1 %v1733_v61 }
 0x84e   : > { %6965 = vmatprep.subr.bf16.mxu1 %v8166_v9 }
 0x851   : > { %6966 = vmatpush3.bf16.msra.mxu1 %v1735_v62 }
 0x852   : > { %6977 = vmatprep.subr.bf16.mxu1 %v8166_v9 }
 0x854   : > { %6968 = vmatmul.mubr.msk.bf16.vlgmr.msra.gmra.mrb[20].mxu1 %vm959_vm3, %v8858_v1 }
 0x855   : > { %6979 = vmatprep.mubr.msk.bf16.mxu1 %vm8167_vm2, %v8166_v9 }
 0x911   : > { %v1724_v12 = vpop.f32.mrb[28].mxu0 }
 0x912   : > { %v6961_v2 = vpop.f32.mrb[29].mxu0  ;;  %v1725_v4 = vadd.f32 %v1724_v12, %v1685_v60 }
 0x913   : > { %v1727_v3 = vpop.f32.mrb[30].mxu0 }
 0x914   : > { %v1728_v5 = vadd.f32 %v1727_v3, %v1685_v60  ;;  %v6962_v6 = vpop.f32.mrb[31].mxu0 }
 0x916   : > { %v7566_v7 = vpack.i.bf16 %v1728_v5, %v1725_v4  ;;  %v1819_v13 = vpack.c.bf16 %v1728_v5, %v1725_v4 }
 0x918   : > { %7567 = vrot.lane.b32.xlu0 %v7566_v7, %s8171_s15  ;;  %7562 = vrot.lane.b32.xlu1 %v7566_v7, %s8169_s22  ;;  %v1851_v14 = vsel %vm1088_vm4, %v1819_v13, 0 }
 0x919   : > { %6972 = vmatpush3.bf16.xpose.msra.mxu0 %v1851_v14 }
 0x91a   : > { %6983 = vmatprep.subr.bf16.mxu0 %v8166_v9 }
 0x91c   : > { %7572 = vrot.lane.b32.xlu0 %v7566_v7, %s8168_s13 }
 0x91f   : > { %v1670_v15 = vpop.f32.mrb[16].mxu1 }
 0x920   : > { %v1671_v20 = vadd.f32 %v1670_v15, %v8833_v46  ;;  %v6953_v21 = vpop.f32.mrb[17].mxu1 }
 0x921   : > { %v1673_v22 = vpop.f32.mrb[18].mxu1 }
 0x922   : > { %v1795_v23 = vpack.c.bf16 %v1671_v20, %v1671_v20  ;;  %v6954_v24 = vpop.f32.mrb[19].mxu1  ;;  %1792 = vrot.lane.b32.xlu0 %v1671_v20, %s8168_s13  ;;  %1786 = vrot.lane.b32.xlu1 %v1671_v20, %s8169_s22 }
 0x924   : > { %6974 = vmatmul.mubr.msk.bf16.vlgmr.msra.gmra.mrb[32].mxu0 %vm1088_vm4, %v1795_v23 }
 0x925   : > { %6985 = vmatprep.mubr.msk.bf16.mxu0 %vm8167_vm2, %v8166_v9 }
 0x926   : > { %1789 = vrot.lane.b32.xlu1 %v1671_v20, %s8171_s15 }
 0x927   : > { %v1778_v49 = vpop.f32.mrb[20].mxu1 }
 0x928   : > { %v6969_v50 = vpop.f32.mrb[21].mxu1 }
 0x929   : > { %v1781_v51 = vpop.f32.mrb[22].mxu1 }
 0x92a   : > { %v6970_v52 = vpop.f32.mrb[23].mxu1 }
 0x98a   : > { %v7568_v25 = vpop.permute.xlu0 %7567  ;;  %v7563_v10 = vpop.permute.xlu1 %7562 }
 0x98b   : > { %v7570_v26 = vunpack.i.h.bf16 %v7568_v25  ;;  %v7569_v27 = vunpack.i.l.bf16 %v7568_v25  ;;  %v7565_v28 = vunpack.i.h.bf16 %v7563_v10  ;;  %v7564_v19 = vunpack.i.l.bf16 %v7563_v10 }
 0x98d   : > { %v1820_v29 = vpack.c.bf16 %v7565_v28, %v7564_v19  ;;  %v1821_v30 = vpack.c.bf16 %v7570_v26, %v7569_v27 }
 0x98e   : > { %v7573_v31 = vpop.permute.xlu0 %7572 }
 0x98f   : > { %v7575_v32 = vunpack.i.h.bf16 %v7573_v31  ;;  %v7574_v33 = vunpack.i.l.bf16 %v7573_v31  ;;  %v1897_v34 = vsel %vm1088_vm4, %v1820_v29, 0  ;;  %v1943_v35 = vsel %vm1088_vm4, %v1821_v30, 0 }
 0x990   : > { %6978 = vmatpush3.bf16.xpose.msra.mxu1 %v1897_v34  ;;  %6984 = vmatpush3.bf16.xpose.msra.mxu0 %v1943_v35 }
 0x991   : > { %6989 = vmatprep.subr.bf16.mxu1 %v8166_v9  ;;  %6995 = vmatprep.subr.bf16.mxu0 %v8166_v9  ;;  %v1822_v11 = vpack.c.bf16 %v7575_v32, %v7574_v33 }
 0x993   : > { %v1989_v42 = vsel %vm1088_vm4, %v1822_v11, 0 }
 0x994   : > { %v1787_v40 = vpop.permute.xlu1 %1786  ;;  %v1793_v47 = vpop.permute.xlu0 %1792 }
 0x995   : > { %v1796_v41 = vpack.c.bf16 %v1787_v40, %v1787_v40  ;;  %v1798_v48 = vpack.c.bf16 %v1793_v47, %v1793_v47 }
 0x997   : > { %6980 = vmatmul.mubr.msk.bf16.vlgmr.msra.gmra.mrb[24].mxu1 %vm1088_vm4, %v1796_v41 }
 0x998   : > { %v1790_v43 = vpop.permute.xlu1 %1789  ;;  %6990 = vmatpush3.bf16.xpose.msra.mxu1 %v1989_v42  ;;  %6991 = vmatprep.mubr.msk.bf16.mxu1 %vm8167_vm2, %v8166_v9 }
 0x999   : > { %v1797_v44 = vpack.c.bf16 %v1790_v43, %v1790_v43  ;;  %7001 = vmatprep.subr.bf16.mxu1 %v8166_v9 }
 0x99b   : > { %6986 = vmatmul.mubr.msk.bf16.vlgmr.msra.gmra.mrb[36].mxu0 %vm1088_vm4, %v1797_v44 }
 0x99c   : > { %6997 = vmatprep.mubr.msk.bf16.mxu0 %vm8167_vm2, %v8166_v9 }
 0x99f   : > { %6992 = vmatmul.mubr.msk.bf16.vlgmr.msra.gmra.mrb[28].mxu1 %vm1088_vm4, %v1798_v48 }
 0x9a0   : > { %7003 = vmatprep.mubr.msk.bf16.mxu1 %vm8167_vm2, %v8166_v9 }
 0x9f7   : > { %v1887_v53 = vpop.f32.mrb[32].mxu0 }
 0x9f8   : > { %v6975_v18 = vpop.f32.mrb[33].mxu0  ;;  %v2031_v55 = vsel %vm1528_vm6, %v1887_v53, -inf }
 0x9f9   : > { %2032 = vmax.xlane.f32.xlu1 %v2031_v55  ;;  %v1890_v56 = vpop.f32.mrb[34].mxu0 }
 0x9fa   : > { %v6976_v8 = vpop.f32.mrb[35].mxu0 }
 0xa6a   : > { %v1933_v58 = vpop.f32.mrb[24].mxu1 }
 0xa6b   : > { %v6981_v59 = vpop.f32.mrb[25].mxu1  ;;  %v2034_v60 = vsel %vm1528_vm6, %v1933_v58, -inf }
 0xa6c   : > { %2035 = vmax.xlane.f32.xlu0 %v2034_v60  ;;  %v1936_v61 = vpop.f32.mrb[26].mxu1 }
 0xa6d   : > { %v6982_v62 = vpop.f32.mrb[27].mxu1 }
 0xa6e   : > { %v1979_v63 = vpop.f32.mrb[36].mxu0 }
 0xa6f   : > { %v6987_v0 = vpop.f32.mrb[37].mxu0  ;;  %v2037_v12 = vsel %vm1528_vm6, %v1979_v63, -inf }
 0xa70   : > { %2038 = vmax.xlane.f32.xlu0 %v2037_v12  ;;  %v1982_v2 = vpop.f32.mrb[38].mxu0 }
 0xa71   : > { %v6988_v3 = vpop.f32.mrb[39].mxu0 }
 0xa72   : > { %v2025_v4 = vpop.f32.mrb[28].mxu1 }
 0xa73   : > { %v6993_v5 = vpop.f32.mrb[29].mxu1  ;;  %v2040_v6 = vsel %vm1528_vm6, %v2025_v4, -inf }
 0xa74   : > { %v2028_v7 = vpop.f32.mrb[30].mxu1  ;;  %2041 = vmax.xlane.f32.xlu1 %v2040_v6 }
 0xa75   : > { %v6994_v13 = vpop.f32.mrb[31].mxu1 }
 0xa86   : > { %v2033_v14 = vpop.xlane.xlu1 %2032  ;;  %1738 = vrot.lane.b32.xlu0 %v8833_v46, %s8170_s19 }
 0xa87   : > { %v2043_v15 = vsub.f32 %v1887_v53, %v2033_v14 }
 0xa89   : > { %v2047_v20 = vmul.f32 1.442695, %v2043_v15 }
 0xa8b   : > { %7768 = vpow2.f32 %v2047_v20 }
 0xa95   : > { %v7769_v21 = vpop.eup %7768 }
 0xa96   : > { %v2055_v22 = vsel %vm1528_vm6, %v7769_v21, 0.0 }
 0xa97   : > { %2056 = vadd.xlane.f32.xlu1 %v2055_v22 }
 0xaf9   : > { %v2036_v23 = vpop.xlane.xlu0 %2035 }
 0xafa   : > { %v2044_v24 = vsub.f32 %v1933_v58, %v2036_v23 }
 0xafc   : > { %v2049_v25 = vmul.f32 1.442695, %v2044_v24 }
 0xafd   : > { %v2039_v10 = vpop.xlane.xlu0 %2038 }
 0xafe   : > { %7770 = vpow2.f32 %v2049_v25  ;;  %v2045_v26 = vsub.f32 %v1979_v63, %v2039_v10 }
 0xb00   : > { %v2051_v27 = vmul.f32 1.442695, %v2045_v26 }
 0xb01   : > { %v2042_v28 = vpop.xlane.xlu1 %2041  ;;  %v1739_v19 = vpop.permute.xlu0 %1738 }
 0xb02   : > { %7772 = vpow2.f32 %v2051_v27  ;;  %v2046_v29 = vsub.f32 %v2025_v4, %v2042_v28  ;;  %v1779_v30 = vadd.f32 %v1778_v49, %v1739_v19  ;;  %v1782_v31 = vadd.f32 %v1781_v51, %v1739_v19 }
 0xb04   : > { %v2053_v32 = vmul.f32 1.442695, %v2046_v29  ;;  %v7581_v33 = vpack.i.bf16 %v1782_v31, %v1779_v30  ;;  %v1843_v34 = vpack.c.bf16 %v1782_v31, %v1779_v30 }
 0xb06   : > { %7774 = vpow2.f32 %v2053_v32  ;;  %7582 = vrot.lane.b32.xlu0 %v7581_v33, %s8171_s15  ;;  %6996 = vmatpush3.bf16.msra.mxu0 %v1843_v34 }
 0xb07   : > { %7007 = vmatprep.subr.bf16.mxu0 %v8166_v9 }
 0xb08   : > { %v7771_v35 = vpop.eup %7770 }
 0xb09   : > { %v2058_v11 = vsel %vm1528_vm6, %v7771_v35, 0.0 }
 0xb0a   : > { %2059 = vadd.xlane.f32.xlu1 %v2058_v11  ;;  %7587 = vrot.lane.b32.xlu0 %v7581_v33, %s8168_s13 }
 0xb0c   : > { %v7773_v40 = vpop.eup %7772 }
 0xb0d   : > { %v2061_v41 = vsel %vm1528_vm6, %v7773_v40, 0.0 }
 0xb0e   : > { %2062 = vadd.xlane.f32.xlu1 %v2061_v41  ;;  %2267 = vrot.lane.b32.xlu0 %v8805_v36, %s8173_s27 }
 0xb10   : > { %v7775_v42 = vpop.eup %7774 }
 0xb11   : > { %v2064_v43 = vsel %vm1528_vm6, %v7775_v42, 0.0 }
 0xb12   : > { %2065 = vadd.xlane.f32.xlu1 %v2064_v43  ;;  %v6572_v43 = vld [vmem:[%s9903_s20 + $0x1] ss:$0 sm:$0xff] }
 0xb23   : > { %7577 = vrot.lane.b32.xlu1 %v7581_v33, %s8169_s22 }
 0xb24   : > { %v2057_v44 = vpop.xlane.xlu1 %2056 }
 0xb25   : > { %7776 = vrcp.f32 %v2057_v44 }
 0xb2f   : > { %v7777_v47 = vpop.eup %7776 }
 0xb30   : > { %v2071_v48 = vmul.f32 %v7777_v47, %v7769_v21 }
 0xb32   : > { %v2075_v49 = vpack.c.bf16 %v2071_v48, %v2071_v48 }
 0xb34   : > { %6998 = vmatmul.mubr.msk.bf16.vlgmr.msra.gmra.mrb[40].mxu0 %vm1528_vm6, %v2075_v49 }
 0xb35   : > { %7009 = vmatprep.mubr.msk.bf16.mxu0 %vm8167_vm2, %v8166_v9 }
 0xb78   : > { %v7583_v50 = vpop.permute.xlu0 %7582 }
 0xb79   : > { %v7585_v51 = vunpack.i.h.bf16 %v7583_v50  ;;  %v7584_v52 = vunpack.i.l.bf16 %v7583_v50 }
 0xb7b   : > { %v1845_v36 = vpack.c.bf16 %v7585_v51, %v7584_v52 }
 0xb7c   : > { %v7588_v8 = vpop.permute.xlu0 %7587 }
 0xb7d   : > { %7008 = vmatpush3.bf16.msra.mxu0 %v1845_v36  ;;  %v7590_v63 = vunpack.i.h.bf16 %v7588_v8  ;;  %v7589_v0 = vunpack.i.l.bf16 %v7588_v8 }
 0xb7e   : > { %7019 = vmatprep.subr.bf16.mxu0 %v8166_v9 }
 0xb7f   : > { %v1846_v6 = vpack.c.bf16 %v7590_v63, %v7589_v0  ;;  %v7711_v63 = vld [vmem:[%s9906_s24 + $0x8] sm:$0xff]   ;;  %v7714_v0 = vld [vmem:[%s8651_s25] sm:$0xff]  }
 0xb80   : > { %v2268_v21 = vpop.permute.xlu0 %2267 }
 0xb97   : > { %v2060_v53 = vpop.xlane.xlu1 %2059 }
 0xb98   : > { %7778 = vrcp.f32 %v2060_v53 }
 0xb9b   : > { %v2063_v18 = vpop.xlane.xlu1 %2062 }
 0xb9c   : > { %7780 = vrcp.f32 %v2063_v18  ;;  %v2335_v18 = vsub.s32 3, %v8702_v16 }
 0xb9f   : > { %v2066_v55 = vpop.xlane.xlu1 %2065 }
 0xba0   : > { %7782 = vrcp.f32 %v2066_v55  ;;  %v2336_v55 = vrot.slane %v8813_v38, %v2335_v18  ;;  %v7710_v38 = vld [vmem:[%s9905_s30] sm:$0xff]  }
 0xba2   : > { %v7779_v56 = vpop.eup %7778 }
 0xba3   : > { %v7578_v58 = vpop.permute.xlu1 %7577  ;;  %v2072_v61 = vmul.f32 %v7779_v56, %v7771_v35 }
 0xba4   : > { %v7580_v59 = vunpack.i.h.bf16 %v7578_v58  ;;  %v7579_v60 = vunpack.i.l.bf16 %v7578_v58 }
 0xba5   : > { %v2076_v3 = vpack.c.bf16 %v2072_v61, %v2072_v61 }
 0xba6   : > { %v7781_v62 = vpop.eup %7780  ;;  %v1844_v12 = vpack.c.bf16 %v7580_v59, %v7579_v60  ;;  %v8950_v60 = vld [vmem:[#allocation3] sm:$0xff] }
 0xba7   : > { %v2073_v2 = vmul.f32 %v7781_v62, %v7773_v40 }
 0xba8   : > { %7002 = vmatpush3.bf16.msra.mxu1 %v1844_v12  ;;  %v7715_v12 = vld [vmem:[%s8651_s25 + $0x8] sm:$0xff]  }
 0xba9   : > { %v2077_v4 = vpack.c.bf16 %v2073_v2, %v2073_v2  ;;  %7013 = vmatprep.subr.bf16.mxu1 %v8166_v9 }
 0xbaa   : > { %v7783_v5 = vpop.eup %7782 }
 0xbab   : > { %7004 = vmatmul.mubr.msk.bf16.vlgmr.msra.gmra.mrb[32].mxu1 %vm1528_vm6, %v2076_v3  ;;  %7010 = vmatmul.mubr.msk.bf16.vlgmr.msra.gmra.mrb[44].mxu0 %vm1528_vm6, %v2077_v4  ;;  %v2074_v7 = vmul.f32 %v7783_v5, %v7775_v42 }
 0xbac   : > { %7014 = vmatpush3.bf16.msra.mxu1 %v1846_v6  ;;  %7015 = vmatprep.mubr.msk.bf16.mxu1 %vm8167_vm2, %v8166_v9 }
 0xbad   : > { %7023 = vmatprep.mubr.msk.bf16.mxu0 %vm8167_vm2, %v8166_v9  ;;  %7027 = vmatprep.subr.bf16.mxu1 %v8166_v9  ;;  %v2078_v13 = vpack.c.bf16 %v2074_v7, %v2074_v7 }
 0xbae   : > { %7020 = vmatpush3.bf16.msra.mxu0 %v2268_v21 }
 0xbaf   : > { %7021 = vmatprep.subr.bf16.mxu0 %v8166_v9 }
 0xbb3   : > { %7016 = vmatmul.mubr.msk.bf16.vlgmr.msra.gmra.mrb[36].mxu1 %vm1528_vm6, %v2078_v13 }
 0xbb4   : > { %7031 = vmatprep.mubr.msk.bf16.mxu1 %vm8167_vm2, %v8166_v9  ;;  %7028 = vmatpush3.bf16.msra.mxu1 %v7710_v38 }
 0xbb5   : > { %7029 = vmatprep.subr.bf16.mxu1 %v8166_v9 }
 0xbb8   : > { %7030 = vmatpush3.bf16.msra.mxu1 %v7711_v63 }
 0xbb9   : > { %7047 = vmatprep.subr.bf16.mxu1 %v8166_v9 }
 0xc07   : > { %v2116_v14 = vpop.f32.mrb[40].mxu0 }
 0xc08   : > { %v6999_v15 = vpop.f32.mrb[41].mxu0 }
 0xc09   : > { %v2119_v20 = vpop.f32.mrb[42].mxu0 }
 0xc0a   : > { %v7000_v22 = vpop.f32.mrb[43].mxu0  ;;  %v8973_v20 = vld [vmem:[%s8631_s23 + $0x20] sm:$0xff]  }
 0xc7e   : > { %v2159_v23 = vpop.f32.mrb[32].mxu1  ;;  %v2202_v24 = vpop.f32.mrb[44].mxu0 }
 0xc7f   : > { %2252 = vrot.lane.b32.xlu0 %v2159_v23, %s8174_s28  ;;  %v7005_v25 = vpop.f32.mrb[33].mxu1  ;;  %2256 = vrot.lane.b32.xlu1 %v2202_v24, %s8175_s6  ;;  %v7011_v10 = vpop.f32.mrb[45].mxu0 }
 0xc80   : > { %v2162_v26 = vpop.f32.mrb[34].mxu1  ;;  %v2205_v27 = vpop.f32.mrb[46].mxu0  ;;  %v8984_v25 = vld [vmem:[%s8631_s23 + $0x28] sm:$0xff]   ;;  %s9907_s23 = sld [smem:[#allocation34_spill]] }
 0xc81   : > { %v7006_v28 = vpop.f32.mrb[35].mxu1  ;;  %v7012_v19 = vpop.f32.mrb[47].mxu0  ;;  %v7716_v26 = vld [vmem:[%s8651_s25 + $0x10] sm:$0xff]   ;;  %v7717_v27 = vld [vmem:[%s8651_s25 + $0x18] sm:$0xff]   ;;  %s9908_s25 = sld [smem:[#allocation32_spill]] }
 0xc82   : > { %v2350_v28 = vsub.s32 7, %v8702_v16  ;;  %v9000_v19 = vld [vmem:[%s8661_s1] sm:$0xff] }
 0xc83   : > { %2269 = vrot.lane.b32.xlu1 %v8810_v37, %s8173_s27 }
 0xc86   : > { %v2245_v29 = vpop.f32.mrb[36].mxu1 }
 0xc87   : > { %2260 = vrot.lane.b32.xlu0 %v2245_v29, %s8176_s16  ;;  %v7017_v30 = vpop.f32.mrb[37].mxu1  ;;  %v9005_v29 = vrot.slane %v9000_v19, %v2350_v28 }
 0xc88   : > { %v2248_v31 = vpop.f32.mrb[38].mxu1 }
 0xc89   : > { %v7018_v32 = vpop.f32.mrb[39].mxu1 }
 0xc8b   : > { %2273 = vrot.lane.b32.xlu0 %v8833_v46, %s8173_s27  ;;  %v930_v46 = vld [vmem:[%s9902_s17] sm:$0xff] }
 0xc8c   : > { %v2526_v44 = vadd.f32 %v6572_v43, %v930_v46 }
 0xc8f   : > { %2529 = vrot.lane.b32.xlu0 %v2526_v44, %s8173_s27 }
 0xcf1   : > { %v2257_v33 = vpop.permute.xlu1 %2256  ;;  %v2253_v34 = vpop.permute.xlu0 %2252 }
 0xcf2   : > { %v2263_v11 = vsel %vm1088_vm4, %v2116_v14, %v2253_v34  ;;  %v6571_v14 = vld [vmem:[%s9903_s20] ss:$0 sm:$0xff] }
 0xcf3   : > { %v2264_v37 = vsel %vm1528_vm6, %v2263_v11, %v2257_v33  ;;  %v8975_v21 = vadd.f32 %v6571_v14, %v930_v46 }
 0xcf5   : > { %v2270_v35 = vpop.permute.xlu1 %2269  ;;  %v2527_v23 = vadd.f32 %v8975_v21, %v8950_v60 }
 0xcf6   : > { %7022 = vmatpush3.bf16.msra.mxu0 %v2270_v35 }
 0xcf7   : > { %7035 = vmatprep.subr.bf16.mxu0 %v8166_v9 }
 0xcf9   : > { %v2261_v40 = vpop.permute.xlu0 %2260 }
 0xcfa   : > { %v2265_v41 = vsel %vm1530_vm7, %v2264_v37, %v2261_v40  ;;  %v9011_v37 = vrot.slane %v9000_v19, %v1602_v39 }
 0xcfb   : > { %v2266_v42 = vpack.c.bf16 %v2265_v41, %v2265_v41 }
 0xcfd   : > { %7024 = vmatmul.mubr.msk.bf16.vlgmr.msra.gmra.mrb[48].mxu0 %vm959_vm3, %v2266_v42  ;;  %v2274_v47 = vpop.permute.xlu0 %2273 }
 0xcfe   : > { %7043 = vmatprep.mubr.msk.bf16.mxu0 %vm8167_vm2, %v8166_v9  ;;  %7036 = vmatpush3.bf16.msra.mxu0 %v7714_v0 }
 0xcff   : > { %7037 = vmatprep.subr.bf16.mxu0 %v8166_v9 }
 0xd01   : > { %v8952_v61 = vpop.permute.xlu0 %2529 }
 0xd02   : > { %v2532_v62 = vadd.f32 %v8952_v61, %v8950_v60  ;;  %7038 = vmatpush3.bf16.msra.mxu0 %v7715_v12 }
 0xd03   : > { %7039 = vmatprep.subr.bf16.mxu0 %v8166_v9 }
 0xd06   : > { %7040 = vmatpush3.bf16.msra.mxu0 %v7716_v26 }
 0xd07   : > { %7041 = vmatprep.subr.bf16.mxu0 %v8166_v9 }
 0xd0a   : > { %7042 = vmatpush3.bf16.msra.mxu0 %v7717_v27 }
 0xd0b   : > { %7063 = vmatprep.subr.bf16.mxu0 %v8166_v9 }
 0xdd0   : > { %v2313_v48 = vpop.f32.mrb[48].mxu0 }
 0xdd1   : > { %v2314_v49 = vadd.f32 %v2313_v48, %v2274_v47  ;;  %v7025_v50 = vpop.f32.mrb[49].mxu0 }
 0xdd2   : > { %v2316_v51 = vpop.f32.mrb[50].mxu0 }
 0xdd3   : > { %v7026_v52 = vpop.f32.mrb[51].mxu0  ;;  %v2319_v36 = vadd.f32 %v2314_v49, %v8847_v57 }
 0xdd5   : > { %v2320_v53 = vsel %vm959_vm3, %v2319_v36, 0.0 }
 0xdd6   : > { %2321 = vadd.xlane.f32.xlu1 %v2320_v53 }
 0xde7   : > { %2339 = vrot.lane.b32.xlu1 %v2336_v55, %s8172_s21 }
 0xe63   : > { %v2322_v56 = vpop.xlane.xlu1 %2321 }
 0xe64   : > { %v2323_v8 = vmul.f32 0.03125, %v2322_v56 }
 0xe66   : > { %v2324_v58 = vsub.f32 %v2319_v36, %v2323_v8 }
 0xe67   : > { %v2340_v7 = vpop.permute.xlu1 %2339 }
 0xe68   : > { %v2325_v59 = vmul.f32 %v2324_v58, %v2324_v58 }
 0xe6a   : > { %v2326_v57 = vsel %vm959_vm3, %v2325_v59, 0.0 }
 0xe6b   : > { %2327 = vadd.xlane.f32.xlu0 %v2326_v57 }
 0xe81   : > { %2534 = vrot.lane.b32.xlu0 %v2532_v62, %s8172_s21 }
 0xef8   : > { %v2328_v2 = vpop.xlane.xlu0 %2327 }
 0xef9   : > { %v2329_v3 = vmul.f32 0.03125, %v2328_v2 }
 0xefb   : > { %v2330_v4 = vadd.f32 1e-05, %v2329_v3 }
 0xefc   : > { %v2535_v24 = vpop.permute.xlu0 %2534 }
 0xefd   : > { %7784 = vrsqrt.f32 %v2330_v4  ;;  %v2546_v10 = vpack.c.bf16 %v2535_v24, %v2527_v23 }
 0xf07   : > { %v7785_v5 = vpop.eup %7784 }
 0xf08   : > { %v2332_v6 = vmul.f32 %v7785_v5, %v2324_v58 }
 0xf0a   : > { %v2337_v13 = vmul.f32 %v2336_v55, %v2332_v6 }
 0xf0c   : > { %v8970_v15 = vadd.f32 %v2340_v7, %v2337_v13 }
 0xf0e   : > { %v2347_v22 = vpack.c.bf16 %v8970_v15, %v8970_v15 }
 0xf10   : > { %7032 = vmatmul.mubr.msk.bf16.vlgmr.msra.gmra.mrb[40].mxu1 %vm959_vm3, %v2347_v22 }
 0xf11   : > { %7048 = vmatpush3.bf16.msra.mxu1 %v8973_v20  ;;  %7051 = vmatprep.mubr.msk.bf16.mxu1 %vm8167_vm2, %v8166_v9 }
 0xf12   : > { %7049 = vmatprep.subr.bf16.mxu1 %v8166_v9 }
 0xf15   : > { %7050 = vmatpush3.bf16.msra.mxu1 %v8984_v25 }
 0xf16   : > { %7055 = vmatprep.subr.bf16.mxu1 %v8166_v9 }
 0xf18   : > { %7052 = vmatmul.mubr.msk.bf16.vlgmr.msra.gmra.mrb[44].mxu1 %vm959_vm3, %v2546_v10 }
 0xf19   : > { %7059 = vmatprep.mubr.msk.bf16.mxu1 %vm8167_vm2, %v8166_v9 }
 0xfe3   : > { %v2401_v30 = vpop.f32.mrb[40].mxu1 }
 0xfe4   : > { %v2402_v31 = vadd.f32 %v2401_v30, %v9005_v29  ;;  %v7033_v32 = vpop.f32.mrb[41].mxu1 }
 0xfe5   : > { %v2404_v33 = vpop.f32.mrb[42].mxu1 }
 0xfe6   : > { %v2407_v34 = vmax.f32 %v2402_v31, 0.0  ;;  %v7034_v35 = vpop.f32.mrb[43].mxu1 }
 0xfe8   : > { %v2416_v11 = vpack.c.bf16 %v2407_v34, %v2407_v34 }
 0xfea   : > { %7044 = vmatmul.mubr.msk.bf16.vlgmr.msra.gmra.mrb[52].mxu0 %vm2445_vm8, %v2416_v11 }
 0xfeb   : > { %v2600_v40 = vpop.f32.mrb[44].mxu1  ;;  %7065 = vmatprep.mubr.msk.bf16.mxu0 %vm8167_vm2, %v8166_v9 }
 0xfec   : > { %v7053_v41 = vpop.f32.mrb[45].mxu1  ;;  %v2601_v46 = vadd.f32 %v2600_v40, %v9011_v37 }
 0xfed   : > { %v2603_v42 = vpop.f32.mrb[46].mxu1 }
 0xfee   : > { %v2604_v43 = vadd.f32 %v2603_v42, %v9011_v37  ;;  %v7054_v44 = vpop.f32.mrb[47].mxu1 }
 0xff0   : > { %v7601_v47 = vpack.i.bf16 %v2604_v43, %v2601_v46  ;;  %v2682_v48 = vpack.c.bf16 %v2604_v43, %v2601_v46 }
 0xff2   : > { %7602 = vrot.lane.b32.xlu0 %v7601_v47, %s8168_s13  ;;  %7592 = vrot.lane.b32.xlu1 %v7601_v47, %s8169_s22 }
 0xff6   : > { %2610 = vrot.lane.b32.xlu0 %v8984_v25, %s8170_s19  ;;  %7597 = vrot.lane.b32.xlu1 %v7601_v47, %s8171_s15 }
 0xffa   : > { %2711 = vrot.lane.b32.xlu0 %v2682_v48, %s8172_s21  ;;  %2608 = vrot.lane.b32.xlu1 %v8973_v20, %s8170_s19 }
 0xffe   : > { %2538 = vrot.lane.b32.xlu1 %v8950_v60, %s8172_s21 }
0x1064   : > { %v7603_v39 = vpop.permute.xlu0 %7602  ;;  %v7593_v49 = vpop.permute.xlu1 %7592 }
0x1065   : > { %v7595_v50 = vunpack.i.h.bf16 %v7593_v49  ;;  %v7594_v51 = vunpack.i.l.bf16 %v7593_v49  ;;  %v7605_v52 = vunpack.i.h.bf16 %v7603_v39  ;;  %v7604_v36 = vunpack.i.l.bf16 %v7603_v39 }
0x1067   : > { %v2683_v53 = vpack.c.bf16 %v7595_v50, %v7594_v51  ;;  %v2685_v59 = vpack.c.bf16 %v7605_v52, %v7604_v36 }
0x1068   : > { %v2611_v55 = vpop.permute.xlu0 %2610  ;;  %v7598_v56 = vpop.permute.xlu1 %7597 }
0x1069   : > { %v7600_v8 = vunpack.i.h.bf16 %v7598_v56  ;;  %v7599_v58 = vunpack.i.l.bf16 %v7598_v56  ;;  %2761 = vrot.lane.b32.xlu1 %v2683_v53, %s8172_s21 }
0x106b   : > { %v2684_v57 = vpack.c.bf16 %v7600_v8, %v7599_v58 }
0x106c   : > { %v2712_v62 = vpop.permute.xlu0 %2711  ;;  %v2609_v38 = vpop.permute.xlu1 %2608 }
0x106d   : > { %v2717_v63 = vsel %vm1088_vm4, %v2712_v62, 0  ;;  %2861 = vrot.lane.b32.xlu1 %v2685_v59, %s8172_s21  ;;  %2811 = vrot.lane.b32.xlu0 %v2684_v57, %s8172_s21 }
0x106e   : > { %7064 = vmatpush3.bf16.xpose.msra.mxu0 %v2717_v63  ;;  %7056 = vmatpush3.bf16.msra.mxu1 %v2609_v38 }
0x106f   : > { %7057 = vmatprep.subr.bf16.mxu1 %v8166_v9  ;;  %7075 = vmatprep.subr.bf16.mxu0 %v8166_v9 }
0x1070   : > { %v2539_v0 = vpop.permute.xlu1 %2538 }
0x1071   : > { %v2607_v12 = vpack.c.bf16 %v2539_v0, %v8950_v60 }
0x1072   : > { %7058 = vmatpush3.bf16.msra.mxu1 %v2611_v55 }
0x1073   : > { %7069 = vmatprep.subr.bf16.mxu1 %v8166_v9 }
0x1075   : > { %7066 = vmatmul.mubr.msk.bf16.vlgmr.msra.gmra.mrb[56].mxu0 %vm1088_vm4, %v2682_v48  ;;  %7060 = vmatmul.mubr.msk.bf16.vlgmr.msra.gmra.mrb[48].mxu1 %vm959_vm3, %v2607_v12 }
0x1076   : > { %7071 = vmatprep.mubr.msk.bf16.mxu1 %vm8167_vm2, %v8166_v9  ;;  %7077 = vmatprep.mubr.msk.bf16.mxu0 %vm8167_vm2, %v8166_v9 }
0x10bd   : > { %v9042_v2 = vpop.f32.mrb[52].mxu0 }
0x10be   : > { %v7045_v3 = vpop.f32.mrb[53].mxu0 }
0x10bf   : > { %v2486_v4 = vpop.f32.mrb[54].mxu0 }
0x10c0   : > { %v7046_v5 = vpop.f32.mrb[55].mxu0 }
0x10db   : > { %v2762_v6 = vpop.permute.xlu1 %2761 }
0x10dc   : > { %v2767_v7 = vsel %vm1088_vm4, %v2762_v6, 0 }
0x10dd   : > { %7070 = vmatpush3.bf16.xpose.msra.mxu1 %v2767_v7 }
0x10de   : > { %7081 = vmatprep.subr.bf16.mxu1 %v8166_v9 }
0x10df   : > { %v2812_v13 = vpop.permute.xlu0 %2811  ;;  %v2862_v22 = vpop.permute.xlu1 %2861 }
0x10e0   : > { %v2817_v14 = vsel %vm1088_vm4, %v2812_v13, 0  ;;  %v2867_v23 = vsel %vm1088_vm4, %v2862_v22, 0 }
0x10e1   : > { %7076 = vmatpush3.bf16.xpose.msra.mxu0 %v2817_v14 }
0x10e2   : > { %7087 = vmatprep.subr.bf16.mxu0 %v8166_v9 }
0x10e4   : > { %7072 = vmatmul.mubr.msk.bf16.vlgmr.msra.gmra.mrb[52].mxu1 %vm1088_vm4, %v2683_v53 }
0x10e5   : > { %7082 = vmatpush3.bf16.xpose.msra.mxu1 %v2867_v23  ;;  %7083 = vmatprep.mubr.msk.bf16.mxu1 %vm8167_vm2, %v8166_v9 }
0x10e6   : > { %7093 = vmatprep.subr.bf16.mxu1 %v8166_v9 }
0x10e8   : > { %7078 = vmatmul.mubr.msk.bf16.vlgmr.msra.gmra.mrb[60].mxu0 %vm1088_vm4, %v2684_v57 }
0x10e9   : > { %7089 = vmatprep.mubr.msk.bf16.mxu0 %vm8167_vm2, %v8166_v9 }
0x10ec   : > { %7084 = vmatmul.mubr.msk.bf16.vlgmr.msra.gmra.mrb[56].mxu1 %vm1088_vm4, %v2685_v59 }
0x10ed   : > { %7095 = vmatprep.mubr.msk.bf16.mxu1 %vm8167_vm2, %v8166_v9 }
0x1148   : > { %v2753_v24 = vpop.f32.mrb[56].mxu0  ;;  %v2655_v10 = vpop.f32.mrb[48].mxu1 }
0x1149   : > { %v7067_v26 = vpop.f32.mrb[57].mxu0  ;;  %v2910_v27 = vsel %vm1528_vm6, %v2753_v24, -inf  ;;  %v7061_v30 = vpop.f32.mrb[49].mxu1 }
0x114a   : > { %2911 = vmax.xlane.f32.xlu0 %v2910_v27  ;;  %v2756_v31 = vpop.f32.mrb[58].mxu0  ;;  %v2658_v32 = vpop.f32.mrb[50].mxu1 }
0x114b   : > { %v7068_v33 = vpop.f32.mrb[59].mxu0  ;;  %v2913_v34 = vsel %vm1528_vm6, %v2756_v31, -inf  ;;  %v7062_v35 = vpop.f32.mrb[51].mxu1 }
0x114c   : > { %2914 = vmax.xlane.f32.xlu1 %v2913_v34 }
0x11b7   : > { %v2803_v11 = vpop.f32.mrb[52].mxu1 }
0x11b8   : > { %v7073_v40 = vpop.f32.mrb[53].mxu1  ;;  %v2916_v41 = vsel %vm1528_vm6, %v2803_v11, -inf }
0x11b9   : > { %v2806_v42 = vpop.f32.mrb[54].mxu1  ;;  %2917 = vmax.xlane.f32.xlu0 %v2916_v41 }
0x11ba   : > { %v7074_v46 = vpop.f32.mrb[55].mxu1  ;;  %v2919_v47 = vsel %vm1528_vm6, %v2806_v42, -inf }
0x11bb   : > { %v2853_v43 = vpop.f32.mrb[60].mxu0 }
0x11bc   : > { %v7079_v44 = vpop.f32.mrb[61].mxu0  ;;  %v2922_v48 = vsel %vm1528_vm6, %v2853_v43, -inf }
0x11bd   : > { %2920 = vmax.xlane.f32.xlu0 %v2919_v47  ;;  %2923 = vmax.xlane.f32.xlu1 %v2922_v48  ;;  %v2856_v39 = vpop.f32.mrb[62].mxu0 }
0x11be   : > { %v7080_v49 = vpop.f32.mrb[63].mxu0  ;;  %v2925_v36 = vsel %vm1528_vm6, %v2856_v39, -inf }
0x11bf   : > { %v2903_v50 = vpop.f32.mrb[56].mxu1 }
0x11c0   : > { %v7085_v51 = vpop.f32.mrb[57].mxu1  ;;  %v2928_v52 = vsel %vm1528_vm6, %v2903_v50, -inf }
0x11c1   : > { %v2906_v53 = vpop.f32.mrb[58].mxu1  ;;  %2929 = vmax.xlane.f32.xlu1 %v2928_v52  ;;  %2926 = vmax.xlane.f32.xlu0 %v2925_v36 }
0x11c2   : > { %v7086_v55 = vpop.f32.mrb[59].mxu1  ;;  %v2931_v56 = vsel %vm1528_vm6, %v2906_v53, -inf }
0x11c5   : > { %2932 = vmax.xlane.f32.xlu0 %v2931_v56 }
0x11d2   : > { %2615 = vrot.lane.b32.xlu1 %v9011_v37, %s8170_s19 }
0x11d7   : > { %v2912_v6 = vpop.xlane.xlu0 %2911 }
0x11d8   : > { %v2934_v7 = vsub.f32 %v2753_v24, %v2912_v6 }
0x11d9   : > { %v2915_v8 = vpop.xlane.xlu1 %2914 }
0x11da   : > { %v2942_v14 = vmul.f32 1.442695, %v2934_v7  ;;  %v2935_v22 = vsub.f32 %v2756_v31, %v2915_v8 }
0x1246   : > { %v2918_v13 = vpop.xlane.xlu0 %2917 }
0x1247   : > { %v2936_v26 = vsub.f32 %v2803_v11, %v2918_v13 }
0x1249   : > { %v2946_v27 = vmul.f32 1.442695, %v2936_v26 }
0x124a   : > { %v2924_v58 = vpop.xlane.xlu1 %2923  ;;  %v2921_v23 = vpop.xlane.xlu0 %2920 }
0x124b   : > { %v2938_v59 = vsub.f32 %v2853_v43, %v2924_v58  ;;  %v2937_v30 = vsub.f32 %v2806_v42, %v2921_v23 }
0x124d   : > { %v2950_v57 = vmul.f32 1.442695, %v2938_v59  ;;  %v2948_v33 = vmul.f32 1.442695, %v2937_v30 }
0x124e   : > { %v2930_v62 = vpop.xlane.xlu1 %2929 }
0x124f   : > { %7786 = vpow2.f32 %v2950_v57  ;;  %v2940_v35 = vsub.f32 %v2903_v50, %v2930_v62 }
0x1250   : > { %7788 = vpow2.f32 %v2942_v14 }
0x1251   : > { %v2954_v46 = vmul.f32 1.442695, %v2940_v35 }
0x1252   : > { %v2616_v38 = vpop.permute.xlu1 %2615 }
0x1253   : > { %v2656_v63 = vadd.f32 %v2655_v10, %v2616_v38  ;;  %v2659_v0 = vadd.f32 %v2658_v32, %v2616_v38  ;;  %v2944_v10 = vmul.f32 1.442695, %v2935_v22  ;;  %v2927_v32 = vpop.xlane.xlu0 %2926 }
0x1254   : > { %v2939_v34 = vsub.f32 %v2856_v39, %v2927_v32 }
0x1255   : > { %v2706_v12 = vpack.c.bf16 %v2659_v0, %v2656_v63  ;;  %v7606_v3 = vpack.i.bf16 %v2659_v0, %v2656_v63  ;;  %7790 = vpow2.f32 %v2944_v10 }
0x1256   : > { %7792 = vpow2.f32 %v2946_v27  ;;  %v2952_v31 = vmul.f32 1.442695, %v2939_v34 }
0x1257   : > { %7088 = vmatpush3.bf16.msra.mxu0 %v2706_v12  ;;  %7607 = vrot.lane.b32.xlu0 %v7606_v3, %s8169_s22  ;;  %7794 = vpow2.f32 %v2948_v33  ;;  %v2933_v40 = vpop.xlane.xlu0 %2932 }
0x1258   : > { %7099 = vmatprep.subr.bf16.mxu0 %v8166_v9  ;;  %7796 = vpow2.f32 %v2952_v31  ;;  %v2941_v42 = vsub.f32 %v2906_v53, %v2933_v40 }
0x1259   : > { %v9071_v4 = vpop.eup %7786  ;;  %7798 = vpow2.f32 %v2954_v46 }
0x125a   : > { %v2970_v5 = vsel %vm1528_vm6, %v9071_v4, 0.0  ;;  %v7789_v24 = vpop.eup %7788  ;;  %v2956_v47 = vmul.f32 1.442695, %v2941_v42 }
0x125b   : > { %2971 = vadd.xlane.f32.xlu1 %v2970_v5  ;;  %v2958_v41 = vsel %vm1528_vm6, %v7789_v24, 0.0 }
0x125c   : > { %7800 = vpow2.f32 %v2956_v47 }
0x125f   : > { %v7791_v11 = vpop.eup %7790 }
0x1260   : > { %v2961_v43 = vsel %vm1528_vm6, %v7791_v11, 0.0  ;;  %v7793_v44 = vpop.eup %7792 }
0x1261   : > { %v7795_v48 = vpop.eup %7794 }
0x1262   : > { %v2967_v39 = vsel %vm1528_vm6, %v7795_v48, 0.0  ;;  %v7797_v49 = vpop.eup %7796 }
0x1263   : > { %v2973_v50 = vsel %vm1528_vm6, %v7797_v49, 0.0  ;;  %v9083_v51 = vpop.eup %7798 }
0x1264   : > { %v2976_v52 = vsel %vm1528_vm6, %v9083_v51, 0.0 }
0x1266   : > { %v7801_v36 = vpop.eup %7800 }
0x1267   : > { %v2979_v53 = vsel %vm1528_vm6, %v7801_v36, 0.0 }
0x126c   : > { %7617 = vrot.lane.b32.xlu1 %v7606_v3, %s8168_s13 }
0x1270   : > { %3211 = vrot.lane.b32.xlu1 %v8984_v25, %s8173_s27  ;;  %v2964_v25 = vsel %vm1528_vm6, %v7793_v44, 0.0 }
0x1276   : > { %2959 = vadd.xlane.f32.xlu0 %v2958_v41 }
0x127a   : > { %2962 = vadd.xlane.f32.xlu0 %v2961_v43 }
0x127e   : > { %2965 = vadd.xlane.f32.xlu0 %v2964_v25 }
0x1282   : > { %2968 = vadd.xlane.f32.xlu0 %v2967_v39 }
0x1286   : > { %2974 = vadd.xlane.f32.xlu0 %v2973_v50 }
0x128a   : > { %2977 = vadd.xlane.f32.xlu0 %v2976_v52 }
0x128e   : > { %2980 = vadd.xlane.f32.xlu0 %v2979_v53 }
0x12a4   : > { %7612 = vrot.lane.b32.xlu0 %v7606_v3, %s8171_s15 }
0x12a8   : > { %3209 = vrot.lane.b32.xlu0 %v8973_v20, %s8173_s27 }
0x12c9   : > { %v7608_v55 = vpop.permute.xlu0 %7607 }
0x12ca   : > { %v7610_v56 = vunpack.i.h.bf16 %v7608_v55  ;;  %v7609_v8 = vunpack.i.l.bf16 %v7608_v55 }
0x12cc   : > { %v2707_v58 = vpack.c.bf16 %v7610_v56, %v7609_v8 }
0x12ce   : > { %7094 = vmatpush3.bf16.msra.mxu1 %v2707_v58 }
0x12cf   : > { %7105 = vmatprep.subr.bf16.mxu1 %v8166_v9 }
0x12e8   : > { %v2972_v0 = vpop.xlane.xlu1 %2971 }
0x12ec   : > { %v7618_v7 = vpop.permute.xlu1 %7617 }
0x12ed   : > { %v7620_v23 = vunpack.i.h.bf16 %v7618_v7  ;;  %v7619_v10 = vunpack.i.l.bf16 %v7618_v7 }
0x12ef   : > { %v2709_v34 = vpack.c.bf16 %v7620_v23, %v7619_v10 }
0x12f0   : > { %v3212_v8 = vpop.permute.xlu1 %3211 }
0x1303   : > { %v2960_v59 = vpop.xlane.xlu0 %2959 }
0x1304   : > { %7802 = vrcp.f32 %v2960_v59 }
0x1307   : > { %v2963_v57 = vpop.xlane.xlu0 %2962 }
0x1308   : > { %7804 = vrcp.f32 %v2963_v57 }
0x130b   : > { %v2966_v62 = vpop.xlane.xlu0 %2965 }
0x130c   : > { %7806 = vrcp.f32 %v2966_v62 }
0x130e   : > { %v7803_v63 = vpop.eup %7802 }
0x130f   : > { %v2969_v38 = vpop.xlane.xlu0 %2968  ;;  %v2990_v3 = vmul.f32 %v7803_v63, %v7789_v24 }
0x1310   : > { %7808 = vrcp.f32 %v2969_v38 }
0x1312   : > { %v7805_v12 = vpop.eup %7804 }
0x1313   : > { %v2991_v20 = vmul.f32 %v7805_v12, %v7791_v11  ;;  %v2975_v5 = vpop.xlane.xlu0 %2974 }
0x1314   : > { %7810 = vrcp.f32 %v2975_v5 }
0x1315   : > { %v2998_v6 = vpack.c.bf16 %v2991_v20, %v2990_v3  ;;  %7812 = vrcp.f32 %v2972_v0 }
0x1316   : > { %v7807_v14 = vpop.eup %7806 }
0x1317   : > { %7090 = vmatmul.mubr.msk.bf16.vlgmr.msra.gmra.mrb[64].mxu0 %vm1528_vm6, %v2998_v6  ;;  %v2978_v13 = vpop.xlane.xlu0 %2977  ;;  %v2992_v26 = vmul.f32 %v7807_v14, %v7793_v44 }
0x1318   : > { %7101 = vmatprep.mubr.msk.bf16.mxu0 %vm8167_vm2, %v8166_v9  ;;  %7814 = vrcp.f32 %v2978_v13 }
0x131a   : > { %v7809_v22 = vpop.eup %7808 }
0x131b   : > { %v2993_v27 = vmul.f32 %v7809_v22, %v7795_v48  ;;  %v2981_v30 = vpop.xlane.xlu0 %2980 }
0x131c   : > { %7816 = vrcp.f32 %v2981_v30 }
0x131d   : > { %v2999_v32 = vpack.c.bf16 %v2993_v27, %v2992_v26 }
0x131e   : > { %v7811_v33 = vpop.eup %7810 }
0x131f   : > { %v7613_v24 = vpop.permute.xlu0 %7612  ;;  %7096 = vmatmul.mubr.msk.bf16.vlgmr.msra.gmra.mrb[60].mxu1 %vm1528_vm6, %v2999_v32  ;;  %v7813_v35 = vpop.eup %7812  ;;  %v2995_v41 = vmul.f32 %v7811_v33, %v7797_v49 }
0x1320   : > { %v7615_v31 = vunpack.i.h.bf16 %v7613_v24  ;;  %v7614_v40 = vunpack.i.l.bf16 %v7613_v24  ;;  %7106 = vmatpush3.bf16.msra.mxu1 %v2709_v34  ;;  %7107 = vmatprep.mubr.msk.bf16.mxu1 %vm8167_vm2, %v8166_v9  ;;  %v2994_v46 = vmul.f32 %v7813_v35, %v9071_v4 }
0x1321   : > { %7119 = vmatprep.subr.bf16.mxu1 %v8166_v9 }
0x1322   : > { %v2708_v11 = vpack.c.bf16 %v7615_v31, %v7614_v40  ;;  %v7815_v42 = vpop.eup %7814  ;;  %v3000_v43 = vpack.c.bf16 %v2995_v41, %v2994_v46 }
0x1323   : > { %v2996_v47 = vmul.f32 %v7815_v42, %v9083_v51  ;;  %v3210_v4 = vpop.permute.xlu0 %3209 }
0x1324   : > { %7100 = vmatpush3.bf16.msra.mxu0 %v2708_v11 }
0x1325   : > { %7111 = vmatprep.subr.bf16.mxu0 %v8166_v9 }
0x1326   : > { %v7817_v44 = vpop.eup %7816 }
0x1327   : > { %v2997_v25 = vmul.f32 %v7817_v44, %v7801_v36  ;;  %7102 = vmatmul.mubr.msk.bf16.vlgmr.msra.gmra.mrb[68].mxu0 %vm1528_vm6, %v3000_v43 }
0x1328   : > { %7115 = vmatprep.mubr.msk.bf16.mxu0 %vm8167_vm2, %v8166_v9  ;;  %7112 = vmatpush3.bf16.msra.mxu0 %v3210_v4 }
0x1329   : > { %v3001_v48 = vpack.c.bf16 %v2997_v25, %v2996_v47  ;;  %7113 = vmatprep.subr.bf16.mxu0 %v8166_v9 }
0x132b   : > { %7108 = vmatmul.mubr.msk.bf16.vlgmr.msra.gmra.mrb[64].mxu1 %vm1528_vm6, %v3001_v48 }
0x132c   : > { %7127 = vmatprep.mubr.msk.bf16.mxu1 %vm8167_vm2, %v8166_v9  ;;  %7114 = vmatpush3.bf16.msra.mxu0 %v3212_v8  ;;  %v7719_v8 = vld [vmem:[%s9907_s23 + $0x8] sm:$0xff]  }
0x132d   : > { %7131 = vmatprep.subr.bf16.mxu0 %v8166_v9 }
0x13ea   : > { %v3039_v39 = vpop.f32.mrb[64].mxu0 }
0x13eb   : > { %v7091_v49 = vpop.f32.mrb[65].mxu0 }
0x13ec   : > { %v3042_v50 = vpop.f32.mrb[66].mxu0 }
0x13ed   : > { %v7092_v51 = vpop.f32.mrb[67].mxu0 }
0x13f2   : > { %v3083_v52 = vpop.f32.mrb[60].mxu1 }
0x13f3   : > { %v7097_v36 = vpop.f32.mrb[61].mxu1 }
0x13f4   : > { %v3086_v53 = vpop.f32.mrb[62].mxu1 }
0x13f5   : > { %v7621_v55 = vpack.i.bf16 %v3086_v53, %v3083_v52  ;;  %v7098_v56 = vpop.f32.mrb[63].mxu1 }
0x13f6   : > { %v7718_v56 = vld [vmem:[%s9907_s23] sm:$0xff]  }
0x13f7   : > { %7622 = vrot.lane.b32.xlu0 %v7621_v55, %s8174_s28 }
0x13fa   : > { %v3127_v58 = vpop.f32.mrb[68].mxu0 }
0x13fb   : > { %v7103_v59 = vpop.f32.mrb[69].mxu0 }
0x13fc   : > { %v3130_v57 = vpop.f32.mrb[70].mxu0 }
0x13fd   : > { %v7626_v62 = vpack.i.bf16 %v3130_v57, %v3127_v58  ;;  %v7104_v38 = vpop.f32.mrb[71].mxu0  ;;  %v3305_v57 = vsub.s32 5, %v8702_v16 }
0x13fe   : > { %v3171_v63 = vpop.f32.mrb[64].mxu1 }
0x13ff   : > { %v7109_v0 = vpop.f32.mrb[65].mxu1  ;;  %7627 = vrot.lane.b32.xlu0 %v7626_v62, %s8175_s6  ;;  %v7901_v62 = vld [vmem:[%s8661_s1 + $0x8] sm:$0xff] }
0x1400   : > { %v3174_v12 = vpop.f32.mrb[66].mxu1  ;;  %v3306_v38 = vrot.slane %v7901_v62, %v3305_v57  ;;  %v7721_v0 = vld [vmem:[%s9908_s25 + $0x8] sm:$0xff]  }
0x1401   : > { %v7631_v3 = vpack.i.bf16 %v3174_v12, %v3171_v63  ;;  %v7110_v20 = vpop.f32.mrb[67].mxu1  ;;  %v7720_v63 = vld [vmem:[%s9908_s25] sm:$0xff]   ;;  %v7723_v12 = vld [vmem:[%s9908_s25 + $0x18] sm:$0xff]  }
0x1402   : > { %7120 = vmatpush3.bf16.msra.mxu1 %v7720_v63 }
0x1403   : > { %7632 = vrot.lane.b32.xlu0 %v7631_v3, %s8176_s16  ;;  %7121 = vmatprep.subr.bf16.mxu1 %v8166_v9  ;;  %v9158_v3 = vrot.slane %v9000_v19, %v2335_v18 }
0x1406   : > { %7122 = vmatpush3.bf16.msra.mxu1 %v7721_v0 }
0x1407   : > { %3215 = vrot.lane.b32.xlu0 %v9011_v37, %s8173_s27  ;;  %7123 = vmatprep.subr.bf16.mxu1 %v8166_v9 }
0x1469   : > { %v7623_v5 = vpop.permute.xlu0 %7622 }
0x146a   : > { %v7625_v7 = vunpack.i.h.bf16 %v7623_v5  ;;  %v7624_v13 = vunpack.i.l.bf16 %v7623_v5 }
0x146c   : > { %v3202_v10 = vsel %vm1088_vm4, %v3039_v39, %v7624_v13  ;;  %v3203_v26 = vsel %vm1088_vm4, %v3042_v50, %v7625_v7 }
0x1471   : > { %v7628_v6 = vpop.permute.xlu0 %7627 }
0x1472   : > { %v7630_v14 = vunpack.i.h.bf16 %v7628_v6  ;;  %v7629_v22 = vunpack.i.l.bf16 %v7628_v6 }
0x1474   : > { %v3205_v32 = vsel %vm1528_vm6, %v3203_v26, %v7630_v14  ;;  %v3204_v33 = vsel %vm1528_vm6, %v3202_v10, %v7629_v22 }
0x1475   : > { %v7633_v23 = vpop.permute.xlu0 %7632 }
0x1476   : > { %v7635_v27 = vunpack.i.h.bf16 %v7633_v23  ;;  %v7634_v30 = vunpack.i.l.bf16 %v7633_v23 }
0x1478   : > { %v3206_v34 = vsel %vm1530_vm7, %v3204_v33, %v7634_v30  ;;  %v3207_v37 = vsel %vm1530_vm7, %v3205_v32, %v7635_v27 }
0x1479   : > { %v3208_v24 = vpack.c.bf16 %v3207_v37, %v3206_v34  ;;  %v3216_v40 = vpop.permute.xlu0 %3215 }
0x147b   : > { %7116 = vmatmul.mubr.msk.bf16.vlgmr.msra.gmra.mrb[72].mxu0 %vm959_vm3, %v3208_v24 }
0x147c   : > { %7135 = vmatprep.mubr.msk.bf16.mxu0 %vm8167_vm2, %v8166_v9  ;;  %7132 = vmatpush3.bf16.msra.mxu0 %v7718_v56 }
0x147d   : > { %7133 = vmatprep.subr.bf16.mxu0 %v8166_v9 }
0x1480   : > { %7134 = vmatpush3.bf16.msra.mxu0 %v7719_v8 }
0x1481   : > { %7139 = vmatprep.subr.bf16.mxu0 %v8166_v9 }
0x1483   : > { %7136 = vmatmul.mubr.msk.bf16.vlgmr.msra.gmra.mrb[76].mxu0 %vm959_vm3, %v8840_v54  ;;  %v7722_v54 = vld [vmem:[%s9908_s25 + $0x10] sm:$0xff]  }
0x1484   : > { %7143 = vmatprep.mubr.msk.bf16.mxu0 %vm8167_vm2, %v8166_v9  ;;  %7124 = vmatpush3.bf16.msra.mxu1 %v7722_v54 }
0x1485   : > { %7125 = vmatprep.subr.bf16.mxu1 %v8166_v9 }
0x1488   : > { %7126 = vmatpush3.bf16.msra.mxu1 %v7723_v12 }
0x1489   : > { %7147 = vmatprep.subr.bf16.mxu1 %v8166_v9 }
0x154e   : > { %v3255_v35 = vpop.f32.mrb[72].mxu0 }
0x154f   : > { %v7117_v31 = vpop.f32.mrb[73].mxu0  ;;  %v3256_v42 = vadd.f32 %v3255_v35, %v3216_v40 }
0x1550   : > { %v3258_v41 = vpop.f32.mrb[74].mxu0 }
0x1551   : > { %v3259_v11 = vadd.f32 %v3258_v41, %v3216_v40  ;;  %v7118_v46 = vpop.f32.mrb[75].mxu0 }
0x1552   : > { %v3313_v46 = vsel %vm959_vm3, %v8975_v21, %v8952_v61 }
0x1553   : > { %3263 = vrot.lane.b32.xlu1 %v3259_v11, %s8173_s27 }
0x1556   : > { %v3457_v20 = vpop.f32.mrb[76].mxu0 }
0x1557   : > { %v7137_v5 = vpop.f32.mrb[77].mxu0 }
0x1558   : > { %v3460_v6 = vpop.f32.mrb[78].mxu0 }
0x1559   : > { %v7138_v7 = vpop.f32.mrb[79].mxu0 }
0x15c5   : > { %v3264_v43 = vpop.permute.xlu1 %3263 }
0x15c6   : > { %v3266_v44 = vsel %vm959_vm3, %v3256_v42, %v3264_v43 }
0x15c7   : > { %v3267_v47 = vadd.f32 %v3266_v44, %v8950_v60 }
0x15c9   : > { %3282 = vrot.lane.b32.xlu0 %v3267_v47, %s8172_s21  ;;  %v3268_v25 = vsel %vm959_vm3, %v3267_v47, 0.0 }
0x15e8   : > { %3269 = vadd.xlane.f32.xlu0 %v3268_v25 }
0x163b   : > { %v3283_v48 = vpop.permute.xlu0 %3282 }
0x163c   : > { %v3285_v4 = vsel %vm959_vm3, %v3283_v48, 0.0 }
0x163d   : > { %3286 = vadd.xlane.f32.xlu1 %v3285_v4 }
0x1675   : > { %v3270_v39 = vpop.xlane.xlu0 %3269 }
0x1676   : > { %v3271_v49 = vmul.f32 0.03125, %v3270_v39 }
0x1678   : > { %v3272_v50 = vsub.f32 %v3267_v47, %v3271_v49 }
0x167a   : > { %v3273_v51 = vmul.f32 %v3272_v50, %v3272_v50 }
0x167c   : > { %v3274_v52 = vsel %vm959_vm3, %v3273_v51, 0.0 }
0x167d   : > { %3275 = vadd.xlane.f32.xlu1 %v3274_v52 }
0x16ca   : > { %v3287_v36 = vpop.xlane.xlu1 %3286 }
0x16cb   : > { %v3288_v60 = vmul.f32 0.03125, %v3287_v36 }
0x16cd   : > { %v3289_v53 = vsub.f32 %v3267_v47, %v3288_v60 }
0x16cf   : > { %v3290_v55 = vmul.f32 %v3289_v53, %v3289_v53 }
0x16d1   : > { %3292 = vrot.lane.b32.xlu0 %v3290_v55, %s8172_s21 }
0x16d5   : > { %3420 = vrot.lane.b32.xlu0 %v9158_v3, %s8170_s19 }
0x16d9   : > { %3468 = vrot.lane.b32.xlu0 %v7718_v56, %s8170_s19 }
0x170a   : > { %v3276_v13 = vpop.xlane.xlu1 %3275 }
0x170b   : > { %v3277_v14 = vmul.f32 0.03125, %v3276_v13 }
0x170d   : > { %v3278_v22 = vadd.f32 1e-05, %v3277_v14 }
0x170f   : > { %7818 = vrsqrt.f32 %v3278_v22 }
0x1719   : > { %v7819_v27 = vpop.eup %7818 }
0x171a   : > { %v3280_v32 = vmul.f32 %v7819_v27, %v3272_v50 }
0x1743   : > { %v3293_v58 = vpop.permute.xlu0 %3292 }
0x1744   : > { %v3295_v59 = vsel %vm959_vm3, %v3293_v58, 0.0 }
0x1745   : > { %3296 = vadd.xlane.f32.xlu1 %v3295_v59 }
0x1747   : > { %v3421_v30 = vpop.permute.xlu0 %3420 }
0x1748   : > { %v3458_v34 = vadd.f32 %v3457_v20, %v3421_v30  ;;  %v3461_v37 = vadd.f32 %v3460_v6, %v3421_v30 }
0x174a   : > { %v7641_v31 = vpack.i.bf16 %v3461_v37, %v3458_v34  ;;  %v3589_v41 = vpack.c.bf16 %v3461_v37, %v3458_v34 }
0x174b   : > { %v3469_v61 = vpop.permute.xlu0 %3468 }
0x174c   : > { %7637 = vrot.lane.b32.xlu0 %v7641_v31, %s8169_s22  ;;  %v3653_v44 = vsel %vm1088_vm4, %v3589_v41, 0  ;;  %7140 = vmatpush3.bf16.msra.mxu0 %v3469_v61 }
0x174d   : > { %7141 = vmatprep.subr.bf16.mxu0 %v8166_v9 }
0x1756   : > { %3309 = vrot.lane.b32.xlu1 %v3306_v38, %s8170_s19 }
0x175a   : > { %3470 = vrot.lane.b32.xlu1 %v7719_v8, %s8170_s19 }
0x175e   : > { %7642 = vrot.lane.b32.xlu1 %v7641_v31, %s8171_s15 }
0x1762   : > { %7647 = vrot.lane.b32.xlu1 %v7641_v31, %s8168_s13 }
0x1766   : > { %7652 = vrot.lane.b32.xlu1 %v7641_v31, %s8172_s21 }
0x176a   : > { %7657 = vrot.lane.b32.xlu1 %v7641_v31, %s8177_s18 }
0x176e   : > { %7662 = vrot.lane.b32.xlu1 %v7641_v31, %s8178_s7 }
0x1772   : > { %7667 = vrot.lane.b32.xlu1 %v7641_v31, %s8179_s11 }
0x17be   : > { %v7638_v47 = vpop.permute.xlu0 %7637 }
0x17bf   : > { %v7640_v25 = vunpack.i.h.bf16 %v7638_v47  ;;  %v7639_v48 = vunpack.i.l.bf16 %v7638_v47 }
0x17c1   : > { %v3590_v4 = vpack.c.bf16 %v7640_v25, %v7639_v48 }
0x17c3   : > { %v3699_v39 = vsel %vm1088_vm4, %v3590_v4, 0 }
0x17d2   : > { %v3297_v23 = vpop.xlane.xlu1 %3296 }
0x17d3   : > { %v3298_v10 = vmul.f32 0.03125, %v3297_v23 }
0x17d5   : > { %v3299_v26 = vadd.f32 1e-05, %v3298_v10 }
0x17d6   : > { %v3310_v35 = vpop.permute.xlu1 %3309 }
0x17d7   : > { %7820 = vrsqrt.f32 %v3299_v26 }
0x17da   : > { %v3471_v21 = vpop.permute.xlu1 %3470 }
0x17db   : > { %7142 = vmatpush3.bf16.msra.mxu0 %v3471_v21 }
0x17dc   : > { %7153 = vmatprep.subr.bf16.mxu0 %v8166_v9 }
0x17de   : > { %7144 = vmatmul.mubr.msk.bf16.vlgmr.msra.gmra.mrb[80].mxu0 %vm959_vm3, %v8858_v1  ;;  %v7643_v49 = vpop.permute.xlu1 %7642 }
0x17df   : > { %7155 = vmatprep.mubr.msk.bf16.mxu0 %vm8167_vm2, %v8166_v9  ;;  %v7645_v50 = vunpack.i.h.bf16 %v7643_v49  ;;  %v7644_v51 = vunpack.i.l.bf16 %v7643_v49 }
0x17e1   : > { %v7821_v18 = vpop.eup %7820  ;;  %v3591_v52 = vpack.c.bf16 %v7645_v50, %v7644_v51  ;;  %v2505_v50 = vsub.s32 4, %v8702_v16 }
0x17e2   : > { %v3301_v33 = vmul.f32 %v7821_v18, %v3289_v53  ;;  %v7648_v58 = vpop.permute.xlu1 %7647 }
0x17e3   : > { %v3745_v8 = vsel %vm1088_vm4, %v3591_v52, 0  ;;  %v7650_v62 = vunpack.i.h.bf16 %v7648_v58  ;;  %v9240_v51 = vrot.slane %v9000_v19, %v2505_v50 }
0x17e4   : > { %v3302_v24 = vsel %vm959_vm3, %v3280_v32, %v3301_v33  ;;  %7154 = vmatpush3.bf16.xpose.msra.mxu0 %v3699_v39 }
0x17e5   : > { %v3307_v40 = vmul.f32 %v3306_v38, %v3302_v24  ;;  %7165 = vmatprep.subr.bf16.mxu0 %v8166_v9  ;;  %v7649_v38 = vunpack.i.l.bf16 %v7648_v58 }
0x17e6   : > { %v7653_v59 = vpop.permute.xlu1 %7652 }
0x17e7   : > { %v9165_v11 = vadd.f32 %v3310_v35, %v3307_v40  ;;  %v7655_v12 = vunpack.i.h.bf16 %v7653_v59  ;;  %v3592_v20 = vpack.c.bf16 %v7650_v62, %v7649_v38 }
0x17e9   : > { %v3314_v42 = vadd.f32 %v3313_v46, %v9165_v11  ;;  %v3791_v10 = vsel %vm1088_vm4, %v3592_v20, 0 }
0x17ea   : > { %v7658_v63 = vpop.permute.xlu1 %7657 }
0x17eb   : > { %v3335_v43 = vpack.c.bf16 %v3314_v42, %v3314_v42  ;;  %v7660_v22 = vunpack.i.h.bf16 %v7658_v63  ;;  %v7659_v23 = vunpack.i.l.bf16 %v7658_v63 }
0x17ed   : > { %7128 = vmatmul.mubr.msk.bf16.vlgmr.msra.gmra.mrb[68].mxu1 %vm2445_vm8, %v3335_v43  ;;  %v3594_v34 = vpack.c.bf16 %v7660_v22, %v7659_v23 }
0x17ee   : > { %7148 = vmatpush3.bf16.xpose.msra.mxu1 %v3653_v44  ;;  %7149 = vmatprep.mubr.msk.bf16.mxu1 %vm8167_vm2, %v8166_v9  ;;  %v7663_v14 = vpop.permute.xlu1 %7662 }
0x17ef   : > { %7159 = vmatprep.subr.bf16.mxu1 %v8166_v9  ;;  %v7665_v30 = vunpack.i.h.bf16 %v7663_v14  ;;  %v7664_v32 = vunpack.i.l.bf16 %v7663_v14  ;;  %v3883_v41 = vsel %vm1088_vm4, %v3594_v34, 0 }
0x17f1   : > { %v3595_v46 = vpack.c.bf16 %v7665_v30, %v7664_v32 }
0x17f2   : > { %v7668_v37 = vpop.permute.xlu1 %7667 }
0x17f3   : > { %v7670_v31 = vunpack.i.h.bf16 %v7668_v37  ;;  %v7669_v40 = vunpack.i.l.bf16 %v7668_v37  ;;  %v3929_v44 = vsel %vm1088_vm4, %v3595_v46, 0 }
0x17f5   : > { %v3596_v61 = vpack.c.bf16 %v7670_v31, %v7669_v40 }
0x17f7   : > { %v3975_v25 = vsel %vm1088_vm4, %v3596_v61, 0 }
0x18b1   : > { %v9203_v0 = vpop.f32.mrb[80].mxu0 }
0x18b2   : > { %v7145_v54 = vpop.f32.mrb[81].mxu0  ;;  %v3509_v52 = vadd.f32 %v9203_v0, %v9240_v51 }
0x18b3   : > { %v3511_v5 = vpop.f32.mrb[82].mxu0 }
0x18b4   : > { %v7146_v13 = vpop.f32.mrb[83].mxu0 }
0x18c0   : > { %v3401_v36 = vpop.f32.mrb[68].mxu1 }
0x18c1   : > { %v3402_v60 = vadd.f32 %v3401_v36, %v9158_v3  ;;  %v7129_v53 = vpop.f32.mrb[69].mxu1  ;;  %v7654_v3 = vunpack.i.l.bf16 %v7653_v59  ;;  %v3512_v36 = vadd.f32 %v3511_v5, %v9240_v51 }
0x18c2   : > { %v3404_v55 = vpop.f32.mrb[70].mxu1 }
0x18c3   : > { %v7130_v56 = vpop.f32.mrb[71].mxu1  ;;  %3534 = vrot.lane.b32.xlu1 %v3402_v60, %s8179_s11  ;;  %3516 = vrot.lane.b32.xlu0 %v3402_v60, %s8169_s22  ;;  %v3537_v1 = vpack.c.bf16 %v3402_v60, %v3402_v60  ;;  %v3593_v26 = vpack.c.bf16 %v7655_v12, %v7654_v3  ;;  %v9245_v53 = vpack.i.bf16 %v3512_v36, %v3509_v52 }
0x18c5   : > { %7150 = vmatmul.mubr.msk.bf16.vlgmr.msra.gmra.mrb[72].mxu1 %vm1088_vm4, %v3537_v1  ;;  %v3837_v33 = vsel %vm1088_vm4, %v3593_v26, 0 }
0x18c6   : > { %7160 = vmatpush3.bf16.xpose.msra.mxu1 %v3745_v8  ;;  %7161 = vmatprep.mubr.msk.bf16.mxu1 %vm8167_vm2, %v8166_v9 }
0x18c7   : > { %3519 = vrot.lane.b32.xlu0 %v3402_v60, %s8171_s15  ;;  %7171 = vmatprep.subr.bf16.mxu1 %v8166_v9 }
0x18cb   : > { %3522 = vrot.lane.b32.xlu0 %v3402_v60, %s8168_s13 }
0x18cf   : > { %3525 = vrot.lane.b32.xlu0 %v3402_v60, %s8172_s21 }
0x18d3   : > { %3528 = vrot.lane.b32.xlu0 %v3402_v60, %s8177_s18 }
0x18d7   : > { %3531 = vrot.lane.b32.xlu0 %v3402_v60, %s8178_s7  ;;  %v3641_v60 = vpack.c.bf16 %v3512_v36, %v3509_v52 }
0x1935   : > { %v3517_v6 = vpop.permute.xlu0 %3516  ;;  %v3535_v39 = vpop.permute.xlu1 %3534 }
0x1936   : > { %v3538_v7 = vpack.c.bf16 %v3517_v6, %v3517_v6  ;;  %v3544_v49 = vpack.c.bf16 %v3535_v39, %v3535_v39 }
0x1938   : > { %7156 = vmatmul.mubr.msk.bf16.vlgmr.msra.gmra.mrb[84].mxu0 %vm1088_vm4, %v3538_v7 }
0x1939   : > { %7166 = vmatpush3.bf16.xpose.msra.mxu0 %v3791_v10  ;;  %v3520_v27 = vpop.permute.xlu0 %3519  ;;  %7167 = vmatprep.mubr.msk.bf16.mxu0 %vm8167_vm2, %v8166_v9 }
0x193a   : > { %v3539_v18 = vpack.c.bf16 %v3520_v27, %v3520_v27  ;;  %7177 = vmatprep.subr.bf16.mxu0 %v8166_v9 }
0x193c   : > { %7162 = vmatmul.mubr.msk.bf16.vlgmr.msra.gmra.mrb[76].mxu1 %vm1088_vm4, %v3539_v18 }
0x193d   : > { %7172 = vmatpush3.bf16.xpose.msra.mxu1 %v3837_v33  ;;  %v3523_v24 = vpop.permute.xlu0 %3522  ;;  %7173 = vmatprep.mubr.msk.bf16.mxu1 %vm8167_vm2, %v8166_v9 }
0x193e   : > { %v3540_v35 = vpack.c.bf16 %v3523_v24, %v3523_v24  ;;  %7183 = vmatprep.subr.bf16.mxu1 %v8166_v9 }
0x1940   : > { %7168 = vmatmul.mubr.msk.bf16.vlgmr.msra.gmra.mrb[88].mxu0 %vm1088_vm4, %v3540_v35 }
0x1941   : > { %7178 = vmatpush3.bf16.xpose.msra.mxu0 %v3883_v41  ;;  %v3526_v42 = vpop.permute.xlu0 %3525  ;;  %7179 = vmatprep.mubr.msk.bf16.mxu0 %vm8167_vm2, %v8166_v9 }
0x1942   : > { %v3541_v43 = vpack.c.bf16 %v3526_v42, %v3526_v42  ;;  %7189 = vmatprep.subr.bf16.mxu0 %v8166_v9 }
0x1944   : > { %7174 = vmatmul.mubr.msk.bf16.vlgmr.msra.gmra.mrb[80].mxu1 %vm1088_vm4, %v3541_v43 }
0x1945   : > { %7184 = vmatpush3.bf16.xpose.msra.mxu1 %v3929_v44  ;;  %v3529_v21 = vpop.permute.xlu0 %3528  ;;  %7185 = vmatprep.mubr.msk.bf16.mxu1 %vm8167_vm2, %v8166_v9 }
0x1946   : > { %v3542_v47 = vpack.c.bf16 %v3529_v21, %v3529_v21  ;;  %7195 = vmatprep.subr.bf16.mxu1 %v8166_v9 }
0x1948   : > { %7180 = vmatmul.mubr.msk.bf16.vlgmr.msra.gmra.mrb[92].mxu0 %vm1088_vm4, %v3542_v47 }
0x1949   : > { %7190 = vmatpush3.bf16.xpose.msra.mxu0 %v3975_v25  ;;  %v3532_v48 = vpop.permute.xlu0 %3531  ;;  %7191 = vmatprep.mubr.msk.bf16.mxu0 %vm8167_vm2, %v8166_v9 }
0x194a   : > { %v3543_v4 = vpack.c.bf16 %v3532_v48, %v3532_v48  ;;  %7201 = vmatprep.subr.bf16.mxu0 %v8166_v9 }
0x194c   : > { %7186 = vmatmul.mubr.msk.bf16.vlgmr.msra.gmra.mrb[84].mxu1 %vm1088_vm4, %v3543_v4 }
0x194d   : > { %7197 = vmatprep.mubr.msk.bf16.mxu1 %vm8167_vm2, %v8166_v9  ;;  %7196 = vmatpush3.bf16.msra.mxu1 %v3641_v60 }
0x194e   : > { %7207 = vmatprep.subr.bf16.mxu1 %v8166_v9 }
0x1950   : > { %7192 = vmatmul.mubr.msk.bf16.vlgmr.msra.gmra.mrb[96].mxu0 %vm1088_vm4, %v3544_v49 }
0x1951   : > { %7203 = vmatprep.mubr.msk.bf16.mxu0 %vm8167_vm2, %v8166_v9 }
0x1998   : > { %v3689_v55 = vpop.f32.mrb[72].mxu1 }
0x1999   : > { %v7151_v56 = vpop.f32.mrb[73].mxu1  ;;  %v4017_v1 = vsel %vm1528_vm6, %v3689_v55, -inf }
0x199a   : > { %4018 = vmax.xlane.f32.xlu0 %v4017_v1  ;;  %v3692_v8 = vpop.f32.mrb[74].mxu1 }
0x199b   : > { %v7152_v58 = vpop.f32.mrb[75].mxu1 }
0x1a0b   : > { %v3735_v19 = vpop.f32.mrb[84].mxu0 }
0x1a0c   : > { %v7157_v59 = vpop.f32.mrb[85].mxu0  ;;  %v4020_v62 = vsel %vm1528_vm6, %v3735_v19, -inf }
0x1a0d   : > { %4021 = vmax.xlane.f32.xlu1 %v4020_v62  ;;  %v3738_v38 = vpop.f32.mrb[86].mxu0 }
0x1a0e   : > { %v7158_v63 = vpop.f32.mrb[87].mxu0 }
0x1a0f   : > { %v3781_v0 = vpop.f32.mrb[76].mxu1 }
0x1a10   : > { %v7163_v54 = vpop.f32.mrb[77].mxu1  ;;  %v4023_v12 = vsel %vm1528_vm6, %v3781_v0, -inf }
0x1a11   : > { %4024 = vmax.xlane.f32.xlu0 %v4023_v12  ;;  %v3784_v3 = vpop.f32.mrb[78].mxu1 }
0x1a12   : > { %v7164_v20 = vpop.f32.mrb[79].mxu1 }
0x1a13   : > { %v9251_v5 = vpop.f32.mrb[88].mxu0 }
0x1a14   : > { %v7169_v6 = vpop.f32.mrb[89].mxu0  ;;  %v4026_v7 = vsel %vm1528_vm6, %v9251_v5, -inf }
0x1a15   : > { %4027 = vmax.xlane.f32.xlu0 %v4026_v7  ;;  %v3830_v13 = vpop.f32.mrb[90].mxu0 }
0x1a16   : > { %v7170_v14 = vpop.f32.mrb[91].mxu0 }
0x1a17   : > { %v3873_v22 = vpop.f32.mrb[80].mxu1 }
0x1a18   : > { %v7175_v23 = vpop.f32.mrb[81].mxu1  ;;  %v4029_v10 = vsel %vm1528_vm6, %v3873_v22, -inf }
0x1a19   : > { %v3876_v26 = vpop.f32.mrb[82].mxu1  ;;  %4030 = vmax.xlane.f32.xlu1 %v4029_v10 }
0x1a1a   : > { %v7176_v27 = vpop.f32.mrb[83].mxu1 }
0x1a1b   : > { %v9256_v18 = vpop.f32.mrb[92].mxu0 }
0x1a1c   : > { %v7181_v30 = vpop.f32.mrb[93].mxu0  ;;  %v4032_v32 = vsel %vm1528_vm6, %v9256_v18, -inf }
0x1a1d   : > { %4033 = vmax.xlane.f32.xlu0 %v4032_v32  ;;  %v3922_v33 = vpop.f32.mrb[94].mxu0 }
0x1a1e   : > { %v7182_v34 = vpop.f32.mrb[95].mxu0 }
0x1a1f   : > { %v3965_v37 = vpop.f32.mrb[84].mxu1 }
0x1a20   : > { %v7187_v24 = vpop.f32.mrb[85].mxu1  ;;  %v4035_v35 = vsel %vm1528_vm6, %v3965_v37, -inf }
0x1a21   : > { %v3968_v31 = vpop.f32.mrb[86].mxu1  ;;  %4036 = vmax.xlane.f32.xlu1 %v4035_v35 }
0x1a22   : > { %v7188_v40 = vpop.f32.mrb[87].mxu1 }
0x1a23   : > { %v4011_v41 = vpop.f32.mrb[96].mxu0 }
0x1a24   : > { %v7193_v46 = vpop.f32.mrb[97].mxu0  ;;  %v4038_v42 = vsel %vm1528_vm6, %v4011_v41, -inf }
0x1a25   : > { %4039 = vmax.xlane.f32.xlu0 %v4038_v42  ;;  %v4014_v43 = vpop.f32.mrb[98].mxu0 }
0x1a26   : > { %v7194_v44 = vpop.f32.mrb[99].mxu0 }
0x1a27   : > { %v4019_v61 = vpop.xlane.xlu0 %4018 }
0x1a28   : > { %v4041_v21 = vsub.f32 %v3689_v55, %v4019_v61 }
0x1a2a   : > { %v4049_v47 = vmul.f32 1.442695, %v4041_v21 }
0x1a2c   : > { %7822 = vpow2.f32 %v4049_v47 }
0x1a32   : > { %7677 = vrot.lane.b32.xlu1 %v9245_v53, %s8171_s15 }
0x1a36   : > { %v9266_v25 = vpop.eup %7822 }
0x1a37   : > { %v4065_v48 = vsel %vm1528_vm6, %v9266_v25, 0.0 }
0x1a3b   : > { %7672 = vrot.lane.b32.xlu0 %v9245_v53, %s8169_s22 }
0x1a56   : > { %4066 = vadd.xlane.f32.xlu1 %v4065_v48 }
0x1a67   : > { %7687 = vrot.lane.b32.xlu1 %v9245_v53, %s8172_s21 }
0x1a9a   : > { %v4022_v4 = vpop.xlane.xlu1 %4021 }
0x1a9b   : > { %v4042_v39 = vsub.f32 %v3735_v19, %v4022_v4 }
0x1a9d   : > { %v4051_v49 = vmul.f32 1.442695, %v4042_v39 }
0x1a9e   : > { %v4025_v52 = vpop.xlane.xlu0 %4024 }
0x1a9f   : > { %7824 = vpow2.f32 %v4051_v49  ;;  %v4043_v36 = vsub.f32 %v3781_v0, %v4025_v52 }
0x1aa1   : > { %v4053_v60 = vmul.f32 1.442695, %v4043_v36 }
0x1aa2   : > { %v4028_v58 = vpop.xlane.xlu0 %4027 }
0x1aa3   : > { %7826 = vpow2.f32 %v4053_v60  ;;  %v4044_v32 = vsub.f32 %v9251_v5, %v4028_v58 }
0x1aa5   : > { %v4055_v33 = vmul.f32 1.442695, %v4044_v32 }
0x1aa6   : > { %v4031_v55 = vpop.xlane.xlu1 %4030 }
0x1aa7   : > { %v4045_v56 = vsub.f32 %v3873_v22, %v4031_v55 }
0x1aa9   : > { %v9272_v1 = vpop.eup %7824  ;;  %v4057_v8 = vmul.f32 1.442695, %v4045_v56 }
0x1aaa   : > { %v4068_v59 = vsel %vm1528_vm6, %v9272_v1, 0.0  ;;  %v4034_v19 = vpop.xlane.xlu0 %4033 }
0x1aab   : > { %7828 = vpow2.f32 %v4057_v8  ;;  %4069 = vadd.xlane.f32.xlu0 %v4068_v59  ;;  %v4046_v34 = vsub.f32 %v9256_v18, %v4034_v19 }
0x1aad   : > { %v9276_v62 = vpop.eup %7826 }
0x1aae   : > { %v4037_v38 = vpop.xlane.xlu1 %4036  ;;  %v4071_v63 = vsel %vm1528_vm6, %v9276_v62, 0.0 }
0x1aaf   : > { %v4047_v0 = vsub.f32 %v3965_v37, %v4037_v38  ;;  %4072 = vadd.xlane.f32.xlu1 %v4071_v63  ;;  %v4059_v37 = vmul.f32 1.442695, %v4046_v34 }
0x1ab1   : > { %v4061_v54 = vmul.f32 1.442695, %v4047_v0 }
0x1ab2   : > { %v4040_v12 = vpop.xlane.xlu0 %4039  ;;  %v7678_v35 = vpop.permute.xlu1 %7677 }
0x1ab3   : > { %7830 = vpow2.f32 %v4061_v54  ;;  %v4048_v3 = vsub.f32 %v4011_v41, %v4040_v12  ;;  %v7680_v46 = vunpack.i.h.bf16 %v7678_v35  ;;  %v7679_v42 = vunpack.i.l.bf16 %v7678_v35 }
0x1ab5   : > { %v9280_v20 = vpop.eup %7828  ;;  %v4063_v6 = vmul.f32 1.442695, %v4048_v3  ;;  %v3643_v61 = vpack.c.bf16 %v7680_v46, %v7679_v42 }
0x1ab6   : > { %v7673_v7 = vpop.permute.xlu0 %7672  ;;  %v4077_v13 = vsel %vm1528_vm6, %v9280_v20, 0.0 }
0x1ab7   : > { %7832 = vpow2.f32 %v4063_v6  ;;  %v7675_v14 = vunpack.i.h.bf16 %v7673_v7  ;;  %v7674_v22 = vunpack.i.l.bf16 %v7673_v7  ;;  %4078 = vadd.xlane.f32.xlu1 %v4077_v13 }
0x1ab8   : > { %7834 = vpow2.f32 %v4055_v33 }
0x1ab9   : > { %v3642_v23 = vpack.c.bf16 %v7675_v14, %v7674_v22  ;;  %7836 = vpow2.f32 %v4059_v37 }
0x1abb   : > { %7202 = vmatpush3.bf16.msra.mxu0 %v3642_v23 }
0x1abc   : > { %7213 = vmatprep.subr.bf16.mxu0 %v8166_v9 }
0x1abd   : > { %v9285_v10 = vpop.eup %7830 }
0x1abe   : > { %v4083_v26 = vsel %vm1528_vm6, %v9285_v10, 0.0 }
0x1abf   : > { %4084 = vadd.xlane.f32.xlu1 %v4083_v26 }
0x1ac1   : > { %v9289_v27 = vpop.eup %7832  ;;  %7682 = vrot.lane.b32.xlu0 %v9245_v53, %s8168_s13 }
0x1ac2   : > { %v4086_v30 = vsel %vm1528_vm6, %v9289_v27, 0.0  ;;  %v9299_v24 = vpop.eup %7834 }
0x1ac3   : > { %4087 = vadd.xlane.f32.xlu1 %v4086_v30  ;;  %v4074_v31 = vsel %vm1528_vm6, %v9299_v24, 0.0  ;;  %v9303_v40 = vpop.eup %7836 }
0x1ac4   : > { %v4080_v5 = vsel %vm1528_vm6, %v9303_v40, 0.0 }
0x1ad4   : > { %7697 = vrot.lane.b32.xlu1 %v9245_v53, %s8178_s7 }
0x1ae0   : > { %4075 = vadd.xlane.f32.xlu0 %v4074_v31 }
0x1ae3   : > { %v4067_v41 = vpop.xlane.xlu1 %4066 }
0x1ae4   : > { %7838 = vrcp.f32 %v4067_v41  ;;  %4081 = vadd.xlane.f32.xlu0 %v4080_v5 }
0x1ae7   : > { %v7688_v21 = vpop.permute.xlu1 %7687 }
0x1ae8   : > { %v7689_v58 = vunpack.i.l.bf16 %v7688_v21 }
0x1aee   : > { %v7839_v18 = vpop.eup %7838 }
0x1aef   : > { %v4090_v43 = vmul.f32 %v7839_v18, %v9266_v25 }
0x1af1   : > { %v4105_v44 = vpack.c.bf16 %v4090_v43, %v4090_v43  ;;  %v4567_v55 = vsel %vm1528_vm6, %v4090_v43, 0.0 }
0x1af3   : > { %7198 = vmatmul.mubr.msk.bf16.vlgmr.msra.gmra.mrb[88].mxu1 %vm1528_vm6, %v4105_v44 }
0x1af4   : > { %7208 = vmatpush3.bf16.msra.mxu1 %v3643_v61  ;;  %7209 = vmatprep.mubr.msk.bf16.mxu1 %vm8167_vm2, %v8166_v9 }
0x1af5   : > { %7219 = vmatprep.subr.bf16.mxu1 %v8166_v9 }
0x1afa   : > { %7692 = vrot.lane.b32.xlu0 %v9245_v53, %s8177_s18 }
0x1afe   : > { %7702 = vrot.lane.b32.xlu0 %v9245_v53, %s8179_s11  ;;  %v7690_v53 = vunpack.i.h.bf16 %v7688_v21 }
0x1b00   : > { %v3645_v0 = vpack.c.bf16 %v7690_v53, %v7689_v58 }
0x1b38   : > { %v4070_v47 = vpop.xlane.xlu0 %4069 }
0x1b39   : > { %7840 = vrcp.f32 %v4070_v47 }
0x1b3c   : > { %v4073_v25 = vpop.xlane.xlu1 %4072  ;;  %v7683_v48 = vpop.permute.xlu0 %7682 }
0x1b3d   : > { %7842 = vrcp.f32 %v4073_v25  ;;  %v7685_v39 = vunpack.i.h.bf16 %v7683_v48  ;;  %v7684_v49 = vunpack.i.l.bf16 %v7683_v48 }
0x1b3f   : > { %v3644_v59 = vpack.c.bf16 %v7685_v39, %v7684_v49 }
0x1b43   : > { %v7841_v4 = vpop.eup %7840 }
0x1b44   : > { %v4092_v52 = vmul.f32 %v7841_v4, %v9272_v1  ;;  %v4079_v36 = vpop.xlane.xlu1 %4078 }
0x1b45   : > { %7844 = vrcp.f32 %v4079_v36 }
0x1b46   : > { %v4106_v60 = vpack.c.bf16 %v4092_v52, %v4092_v52  ;;  %v4568_v56 = vsel %vm1528_vm6, %v4092_v52, 0.0 }
0x1b47   : > { %v7843_v8 = vpop.eup %7842  ;;  %v4569_v19 = vadd.f32 %v4568_v56, %v4567_v55 }
0x1b48   : > { %v4094_v38 = vmul.f32 %v7843_v8, %v9276_v62  ;;  %7204 = vmatmul.mubr.msk.bf16.vlgmr.msra.gmra.mrb[100].mxu0 %vm1528_vm6, %v4106_v60 }
0x1b49   : > { %7214 = vmatpush3.bf16.msra.mxu0 %v3644_v59  ;;  %7215 = vmatprep.mubr.msk.bf16.mxu0 %vm8167_vm2, %v8166_v9 }
0x1b4a   : > { %v4107_v1 = vpack.c.bf16 %v4094_v38, %v4094_v38  ;;  %7225 = vmatprep.subr.bf16.mxu0 %v8166_v9  ;;  %v4570_v63 = vsel %vm1528_vm6, %v4094_v38, 0.0 }
0x1b4b   : > { %v4571_v54 = vadd.f32 %v4570_v63, %v4569_v19 }
0x1b4c   : > { %v4085_v12 = vpop.xlane.xlu1 %4084  ;;  %7210 = vmatmul.mubr.msk.bf16.vlgmr.msra.gmra.mrb[92].mxu1 %vm1528_vm6, %v4107_v1 }
0x1b4d   : > { %7846 = vrcp.f32 %v4085_v12  ;;  %7220 = vmatpush3.bf16.msra.mxu1 %v3645_v0  ;;  %7221 = vmatprep.mubr.msk.bf16.mxu1 %vm8167_vm2, %v8166_v9 }
0x1b4e   : > { %7231 = vmatprep.subr.bf16.mxu1 %v8166_v9 }
0x1b4f   : > { %v7845_v62 = vpop.eup %7844 }
0x1b50   : > { %v4098_v3 = vmul.f32 %v7845_v62, %v9280_v20  ;;  %v4088_v6 = vpop.xlane.xlu1 %4087 }
0x1b52   : > { %v4109_v7 = vpack.c.bf16 %v4098_v3, %v4098_v3 }
0x1b54   : > { %7222 = vmatmul.mubr.msk.bf16.vlgmr.msra.gmra.mrb[96].mxu1 %vm1528_vm6, %v4109_v7  ;;  %v7698_v13 = vpop.permute.xlu1 %7697 }
0x1b55   : > { %v7700_v14 = vunpack.i.h.bf16 %v7698_v13  ;;  %v7699_v22 = vunpack.i.l.bf16 %v7698_v13  ;;  %7233 = vmatprep.mubr.msk.bf16.mxu1 %vm8167_vm2, %v8166_v9 }
0x1b57   : > { %v7847_v23 = vpop.eup %7846  ;;  %v3647_v26 = vpack.c.bf16 %v7700_v14, %v7699_v22 }
0x1b58   : > { %v4102_v30 = vmul.f32 %v7847_v23, %v9285_v10  ;;  %v7724_v23 = vld [vmem:[%s9909_s3] sm:$0xff]  }
0x1b59   : > { %7232 = vmatpush3.bf16.msra.mxu1 %v3647_v26  ;;  %v7725_v26 = vld [vmem:[%s9909_s3 + $0x8] sm:$0xff]  }
0x1b5a   : > { %v4111_v32 = vpack.c.bf16 %v4102_v30, %v4102_v30  ;;  %7243 = vmatprep.subr.bf16.mxu1 %v8166_v9 }
0x1b5c   : > { %7234 = vmatmul.mubr.msk.bf16.vlgmr.msra.gmra.mrb[100].mxu1 %vm1528_vm6, %v4111_v32 }
0x1b5d   : > { %7251 = vmatprep.mubr.msk.bf16.mxu1 %vm8167_vm2, %v8166_v9  ;;  %7244 = vmatpush3.bf16.msra.mxu1 %v7724_v23  ;;  %v7728_v23 = vld [vmem:[%s9907_s23 + $0x10] sm:$0xff]  }
0x1b5e   : > { %7245 = vmatprep.subr.bf16.mxu1 %v8166_v9 }
0x1b61   : > { %7246 = vmatpush3.bf16.msra.mxu1 %v7725_v26 }
0x1b62   : > { %7247 = vmatprep.subr.bf16.mxu1 %v8166_v9 }
0x1b6d   : > { %v4076_v20 = vpop.xlane.xlu0 %4075 }
0x1b6e   : > { %7848 = vrcp.f32 %v4076_v20 }
0x1b6f   : > { %7850 = vrcp.f32 %v4088_v6 }
0x1b71   : > { %v4082_v33 = vpop.xlane.xlu0 %4081 }
0x1b72   : > { %7852 = vrcp.f32 %v4082_v33 }
0x1b75   : > { %v7693_v34 = vpop.permute.xlu0 %7692 }
0x1b76   : > { %v7695_v35 = vunpack.i.h.bf16 %v7693_v34  ;;  %v7694_v31 = vunpack.i.l.bf16 %v7693_v34  ;;  %v7727_v34 = vld [vmem:[%s9909_s3 + $0x18] sm:$0xff]  }
0x1b78   : > { %v7849_v37 = vpop.eup %7848  ;;  %v3646_v42 = vpack.c.bf16 %v7695_v35, %v7694_v31 }
0x1b79   : > { %v4096_v10 = vmul.f32 %v7849_v37, %v9299_v24  ;;  %v7851_v41 = vpop.eup %7850  ;;  %v7703_v61 = vpop.permute.xlu0 %7702  ;;  %v4576_v24 = vsel %vm1528_vm6, %v4098_v3, 0.0 }
0x1b7a   : > { %v4104_v21 = vmul.f32 %v7851_v41, %v9289_v27  ;;  %v7705_v25 = vunpack.i.h.bf16 %v7703_v61  ;;  %v7704_v48 = vunpack.i.l.bf16 %v7703_v61 }
0x1b7b   : > { %v4108_v5 = vpack.c.bf16 %v4096_v10, %v4096_v10  ;;  %v4572_v18 = vsel %vm1528_vm6, %v4096_v10, 0.0 }
0x1b7c   : > { %v7853_v46 = vpop.eup %7852  ;;  %v9340_v43 = vadd.f32 %v4572_v18, %v4571_v54  ;;  %v4581_v52 = vsel %vm1528_vm6, %v4104_v21, 0.0  ;;  %v3648_v36 = vpack.c.bf16 %v7705_v25, %v7704_v48  ;;  %v4112_v27 = vpack.c.bf16 %v4104_v21, %v4104_v21 }
0x1b7d   : > { %v4100_v44 = vmul.f32 %v7853_v46, %v9303_v40  ;;  %7216 = vmatmul.mubr.msk.bf16.vlgmr.msra.gmra.mrb[104].mxu0 %vm1528_vm6, %v4108_v5  ;;  %v4579_v40 = vsel %vm1528_vm6, %v4102_v30, 0.0  ;;  %v7726_v30 = vld [vmem:[%s9909_s3 + $0x10] sm:$0xff]  }
0x1b7e   : > { %7226 = vmatpush3.bf16.msra.mxu0 %v3646_v42  ;;  %7227 = vmatprep.mubr.msk.bf16.mxu0 %vm8167_vm2, %v8166_v9 }
0x1b7f   : > { %7237 = vmatprep.subr.bf16.mxu0 %v8166_v9  ;;  %v4577_v47 = vsel %vm1528_vm6, %v4100_v44, 0.0  ;;  %v4110_v49 = vpack.c.bf16 %v4100_v44, %v4100_v44  ;;  %7248 = vmatpush3.bf16.msra.mxu1 %v7726_v30  ;;  %v7729_v30 = vld [vmem:[%s9907_s23 + $0x18] sm:$0xff]  }
0x1b80   : > { %v4578_v4 = vadd.f32 %v4577_v47, %v4576_v24  ;;  %7249 = vmatprep.subr.bf16.mxu1 %v8166_v9 }
0x1b82   : > { %v4580_v39 = vadd.f32 %v4579_v40, %v4578_v4 }
0x1b83   : > { %7250 = vmatpush3.bf16.msra.mxu1 %v7727_v34 }
0x1b84   : > { %v9352_v60 = vadd.f32 %v4581_v52, %v4580_v39  ;;  %7267 = vmatprep.subr.bf16.mxu1 %v8166_v9 }
0x1b85   : > { %7228 = vmatmul.mubr.msk.bf16.vlgmr.msra.gmra.mrb[108].mxu0 %vm1528_vm6, %v4110_v49 }
0x1b86   : > { %7238 = vmatpush3.bf16.msra.mxu0 %v3648_v36  ;;  %7239 = vmatprep.mubr.msk.bf16.mxu0 %vm8167_vm2, %v8166_v9 }
0x1b87   : > { %7255 = vmatprep.subr.bf16.mxu0 %v8166_v9 }
0x1b8d   : > { %7240 = vmatmul.mubr.msk.bf16.vlgmr.msra.gmra.mrb[112].mxu0 %vm1528_vm6, %v4112_v27 }
0x1b8e   : > { %7263 = vmatprep.mubr.msk.bf16.mxu0 %vm8167_vm2, %v8166_v9 }
0x1bc6   : > { %v9361_v55 = vpop.f32.mrb[88].mxu1 }
0x1bc7   : > { %v7199_v56 = vpop.f32.mrb[89].mxu1 }
0x1bc8   : > { %v4153_v8 = vpop.f32.mrb[90].mxu1 }
0x1bc9   : > { %v7200_v53 = vpop.f32.mrb[91].mxu1 }
0x1c1b   : > { %v4193_v58 = vpop.f32.mrb[100].mxu0 }
0x1c1c   : > { %4458 = vrot.lane.b32.xlu1 %v4193_v58, %s8174_s28  ;;  %v7205_v59 = vpop.f32.mrb[101].mxu0 }
0x1c1d   : > { %v4196_v19 = vpop.f32.mrb[102].mxu0 }
0x1c1e   : > { %v7206_v38 = vpop.f32.mrb[103].mxu0 }
0x1c1f   : > { %v4236_v1 = vpop.f32.mrb[92].mxu1 }
0x1c20   : > { %v7211_v63 = vpop.f32.mrb[93].mxu1  ;;  %4462 = vrot.lane.b32.xlu0 %v4236_v1, %s8175_s6 }
0x1c21   : > { %v4239_v0 = vpop.f32.mrb[94].mxu1 }
0x1c22   : > { %v7212_v54 = vpop.f32.mrb[95].mxu1 }
0x1c27   : > { %v4322_v12 = vpop.f32.mrb[96].mxu1 }
0x1c28   : > { %v7223_v62 = vpop.f32.mrb[97].mxu1  ;;  %4470 = vrot.lane.b32.xlu0 %v4322_v12, %s8173_s27 }
0x1c29   : > { %v4325_v3 = vpop.f32.mrb[98].mxu1 }
0x1c2a   : > { %v7224_v6 = vpop.f32.mrb[99].mxu1 }
0x1c2f   : > { %v4408_v7 = vpop.f32.mrb[100].mxu1 }
0x1c30   : > { %4478 = vrot.lane.b32.xlu0 %v4408_v7, %s8180_s2  ;;  %v7235_v13 = vpop.f32.mrb[101].mxu1 }
0x1c31   : > { %v4411_v14 = vpop.f32.mrb[102].mxu1 }
0x1c32   : > { %v7236_v22 = vpop.f32.mrb[103].mxu1 }
0x1c34   : > { %4521 = vrot.lane.b32.xlu0 %v9240_v51, %s8170_s19 }
0x1c38   : > { %2442 = vrot.lane.b32.xlu0 %v9005_v29, %s8170_s19 }
0x1c50   : > { %v4279_v32 = vpop.f32.mrb[104].mxu0 }
0x1c51   : > { %4466 = vrot.lane.b32.xlu1 %v4279_v32, %s8176_s16  ;;  %v7217_v20 = vpop.f32.mrb[105].mxu0 }
0x1c52   : > { %v4282_v33 = vpop.f32.mrb[106].mxu0 }
0x1c53   : > { %v7218_v51 = vpop.f32.mrb[107].mxu0 }
0x1c54   : > { %v9416_v51 = vld [vmem:[%s8661_s1 + $0x8] sm:$0xff] }
0x1c55   : > { %v2506_v34 = vrot.slane %v9416_v51, %v2505_v50  ;;  %v9434_v50 = vld [vmem:[%s8661_s1] sm:$0xff] }
0x1c58   : > { %v4365_v29 = vpop.f32.mrb[108].mxu0 }
0x1c59   : > { %4474 = vrot.lane.b32.xlu1 %v4365_v29, %s8181_s26  ;;  %v7229_v37 = vpop.f32.mrb[109].mxu0  ;;  %v7730_v29 = vld [vmem:[%s9908_s25 + $0x8] sm:$0xff]  }
0x1c5a   : > { %v4368_v35 = vpop.f32.mrb[110].mxu0  ;;  %v7732_v37 = vld [vmem:[%s9908_s25 + $0x10] sm:$0xff]  }
0x1c5b   : > { %v7230_v31 = vpop.f32.mrb[111].mxu0  ;;  %v4622_v35 = vsub.s32 6, %v8702_v16 }
0x1c5d   : > { %v4623_v31 = vrot.slane %v9416_v51, %v4622_v35 }
0x1c60   : > { %v4451_v10 = vpop.f32.mrb[112].mxu0 }
0x1c61   : > { %4482 = vrot.lane.b32.xlu1 %v4451_v10, %s8182_s5  ;;  %v7241_v41 = vpop.f32.mrb[113].mxu0  ;;  %v7903_v10 = vld [vmem:[%s9902_s17] sm:$0xff] }
0x1c62   : > { %v4454_v5 = vpop.f32.mrb[114].mxu0  ;;  %v9439_v41 = vrot.slane %v9434_v50, %v3305_v57 }
0x1c63   : > { %v7242_v18 = vpop.f32.mrb[115].mxu0 }
0x1c8e   : > { %v4459_v48 = vpop.permute.xlu1 %4458 }
0x1c8f   : > { %v4485_v40 = vsel %vm1088_vm4, %v9361_v55, %v4459_v48 }
0x1c92   : > { %v4463_v46 = vpop.permute.xlu0 %4462 }
0x1c93   : > { %v4486_v39 = vsel %vm1528_vm6, %v4485_v40, %v4463_v46  ;;  %v7731_v40 = vld [vmem:[%s9908_s25] sm:$0xff]  }
0x1c9a   : > { %v4471_v42 = vpop.permute.xlu0 %4470 }
0x1ca2   : > { %v4479_v44 = vpop.permute.xlu0 %4478 }
0x1ca6   : > { %v4522_v61 = vpop.permute.xlu0 %4521 }
0x1caa   : > { %v2443_v21 = vpop.permute.xlu0 %2442 }
0x1cab   : > { %v2484_v24 = vadd.f32 %v9042_v2, %v2443_v21 }
0x1cad   : > { %v2489_v47 = vadd.f32 %v2484_v24, %v8970_v15 }
0x1caf   : > { %v2490_v25 = vsel %vm959_vm3, %v2489_v47, 0.0 }
0x1cb0   : > { %2491 = vadd.xlane.f32.xlu0 %v2490_v25  ;;  %v7905_v25 = vld [vmem:[%s8604_s8] sm:$0xff] }
0x1cc3   : > { %v4467_v4 = vpop.permute.xlu1 %4466 }
0x1cc4   : > { %v4487_v49 = vsel %vm1530_vm7, %v4486_v39, %v4467_v4  ;;  %v7733_v39 = vld [vmem:[%s9908_s25 + $0x18] sm:$0xff]  }
0x1cc5   : > { %v4488_v36 = vsel %vm959_vm3, %v4487_v49, %v4471_v42 }
0x1ccb   : > { %v4475_v52 = vpop.permute.xlu1 %4474 }
0x1ccc   : > { %v4490_v2 = vsel %vm4489_vm9, %v4488_v36, %v4475_v52 }
0x1ccd   : > { %v4492_v15 = vsel %vm4491_vm10, %v4490_v2, %v4479_v44 }
0x1cd3   : > { %v4483_v27 = vpop.permute.xlu1 %4482 }
0x1cd4   : > { %v4494_v56 = vsel %vm4493_vm11, %v4492_v15, %v4483_v27 }
0x1cd5   : > { %v4495_v8 = vpack.c.bf16 %v4494_v56, %v4494_v56 }
0x1cd7   : > { %7252 = vmatmul.mubr.msk.bf16.vlgmr.msra.gmra.mrb[104].mxu1 %vm2445_vm8, %v4495_v8 }
0x1cd8   : > { %7271 = vmatprep.mubr.msk.bf16.mxu1 %vm8167_vm2, %v8166_v9  ;;  %7268 = vmatpush3.bf16.msra.mxu1 %v7728_v23 }
0x1cd9   : > { %7269 = vmatprep.subr.bf16.mxu1 %v8166_v9 }
0x1cdc   : > { %7270 = vmatpush3.bf16.msra.mxu1 %v7729_v30 }
0x1cdd   : > { %7283 = vmatprep.subr.bf16.mxu1 %v8166_v9 }
0x1d3d   : > { %v2492_v55 = vpop.xlane.xlu0 %2491 }
0x1d3e   : > { %v2493_v53 = vmul.f32 0.03125, %v2492_v55 }
0x1d40   : > { %v2494_v59 = vsub.f32 %v2489_v47, %v2493_v53 }
0x1d42   : > { %v2495_v12 = vmul.f32 %v2494_v59, %v2494_v59 }
0x1d44   : > { %v2496_v62 = vsel %vm959_vm3, %v2495_v12, 0.0 }
0x1daa   : > { %v4561_v58 = vpop.f32.mrb[104].mxu1 }
0x1dab   : > { %v4562_v19 = vadd.f32 %v4561_v58, %v4522_v61  ;;  %v7253_v38 = vpop.f32.mrb[105].mxu1 }
0x1dac   : > { %v4564_v1 = vpop.f32.mrb[106].mxu1 }
0x1dad   : > { %v4584_v63 = vadd.f32 %v4562_v19, %v9165_v11  ;;  %v7254_v0 = vpop.f32.mrb[107].mxu1 }
0x1daf   : > { %4599 = vrot.lane.b32.xlu1 %v4584_v63, %s8172_s21  ;;  %v4585_v54 = vsel %vm959_vm3, %v4584_v63, 0.0 }
0x1db0   : > { %4586 = vadd.xlane.f32.xlu0 %v4585_v54 }
0x1db4   : > { %2497 = vadd.xlane.f32.xlu0 %v2496_v62 }
0x1e21   : > { %v4600_v3 = vpop.permute.xlu1 %4599 }
0x1e22   : > { %v4602_v6 = vsel %vm959_vm3, %v4600_v3, 0.0 }
0x1e23   : > { %4603 = vadd.xlane.f32.xlu1 %v4602_v6 }
0x1e3d   : > { %v4587_v7 = vpop.xlane.xlu0 %4586 }
0x1e3e   : > { %v4588_v13 = vmul.f32 0.03125, %v4587_v7 }
0x1e40   : > { %v9401_v11 = vsub.f32 %v4584_v63, %v4588_v13 }
0x1e41   : > { %v2498_v5 = vpop.xlane.xlu0 %2497 }
0x1e42   : > { %v4590_v14 = vmul.f32 %v9401_v11, %v9401_v11  ;;  %v2499_v18 = vmul.f32 0.03125, %v2498_v5 }
0x1e44   : > { %v4591_v22 = vsel %vm959_vm3, %v4590_v14, 0.0  ;;  %v2500_v46 = vadd.f32 1e-05, %v2499_v18 }
0x1e45   : > { %4592 = vadd.xlane.f32.xlu0 %v4591_v22 }
0x1e46   : > { %7854 = vrsqrt.f32 %v2500_v46 }
0x1e50   : > { %v7855_v42 = vpop.eup %7854 }
0x1e51   : > { %v2502_v44 = vmul.f32 %v7855_v42, %v2494_v59 }
0x1e53   : > { %v2507_v24 = vmul.f32 %v2506_v34, %v2502_v44 }
0x1eb0   : > { %v4604_v26 = vpop.xlane.xlu1 %4603 }
0x1eb1   : > { %v4605_v32 = vmul.f32 0.03125, %v4604_v26 }
0x1eb3   : > { %v9409_v20 = vsub.f32 %v4584_v63, %v4605_v32 }
0x1eb5   : > { %v4607_v33 = vmul.f32 %v9409_v20, %v9409_v20 }
0x1eb7   : > { %4609 = vrot.lane.b32.xlu1 %v4607_v33, %s8172_s21 }
0x1ebb   : > { %2509 = vrot.lane.b32.xlu1 %v2506_v34, %s8172_s21 }
0x1ebf   : > { %4685 = vrot.lane.b32.xlu1 %v7730_v29, %s8170_s19 }
0x1ec3   : > { %4687 = vrot.lane.b32.xlu1 %v7732_v37, %s8170_s19 }
0x1ec7   : > { %4626 = vrot.lane.b32.xlu1 %v4623_v31, %s8170_s19 }
0x1ecb   : > { %4631 = vrot.lane.b32.xlu1 %v7903_v10, %s8173_s27 }
0x1ecf   : > { %4752 = vrot.lane.b32.xlu1 %v9439_v41, %s8170_s19 }
0x1ed2   : > { %v4593_v49 = vpop.xlane.xlu0 %4592 }
0x1ed3   : > { %4805 = vrot.lane.b32.xlu1 %v7729_v30, %s8170_s19  ;;  %v4594_v52 = vmul.f32 0.03125, %v4593_v49 }
0x1ed5   : > { %v4595_v36 = vadd.f32 1e-05, %v4594_v52 }
0x1ed7   : > { %7856 = vrsqrt.f32 %v4595_v36 }
0x1ee1   : > { %v7857_v58 = vpop.eup %7856 }
0x1ee2   : > { %v4597_v38 = vmul.f32 %v7857_v58, %v9401_v11 }
0x1f29   : > { %v4610_v61 = vpop.permute.xlu1 %4609 }
0x1f2a   : > { %v4612_v21 = vsel %vm959_vm3, %v4610_v61, 0.0 }
0x1f2b   : > { %4613 = vadd.xlane.f32.xlu0 %v4612_v21 }
0x1f2d   : > { %v2510_v57 = vpop.permute.xlu1 %2509 }
0x1f2e   : > { %v9445_v47 = vadd.f32 %v2510_v57, %v2507_v24 }
0x1f30   : > { %v4636_v48 = vadd.f32 %v7905_v25, %v9445_v47  ;;  %6171 = vst.msk [vmem:[#allocation2] sm:$0xff] %vm959_vm3, %v9445_v47  ;;  %v4798_v14 = vpack.c.bf16 %v9445_v47, %v9445_v47 }
0x1f31   : > { %v4686_v2 = vpop.permute.xlu1 %4685 }
0x1f32   : > { %v4738_v4 = vpack.c.bf16 %v4636_v48, %v4636_v48 }
0x1f34   : > { %7272 = vmatmul.mubr.msk.bf16.vlgmr.msra.gmra.mrb[108].mxu1 %vm959_vm3, %v4738_v4 }
0x1f35   : > { %7285 = vmatprep.mubr.msk.bf16.mxu1 %vm8167_vm2, %v8166_v9  ;;  %v4688_v55 = vpop.permute.xlu1 %4687 }
0x1f39   : > { %v4627_v53 = vpop.permute.xlu1 %4626 }
0x1f3d   : > { %v4632_v63 = vpop.permute.xlu1 %4631 }
0x1f3e   : > { %v4634_v12 = vsel %vm959_vm3, %v7903_v10, %v4632_v63 }
0x1f41   : > { %4683 = vrot.lane.b32.xlu0 %v7731_v40, %s8170_s19  ;;  %v4753_v6 = vpop.permute.xlu1 %4752 }
0x1f45   : > { %4689 = vrot.lane.b32.xlu0 %v7733_v39, %s8170_s19  ;;  %v4806_v11 = vpop.permute.xlu1 %4805 }
0x1f49   : > { %4803 = vrot.lane.b32.xlu0 %v7728_v23, %s8170_s19 }
0x1fb8   : > { %v4614_v15 = vpop.xlane.xlu0 %4613 }
0x1fb9   : > { %v4615_v27 = vmul.f32 0.03125, %v4614_v15 }
0x1fbb   : > { %v4616_v56 = vadd.f32 1e-05, %v4615_v27 }
0x1fbc   : > { %v4684_v8 = vpop.permute.xlu0 %4683 }
0x1fbd   : > { %7858 = vrsqrt.f32 %v4616_v56  ;;  %7256 = vmatpush3.bf16.msra.mxu0 %v4684_v8 }
0x1fbe   : > { %7257 = vmatprep.subr.bf16.mxu0 %v8166_v9 }
0x1fc0   : > { %v4690_v59 = vpop.permute.xlu0 %4689 }
0x1fc1   : > { %7258 = vmatpush3.bf16.msra.mxu0 %v4686_v2 }
0x1fc2   : > { %7259 = vmatprep.subr.bf16.mxu0 %v8166_v9 }
0x1fc4   : > { %v4804_v13 = vpop.permute.xlu0 %4803 }
0x1fc5   : > { %7260 = vmatpush3.bf16.msra.mxu0 %v4688_v55 }
0x1fc6   : > { %7261 = vmatprep.subr.bf16.mxu0 %v8166_v9 }
0x1fc7   : > { %v7859_v19 = vpop.eup %7858 }
0x1fc8   : > { %v4618_v1 = vmul.f32 %v7859_v19, %v9409_v20 }
0x1fc9   : > { %7262 = vmatpush3.bf16.msra.mxu0 %v4690_v59 }
0x1fca   : > { %v4619_v0 = vsel %vm959_vm3, %v4597_v38, %v4618_v1  ;;  %7275 = vmatprep.subr.bf16.mxu0 %v8166_v9  ;;  %v9518_v38 = vrot.slane %v9434_v50, %v4622_v35 }
0x1fcb   : > { %v4624_v54 = vmul.f32 %v4623_v31, %v4619_v0 }
0x1fcd   : > { %v9467_v62 = vadd.f32 %v4627_v53, %v4624_v54 }
0x1fcf   : > { %v4635_v3 = vadd.f32 %v4634_v12, %v9467_v62 }
0x1fd1   : > { %v4658_v7 = vpack.c.bf16 %v4635_v3, %v4635_v3 }
0x1fd3   : > { %7264 = vmatmul.mubr.msk.bf16.vlgmr.msra.gmra.mrb[116].mxu0 %vm2445_vm8, %v4658_v7 }
0x1fd4   : > { %7276 = vmatpush3.bf16.msra.mxu0 %v4804_v13  ;;  %7279 = vmatprep.mubr.msk.bf16.mxu0 %vm8167_vm2, %v8166_v9 }
0x1fd5   : > { %7277 = vmatprep.subr.bf16.mxu0 %v8166_v9 }
0x1fd8   : > { %7278 = vmatpush3.bf16.msra.mxu0 %v4806_v11 }
0x1fd9   : > { %7289 = vmatprep.subr.bf16.mxu0 %v8166_v9 }
0x1fdb   : > { %7280 = vmatmul.mubr.msk.bf16.vlgmr.msra.gmra.mrb[120].mxu0 %vm959_vm3, %v4798_v14 }
0x1fdc   : > { %7291 = vmatprep.mubr.msk.bf16.mxu0 %vm8167_vm2, %v8166_v9 }
0x2007   : > { %v4792_v22 = vpop.f32.mrb[108].mxu1 }
0x2008   : > { %v4793_v23 = vadd.f32 %v4792_v22, %v4753_v6  ;;  %v7273_v26 = vpop.f32.mrb[109].mxu1 }
0x2009   : > { %v4795_v30 = vpop.f32.mrb[110].mxu1 }
0x200a   : > { %4886 = vrot.lane.b32.xlu1 %v4793_v23, %s8171_s15  ;;  %4883 = vrot.lane.b32.xlu0 %v4793_v23, %s8169_s22  ;;  %v7274_v32 = vpop.f32.mrb[111].mxu1  ;;  %v4904_v20 = vpack.c.bf16 %v4793_v23, %v4793_v23 }
0x200c   : > { %v4946_v33 = vsel %vm1088_vm4, %v4904_v20, 0 }
0x200d   : > { %7284 = vmatpush3.bf16.xpose.msra.mxu1 %v4946_v33 }
0x200e   : > { %4889 = vrot.lane.b32.xlu1 %v4793_v23, %s8168_s13  ;;  %7295 = vmatprep.subr.bf16.mxu1 %v8166_v9 }
0x2012   : > { %4892 = vrot.lane.b32.xlu1 %v4793_v23, %s8172_s21 }
0x2016   : > { %4895 = vrot.lane.b32.xlu1 %v4793_v23, %s8177_s18 }
0x201a   : > { %4898 = vrot.lane.b32.xlu1 %v4793_v23, %s8178_s7 }
0x201e   : > { %4901 = vrot.lane.b32.xlu1 %v4793_v23, %s8179_s11 }
0x207c   : > { %v4884_v34 = vpop.permute.xlu0 %4883  ;;  %v4887_v31 = vpop.permute.xlu1 %4886 }
0x207d   : > { %v4905_v29 = vpack.c.bf16 %v4884_v34, %v4884_v34  ;;  %v4906_v5 = vpack.c.bf16 %v4887_v31, %v4887_v31 }
0x207f   : > { %v4992_v37 = vsel %vm1088_vm4, %v4905_v29, 0  ;;  %v5038_v21 = vsel %vm1088_vm4, %v4906_v5, 0 }
0x2080   : > { %7290 = vmatpush3.bf16.xpose.msra.mxu0 %v4992_v37  ;;  %v4890_v48 = vpop.permute.xlu1 %4889 }
0x2081   : > { %7301 = vmatprep.subr.bf16.mxu0 %v8166_v9  ;;  %v4907_v40 = vpack.c.bf16 %v4890_v48, %v4890_v48 }
0x2083   : > { %v5084_v36 = vsel %vm1088_vm4, %v4907_v40, 0 }
0x2084   : > { %v4893_v4 = vpop.permute.xlu1 %4892 }
0x2085   : > { %v4908_v2 = vpack.c.bf16 %v4893_v4, %v4893_v4 }
0x2087   : > { %v5130_v8 = vsel %vm1088_vm4, %v4908_v2, 0 }
0x2088   : > { %v4896_v39 = vpop.permute.xlu1 %4895 }
0x2089   : > { %v4909_v55 = vpack.c.bf16 %v4896_v39, %v4896_v39 }
0x208b   : > { %v5176_v59 = vsel %vm1088_vm4, %v4909_v55, 0 }
0x208c   : > { %v4899_v56 = vpop.permute.xlu1 %4898 }
0x208d   : > { %v4910_v19 = vpack.c.bf16 %v4899_v56, %v4899_v56 }
0x208f   : > { %v5222_v54 = vsel %vm1088_vm4, %v4910_v19, 0 }
0x2090   : > { %v4902_v1 = vpop.permute.xlu1 %4901 }
0x2091   : > { %v4911_v12 = vpack.c.bf16 %v4902_v1, %v4902_v1 }
0x2093   : > { %v5268_v6 = vsel %vm1088_vm4, %v4911_v12, 0 }
0x20a6   : > { %v4732_v10 = vpop.f32.mrb[116].mxu0 }
0x20a7   : > { %v4733_v18 = vadd.f32 %v4732_v10, %v9439_v41  ;;  %v7265_v46 = vpop.f32.mrb[117].mxu0 }
0x20a8   : > { %v4735_v42 = vpop.f32.mrb[118].mxu0 }
0x20a9   : > { %4871 = vrot.lane.b32.xlu1 %v4733_v18, %s8179_s11  ;;  %4853 = vrot.lane.b32.xlu0 %v4733_v18, %s8169_s22  ;;  %v7266_v44 = vpop.f32.mrb[119].mxu0  ;;  %v4874_v61 = vpack.c.bf16 %v4733_v18, %v4733_v18 }
0x20ab   : > { %7286 = vmatmul.mubr.msk.bf16.vlgmr.msra.gmra.mrb[112].mxu1 %vm1088_vm4, %v4874_v61 }
0x20ac   : > { %7296 = vmatpush3.bf16.xpose.msra.mxu1 %v5038_v21  ;;  %7297 = vmatprep.mubr.msk.bf16.mxu1 %vm8167_vm2, %v8166_v9 }
0x20ad   : > { %4856 = vrot.lane.b32.xlu0 %v4733_v18, %s8171_s15  ;;  %7307 = vmatprep.subr.bf16.mxu1 %v8166_v9 }
0x20ae   : > { %v4846_v41 = vpop.f32.mrb[120].mxu0 }
0x20af   : > { %v7281_v24 = vpop.f32.mrb[121].mxu0  ;;  %v9526_v3 = vadd.f32 %v4846_v41, %v9518_v38 }
0x20b0   : > { %v4849_v57 = vpop.f32.mrb[122].mxu0 }
0x20b1   : > { %4859 = vrot.lane.b32.xlu0 %v4733_v18, %s8168_s13  ;;  %v7282_v25 = vpop.f32.mrb[123].mxu0  ;;  %v4934_v7 = vpack.c.bf16 %v9526_v3, %v9526_v3 }
0x20b3   : > { %v5410_v22 = vsel %vm1333_vm5, %v4934_v7, 0 }
0x20b5   : > { %4862 = vrot.lane.b32.xlu0 %v4733_v18, %s8172_s21 }
0x20b9   : > { %4865 = vrot.lane.b32.xlu0 %v4733_v18, %s8177_s18 }
0x20bd   : > { %4868 = vrot.lane.b32.xlu0 %v4733_v18, %s8178_s7 }
0x211b   : > { %v4854_v49 = vpop.permute.xlu0 %4853  ;;  %v4872_v14 = vpop.permute.xlu1 %4871 }
0x211c   : > { %v4875_v52 = vpack.c.bf16 %v4854_v49, %v4854_v49  ;;  %v4881_v23 = vpack.c.bf16 %v4872_v14, %v4872_v14 }
0x211e   : > { %7292 = vmatmul.mubr.msk.bf16.vlgmr.msra.gmra.mrb[124].mxu0 %vm1088_vm4, %v4875_v52 }
0x211f   : > { %7302 = vmatpush3.bf16.xpose.msra.mxu0 %v5084_v36  ;;  %v4857_v15 = vpop.permute.xlu0 %4856  ;;  %7303 = vmatprep.mubr.msk.bf16.mxu0 %vm8167_vm2, %v8166_v9 }
0x2120   : > { %v4876_v27 = vpack.c.bf16 %v4857_v15, %v4857_v15  ;;  %7313 = vmatprep.subr.bf16.mxu0 %v8166_v9 }
0x2122   : > { %7298 = vmatmul.mubr.msk.bf16.vlgmr.msra.gmra.mrb[116].mxu1 %vm1088_vm4, %v4876_v27 }
0x2123   : > { %7308 = vmatpush3.bf16.xpose.msra.mxu1 %v5130_v8  ;;  %v4860_v53 = vpop.permute.xlu0 %4859  ;;  %7309 = vmatprep.mubr.msk.bf16.mxu1 %vm8167_vm2, %v8166_v9 }
0x2124   : > { %v4877_v58 = vpack.c.bf16 %v4860_v53, %v4860_v53  ;;  %7319 = vmatprep.subr.bf16.mxu1 %v8166_v9 }
0x2126   : > { %7304 = vmatmul.mubr.msk.bf16.vlgmr.msra.gmra.mrb[128].mxu0 %vm1088_vm4, %v4877_v58 }
0x2127   : > { %7314 = vmatpush3.bf16.xpose.msra.mxu0 %v5176_v59  ;;  %v4863_v63 = vpop.permute.xlu0 %4862  ;;  %7315 = vmatprep.mubr.msk.bf16.mxu0 %vm8167_vm2, %v8166_v9 }
0x2128   : > { %v4878_v0 = vpack.c.bf16 %v4863_v63, %v4863_v63  ;;  %7325 = vmatprep.subr.bf16.mxu0 %v8166_v9 }
0x212a   : > { %7310 = vmatmul.mubr.msk.bf16.vlgmr.msra.gmra.mrb[120].mxu1 %vm1088_vm4, %v4878_v0 }
0x212b   : > { %7320 = vmatpush3.bf16.xpose.msra.mxu1 %v5222_v54  ;;  %v4866_v35 = vpop.permute.xlu0 %4865  ;;  %7321 = vmatprep.mubr.msk.bf16.mxu1 %vm8167_vm2, %v8166_v9 }
0x212c   : > { %v4879_v50 = vpack.c.bf16 %v4866_v35, %v4866_v35  ;;  %7331 = vmatprep.subr.bf16.mxu1 %v8166_v9 }
0x212e   : > { %7316 = vmatmul.mubr.msk.bf16.vlgmr.msra.gmra.mrb[132].mxu0 %vm1088_vm4, %v4879_v50 }
0x212f   : > { %7326 = vmatpush3.bf16.xpose.msra.mxu0 %v5268_v6  ;;  %v4869_v13 = vpop.permute.xlu0 %4868  ;;  %7327 = vmatprep.mubr.msk.bf16.mxu0 %vm8167_vm2, %v8166_v9 }
0x2130   : > { %v4880_v11 = vpack.c.bf16 %v4869_v13, %v4869_v13  ;;  %7337 = vmatprep.subr.bf16.mxu0 %v8166_v9 }
0x2132   : > { %7322 = vmatmul.mubr.msk.bf16.vlgmr.msra.gmra.mrb[124].mxu1 %vm1088_vm4, %v4880_v11 }
0x2133   : > { %7332 = vmatpush3.bf16.msra.mxu1 %v5410_v22  ;;  %7333 = vmatprep.mubr.msk.bf16.mxu1 %vm8167_vm2, %v8166_v9 }
0x2134   : > { %7343 = vmatprep.subr.bf16.mxu1 %v8166_v9 }
0x2136   : > { %7328 = vmatmul.mubr.msk.bf16.vlgmr.msra.gmra.mrb[136].mxu0 %vm1088_vm4, %v4881_v23 }
0x2137   : > { %7339 = vmatprep.mubr.msk.bf16.mxu0 %vm8167_vm2, %v8166_v9 }
0x217e   : > { %v4982_v26 = vpop.f32.mrb[112].mxu1 }
0x217f   : > { %v7287_v30 = vpop.f32.mrb[113].mxu1  ;;  %v5310_v32 = vsel %vm1088_vm4, %v4982_v26, -inf }
0x2180   : > { %5311 = vmax.xlane.f32.xlu0 %v5310_v32  ;;  %v4985_v20 = vpop.f32.mrb[114].mxu1 }
0x2181   : > { %v7288_v33 = vpop.f32.mrb[115].mxu1 }
0x21f1   : > { %v5028_v34 = vpop.f32.mrb[124].mxu0 }
0x21f2   : > { %v7293_v29 = vpop.f32.mrb[125].mxu0  ;;  %v5313_v37 = vsel %vm1088_vm4, %v5028_v34, -inf }
0x21f3   : > { %5314 = vmax.xlane.f32.xlu1 %v5313_v37  ;;  %v5031_v31 = vpop.f32.mrb[126].mxu0 }
0x21f4   : > { %v7294_v10 = vpop.f32.mrb[127].mxu0 }
0x21f5   : > { %v5074_v5 = vpop.f32.mrb[116].mxu1 }
0x21f6   : > { %v7299_v18 = vpop.f32.mrb[117].mxu1  ;;  %v5316_v46 = vsel %vm1088_vm4, %v5074_v5, -inf }
0x21f7   : > { %5317 = vmax.xlane.f32.xlu0 %v5316_v46  ;;  %v5077_v42 = vpop.f32.mrb[118].mxu1 }
0x21f8   : > { %v7300_v44 = vpop.f32.mrb[119].mxu1 }
0x21f9   : > { %v5120_v61 = vpop.f32.mrb[128].mxu0 }
0x21fa   : > { %v7305_v21 = vpop.f32.mrb[129].mxu0  ;;  %v5319_v41 = vsel %vm1088_vm4, %v5120_v61, -inf }
0x21fb   : > { %5320 = vmax.xlane.f32.xlu0 %v5319_v41  ;;  %v5123_v24 = vpop.f32.mrb[130].mxu0 }
0x21fc   : > { %v7306_v57 = vpop.f32.mrb[131].mxu0 }
0x21fd   : > { %v5166_v25 = vpop.f32.mrb[120].mxu1 }
0x21fe   : > { %v7311_v48 = vpop.f32.mrb[121].mxu1  ;;  %v5322_v4 = vsel %vm1088_vm4, %v5166_v25, -inf }
0x21ff   : > { %v5169_v40 = vpop.f32.mrb[122].mxu1  ;;  %5323 = vmax.xlane.f32.xlu1 %v5322_v4 }
0x2200   : > { %v7312_v39 = vpop.f32.mrb[123].mxu1 }
0x2201   : > { %v5212_v49 = vpop.f32.mrb[132].mxu0 }
0x2202   : > { %v7317_v52 = vpop.f32.mrb[133].mxu0  ;;  %v5325_v36 = vsel %vm1088_vm4, %v5212_v49, -inf }
0x2203   : > { %5326 = vmax.xlane.f32.xlu0 %v5325_v36  ;;  %v5215_v2 = vpop.f32.mrb[134].mxu0 }
0x2204   : > { %v7318_v15 = vpop.f32.mrb[135].mxu0 }
0x2205   : > { %v5258_v27 = vpop.f32.mrb[124].mxu1 }
0x2206   : > { %v7323_v56 = vpop.f32.mrb[125].mxu1  ;;  %v5328_v8 = vsel %vm1088_vm4, %v5258_v27, -inf }
0x2207   : > { %v5261_v55 = vpop.f32.mrb[126].mxu1  ;;  %5329 = vmax.xlane.f32.xlu1 %v5328_v8 }
0x2208   : > { %v7324_v53 = vpop.f32.mrb[127].mxu1 }
0x2209   : > { %v5304_v58 = vpop.f32.mrb[136].mxu0 }
0x220a   : > { %v7329_v59 = vpop.f32.mrb[137].mxu0  ;;  %v5331_v19 = vsel %vm1088_vm4, %v5304_v58, -inf }
0x220b   : > { %5332 = vmax.xlane.f32.xlu0 %v5331_v19  ;;  %v5307_v1 = vpop.f32.mrb[138].mxu0 }
0x220c   : > { %v7330_v63 = vpop.f32.mrb[139].mxu0 }
0x220d   : > { %v5312_v0 = vpop.xlane.xlu0 %5311 }
0x220e   : > { %v5334_v54 = vsub.f32 %v4982_v26, %v5312_v0 }
0x2210   : > { %v5342_v12 = vmul.f32 1.442695, %v5334_v54 }
0x2212   : > { %7860 = vpow2.f32 %v5342_v12 }
0x2218   : > { %4913 = vrot.lane.b32.xlu1 %v9526_v3, %s8169_s22 }
0x221c   : > { %4919 = vrot.lane.b32.xlu1 %v9526_v3, %s8168_s13  ;;  %v9563_v35 = vpop.eup %7860 }
0x221d   : > { %v5358_v50 = vsel %vm1088_vm4, %v9563_v35, 0.0 }
0x2220   : > { %4922 = vrot.lane.b32.xlu1 %v9526_v3, %s8172_s21 }
0x2221   : > { %4916 = vrot.lane.b32.xlu0 %v9526_v3, %s8171_s15 }
0x2244   : > { %5359 = vadd.xlane.f32.xlu1 %v5358_v50 }
0x2255   : > { %4925 = vrot.lane.b32.xlu1 %v9526_v3, %s8177_s18 }
0x2280   : > { %v5315_v6 = vpop.xlane.xlu1 %5314 }
0x2281   : > { %v5335_v7 = vsub.f32 %v5028_v34, %v5315_v6 }
0x2283   : > { %v5344_v13 = vmul.f32 1.442695, %v5335_v7 }
0x2284   : > { %v5318_v11 = vpop.xlane.xlu0 %5317 }
0x2285   : > { %7862 = vpow2.f32 %v5344_v13  ;;  %v5336_v14 = vsub.f32 %v5074_v5, %v5318_v11 }
0x2287   : > { %v5346_v22 = vmul.f32 1.442695, %v5336_v14 }
0x2288   : > { %v5321_v23 = vpop.xlane.xlu0 %5320 }
0x2289   : > { %7864 = vpow2.f32 %v5346_v22  ;;  %v5337_v26 = vsub.f32 %v5120_v61, %v5321_v23 }
0x228b   : > { %v5348_v30 = vmul.f32 1.442695, %v5337_v26 }
0x228c   : > { %v5324_v32 = vpop.xlane.xlu1 %5323 }
0x228d   : > { %7866 = vpow2.f32 %v5348_v30  ;;  %v5338_v20 = vsub.f32 %v5166_v25, %v5324_v32 }
0x228f   : > { %v9569_v33 = vpop.eup %7862  ;;  %v5350_v29 = vmul.f32 1.442695, %v5338_v20 }
0x2290   : > { %v5327_v37 = vpop.xlane.xlu0 %5326  ;;  %v5361_v31 = vsel %vm1088_vm4, %v9569_v33, 0.0 }
0x2291   : > { %7868 = vpow2.f32 %v5350_v29  ;;  %v5339_v34 = vsub.f32 %v5212_v49, %v5327_v37  ;;  %5362 = vadd.xlane.f32.xlu0 %v5361_v31 }
0x2293   : > { %v9573_v10 = vpop.eup %7864  ;;  %v5352_v5 = vmul.f32 1.442695, %v5339_v34 }
0x2294   : > { %v5330_v18 = vpop.xlane.xlu1 %5329  ;;  %v5364_v46 = vsel %vm1088_vm4, %v9573_v10, 0.0 }
0x2295   : > { %7870 = vpow2.f32 %v5352_v5  ;;  %v5340_v42 = vsub.f32 %v5258_v27, %v5330_v18  ;;  %5365 = vadd.xlane.f32.xlu1 %v5364_v46 }
0x2297   : > { %v9577_v44 = vpop.eup %7866  ;;  %v5354_v61 = vmul.f32 1.442695, %v5340_v42 }
0x2298   : > { %v4914_v21 = vpop.permute.xlu1 %4913  ;;  %v5333_v41 = vpop.xlane.xlu0 %5332  ;;  %v5367_v24 = vsel %vm1088_vm4, %v9577_v44, 0.0 }
0x2299   : > { %7872 = vpow2.f32 %v5354_v61  ;;  %v4935_v57 = vpack.c.bf16 %v4914_v21, %v4914_v21  ;;  %v5341_v25 = vsub.f32 %v5304_v58, %v5333_v41  ;;  %5368 = vadd.xlane.f32.xlu0 %v5367_v24  ;;  %v7735_v61 = vld [vmem:[%s9909_s3 + $0x8] sm:$0xff]  }
0x229b   : > { %v9581_v48 = vpop.eup %7868  ;;  %v5456_v4 = vsel %vm1333_vm5, %v4935_v57, 0  ;;  %v5356_v40 = vmul.f32 1.442695, %v5341_v25 }
0x229c   : > { %7338 = vmatpush3.bf16.msra.mxu0 %v5456_v4  ;;  %v5370_v39 = vsel %vm1088_vm4, %v9581_v48, 0.0  ;;  %v4920_v56 = vpop.permute.xlu1 %4919  ;;  %v4917_v53 = vpop.permute.xlu0 %4916 }
0x229d   : > { %7874 = vpow2.f32 %v5356_v40  ;;  %5371 = vadd.xlane.f32.xlu1 %v5370_v39  ;;  %7349 = vmatprep.subr.bf16.mxu0 %v8166_v9  ;;  %v4936_v59 = vpack.c.bf16 %v4917_v53, %v4917_v53 }
0x229f   : > { %v9587_v49 = vpop.eup %7870  ;;  %v5502_v63 = vsel %vm1333_vm5, %v4936_v59, 0 }
0x22a0   : > { %v5373_v52 = vsel %vm1088_vm4, %v9587_v49, 0.0  ;;  %v4923_v8 = vpop.permute.xlu1 %4922 }
0x22a1   : > { %5374 = vadd.xlane.f32.xlu0 %v5373_v52  ;;  %v4938_v22 = vpack.c.bf16 %v4923_v8, %v4923_v8 }
0x22a3   : > { %v9591_v36 = vpop.eup %7872  ;;  %v5594_v20 = vsel %vm1333_vm5, %v4938_v22, 0 }
0x22a4   : > { %v5376_v2 = vsel %vm1088_vm4, %v9591_v36, 0.0 }
0x22a5   : > { %5377 = vadd.xlane.f32.xlu0 %v5376_v2 }
0x22a7   : > { %v9595_v15 = vpop.eup %7874 }
0x22a8   : > { %v5379_v27 = vsel %vm1088_vm4, %v9595_v15, 0.0 }
0x22a9   : > { %5380 = vadd.xlane.f32.xlu0 %v5379_v27 }
0x22ae   : > { %4928 = vrot.lane.b32.xlu1 %v9526_v3, %s8178_s7 }
0x22bf   : > { %4931 = vrot.lane.b32.xlu0 %v9526_v3, %s8179_s11 }
0x22c3   : > { %5832 = vrot.lane.b32.xlu0 %v7735_v61, %s8170_s19 }
0x22d1   : > { %v5360_v55 = vpop.xlane.xlu1 %5359 }
0x22d2   : > { %7876 = vrcp.f32 %v5360_v55 }
0x22d5   : > { %v4926_v3 = vpop.permute.xlu1 %4925 }
0x22dc   : > { %v7877_v58 = vpop.eup %7876 }
0x22dd   : > { %v5390_v19 = vmul.f32 %v7877_v58, %v9563_v35  ;;  %v4937_v35 = vpack.c.bf16 %v4920_v56, %v4920_v56 }
0x22df   : > { %v5398_v1 = vpack.c.bf16 %v5390_v19, %v5390_v19  ;;  %v5548_v14 = vsel %vm1333_vm5, %v4937_v35, 0 }
0x22e1   : > { %7334 = vmatmul.mubr.msk.bf16.vlgmr.msra.gmra.mrb[128].mxu1 %vm1088_vm4, %v5398_v1 }
0x22e2   : > { %7344 = vmatpush3.bf16.msra.mxu1 %v5502_v63  ;;  %7345 = vmatprep.mubr.msk.bf16.mxu1 %vm8167_vm2, %v8166_v9 }
0x22e3   : > { %7355 = vmatprep.subr.bf16.mxu1 %v8166_v9 }
0x231e   : > { %v5363_v0 = vpop.xlane.xlu0 %5362 }
0x231f   : > { %7878 = vrcp.f32 %v5363_v0 }
0x2322   : > { %v5366_v54 = vpop.xlane.xlu1 %5365 }
0x2323   : > { %7880 = vrcp.f32 %v5366_v54 }
0x2326   : > { %v5369_v12 = vpop.xlane.xlu0 %5368 }
0x2327   : > { %7882 = vrcp.f32 %v5369_v12 }
0x2329   : > { %v7879_v50 = vpop.eup %7878 }
0x232a   : > { %v5391_v6 = vmul.f32 %v7879_v50, %v9569_v33  ;;  %v5372_v7 = vpop.xlane.xlu1 %5371  ;;  %v4939_v33 = vpack.c.bf16 %v4926_v3, %v4926_v3 }
0x232b   : > { %7884 = vrcp.f32 %v5372_v7 }
0x232c   : > { %v5399_v13 = vpack.c.bf16 %v5391_v6, %v5391_v6  ;;  %v5640_v5 = vsel %vm1333_vm5, %v4939_v33, 0 }
0x232d   : > { %v7881_v11 = vpop.eup %7880 }
0x232e   : > { %v5392_v23 = vmul.f32 %v7881_v11, %v9573_v10  ;;  %7340 = vmatmul.mubr.msk.bf16.vlgmr.msra.gmra.mrb[140].mxu0 %vm1088_vm4, %v5399_v13  ;;  %v5375_v26 = vpop.xlane.xlu0 %5374  ;;  %v4929_v31 = vpop.permute.xlu1 %4928 }
0x232f   : > { %7350 = vmatpush3.bf16.msra.mxu0 %v5548_v14  ;;  %7886 = vrcp.f32 %v5375_v26  ;;  %7351 = vmatprep.mubr.msk.bf16.mxu0 %vm8167_vm2, %v8166_v9  ;;  %v4940_v46 = vpack.c.bf16 %v4929_v31, %v4929_v31  ;;  %v7737_v31 = vld [vmem:[%s9909_s3 + $0x18] sm:$0xff]  }
0x2330   : > { %v5400_v30 = vpack.c.bf16 %v5392_v23, %v5392_v23  ;;  %7361 = vmatprep.subr.bf16.mxu0 %v8166_v9 }
0x2331   : > { %v7883_v32 = vpop.eup %7882  ;;  %v5686_v24 = vsel %vm1333_vm5, %v4940_v46, 0 }
0x2332   : > { %v5393_v29 = vmul.f32 %v7883_v32, %v9577_v44  ;;  %7346 = vmatmul.mubr.msk.bf16.vlgmr.msra.gmra.mrb[132].mxu1 %vm1088_vm4, %v5400_v30  ;;  %v5378_v37 = vpop.xlane.xlu0 %5377  ;;  %v7734_v44 = vld [vmem:[%s9909_s3] sm:$0xff]  }
0x2333   : > { %7356 = vmatpush3.bf16.msra.mxu1 %v5594_v20  ;;  %7888 = vrcp.f32 %v5378_v37  ;;  %7357 = vmatprep.mubr.msk.bf16.mxu1 %vm8167_vm2, %v8166_v9 }
0x2334   : > { %v5401_v34 = vpack.c.bf16 %v5393_v29, %v5393_v29  ;;  %7367 = vmatprep.subr.bf16.mxu1 %v8166_v9  ;;  %5830 = vrot.lane.b32.xlu1 %v7734_v44, %s8170_s19 }
0x2335   : > { %v7885_v10 = vpop.eup %7884 }
0x2336   : > { %v5394_v18 = vmul.f32 %v7885_v10, %v9581_v48  ;;  %7352 = vmatmul.mubr.msk.bf16.vlgmr.msra.gmra.mrb[144].mxu0 %vm1088_vm4, %v5401_v34  ;;  %v5381_v42 = vpop.xlane.xlu0 %5380 }
0x2337   : > { %7362 = vmatpush3.bf16.msra.mxu0 %v5640_v5  ;;  %7890 = vrcp.f32 %v5381_v42  ;;  %7363 = vmatprep.mubr.msk.bf16.mxu0 %vm8167_vm2, %v8166_v9 }
0x2338   : > { %v5402_v21 = vpack.c.bf16 %v5394_v18, %v5394_v18  ;;  %7373 = vmatprep.subr.bf16.mxu0 %v8166_v9 }
0x2339   : > { %v7887_v41 = vpop.eup %7886 }
0x233a   : > { %v5395_v57 = vmul.f32 %v7887_v41, %v9587_v49  ;;  %7358 = vmatmul.mubr.msk.bf16.vlgmr.msra.gmra.mrb[136].mxu1 %vm1088_vm4, %v5402_v21  ;;  %v4932_v25 = vpop.permute.xlu0 %4931 }
0x233b   : > { %7368 = vmatpush3.bf16.msra.mxu1 %v5686_v24  ;;  %v4941_v48 = vpack.c.bf16 %v4932_v25, %v4932_v25  ;;  %7369 = vmatprep.mubr.msk.bf16.mxu1 %vm8167_vm2, %v8166_v9 }
0x233c   : > { %v5403_v4 = vpack.c.bf16 %v5395_v57, %v5395_v57  ;;  %7379 = vmatprep.subr.bf16.mxu1 %v8166_v9 }
0x233d   : > { %v7889_v40 = vpop.eup %7888  ;;  %v5732_v39 = vsel %vm1333_vm5, %v4941_v48, 0 }
0x233e   : > { %v5396_v52 = vmul.f32 %v7889_v40, %v9591_v36  ;;  %7364 = vmatmul.mubr.msk.bf16.vlgmr.msra.gmra.mrb[148].mxu0 %vm1088_vm4, %v5403_v4  ;;  %v7736_v36 = vld [vmem:[%s9909_s3 + $0x10] sm:$0xff]   ;;  %v5833_v55 = vpop.permute.xlu0 %5832 }
0x233f   : > { %7374 = vmatpush3.bf16.msra.mxu0 %v5732_v39  ;;  %7375 = vmatprep.mubr.msk.bf16.mxu0 %vm8167_vm2, %v8166_v9 }
0x2340   : > { %v5404_v49 = vpack.c.bf16 %v5396_v52, %v5396_v52  ;;  %7391 = vmatprep.subr.bf16.mxu0 %v8166_v9  ;;  %5834 = vrot.lane.b32.xlu0 %v7736_v36, %s8170_s19 }
0x2341   : > { %v7891_v2 = vpop.eup %7890 }
0x2342   : > { %v5397_v27 = vmul.f32 %v7891_v2, %v9595_v15  ;;  %7370 = vmatmul.mubr.msk.bf16.vlgmr.msra.gmra.mrb[140].mxu1 %vm1088_vm4, %v5404_v49 }
0x2343   : > { %7387 = vmatprep.mubr.msk.bf16.mxu1 %vm8167_vm2, %v8166_v9 }
0x2344   : > { %v5405_v56 = vpack.c.bf16 %v5397_v27, %v5397_v27 }
0x2346   : > { %7376 = vmatmul.mubr.msk.bf16.vlgmr.msra.gmra.mrb[152].mxu0 %vm1088_vm4, %v5405_v56 }
0x2347   : > { %7399 = vmatprep.mubr.msk.bf16.mxu0 %vm8167_vm2, %v8166_v9 }
0x23a6   : > { %v5831_v8 = vpop.permute.xlu1 %5830 }
0x23a7   : > { %7380 = vmatpush3.bf16.msra.mxu1 %v5831_v8 }
0x23a8   : > { %7381 = vmatprep.subr.bf16.mxu1 %v8166_v9 }
0x23ab   : > { %7382 = vmatpush3.bf16.msra.mxu1 %v5833_v55 }
0x23ac   : > { %7383 = vmatprep.subr.bf16.mxu1 %v8166_v9 }
0x23b2   : > { %v5835_v19 = vpop.permute.xlu0 %5834 }
0x23b3   : > { %7384 = vmatpush3.bf16.msra.mxu1 %v5835_v19 }
0x23b4   : > { %v5446_v15 = vpop.f32.mrb[128].mxu1  ;;  %7385 = vmatprep.subr.bf16.mxu1 %v8166_v9 }
0x23b5   : > { %v7335_v53 = vpop.f32.mrb[129].mxu1 }
0x23b6   : > { %v5449_v58 = vpop.f32.mrb[130].mxu1 }
0x23b7   : > { %v7336_v59 = vpop.f32.mrb[131].mxu1 }
0x2401   : > { %v5492_v1 = vpop.f32.mrb[140].mxu0 }
0x2402   : > { %5775 = vrot.lane.b32.xlu1 %v5492_v1, %s8174_s28  ;;  %v7341_v63 = vpop.f32.mrb[141].mxu0 }
0x2403   : > { %v5495_v3 = vpop.f32.mrb[142].mxu0 }
0x2404   : > { %v7342_v0 = vpop.f32.mrb[143].mxu0 }
0x2405   : > { %v5538_v54 = vpop.f32.mrb[132].mxu1 }
0x2406   : > { %5779 = vrot.lane.b32.xlu0 %v5538_v54, %s8175_s6  ;;  %v7347_v12 = vpop.f32.mrb[133].mxu1 }
0x2407   : > { %v5541_v50 = vpop.f32.mrb[134].mxu1 }
0x2408   : > { %v7348_v35 = vpop.f32.mrb[135].mxu1 }
0x2409   : > { %v5584_v6 = vpop.f32.mrb[144].mxu0 }
0x240a   : > { %5783 = vrot.lane.b32.xlu1 %v5584_v6, %s8176_s16  ;;  %v7353_v7 = vpop.f32.mrb[145].mxu0 }
0x240b   : > { %v5587_v13 = vpop.f32.mrb[146].mxu0 }
0x240c   : > { %v7354_v11 = vpop.f32.mrb[147].mxu0 }
0x240d   : > { %v5630_v14 = vpop.f32.mrb[136].mxu1  ;;  %v5928_v11 = vrot.slane %v9416_v51, %v2350_v28  ;;  %v7742_v28 = vld [vmem:[%s8656_s10] sm:$0xff]   ;;  %v7743_v51 = vld [vmem:[%s8656_s10 + $0x8] sm:$0xff]  }
0x240e   : > { %v7359_v22 = vpop.f32.mrb[137].mxu1  ;;  %5787 = vrot.lane.b32.xlu1 %v5630_v14, %s8173_s27  ;;  %v7738_v14 = vld [vmem:[%s8668_s4] sm:$0xff]  }
0x240f   : > { %v5633_v23 = vpop.f32.mrb[138].mxu1  ;;  %7392 = vmatpush3.bf16.msra.mxu0 %v7738_v14  ;;  %v7739_v22 = vld [vmem:[%s8668_s4 + $0x8] sm:$0xff]  }
0x2410   : > { %v7360_v26 = vpop.f32.mrb[139].mxu1  ;;  %7393 = vmatprep.subr.bf16.mxu0 %v8166_v9  ;;  %v7740_v23 = vld [vmem:[%s8668_s4 + $0x10] sm:$0xff]  }
0x2411   : > { %v5676_v30 = vpop.f32.mrb[148].mxu0  ;;  %v7741_v26 = vld [vmem:[%s8668_s4 + $0x18] sm:$0xff]  }
0x2412   : > { %5791 = vrot.lane.b32.xlu0 %v5676_v30, %s8181_s26  ;;  %v7365_v32 = vpop.f32.mrb[149].mxu0  ;;  %v7744_v30 = vld [vmem:[%s8656_s10 + $0x10] sm:$0xff]  }
0x2413   : > { %v5679_v20 = vpop.f32.mrb[150].mxu0  ;;  %7394 = vmatpush3.bf16.msra.mxu0 %v7739_v22  ;;  %v7745_v32 = vld [vmem:[%s8656_s10 + $0x18] sm:$0xff]  }
0x2414   : > { %v7366_v33 = vpop.f32.mrb[151].mxu0  ;;  %7395 = vmatprep.subr.bf16.mxu0 %v8166_v9  ;;  %v7746_v20 = vld [vmem:[%s8656_s10 + $0x20] sm:$0xff]  }
0x2415   : > { %v5722_v29 = vpop.f32.mrb[140].mxu1  ;;  %v7747_v33 = vld [vmem:[%s8656_s10 + $0x28] sm:$0xff]  }
0x2416   : > { %v7371_v37 = vpop.f32.mrb[141].mxu1  ;;  %5795 = vrot.lane.b32.xlu1 %v5722_v29, %s8180_s2 }
0x2417   : > { %v5725_v34 = vpop.f32.mrb[142].mxu1  ;;  %7396 = vmatpush3.bf16.msra.mxu0 %v7740_v23 }
0x2418   : > { %v7372_v10 = vpop.f32.mrb[143].mxu1  ;;  %7397 = vmatprep.subr.bf16.mxu0 %v8166_v9 }
0x2419   : > { %v5768_v5 = vpop.f32.mrb[152].mxu0 }
0x241a   : > { %5836 = vrot.lane.b32.xlu1 %v7737_v31, %s8170_s19  ;;  %5799 = vrot.lane.b32.xlu0 %v5768_v5, %s8182_s5  ;;  %v7377_v18 = vpop.f32.mrb[153].mxu0 }
0x241b   : > { %v5771_v46 = vpop.f32.mrb[154].mxu0  ;;  %7398 = vmatpush3.bf16.msra.mxu0 %v7741_v26 }
0x241c   : > { %v7378_v42 = vpop.f32.mrb[155].mxu0 }
0x241e   : > { %5843 = vrot.lane.b32.xlu0 %v9518_v38, %s8170_s19 }
0x2474   : > { %v5776_v44 = vpop.permute.xlu1 %5775 }
0x2475   : > { %v5802_v24 = vsel %vm1088_vm4, %v5446_v15, %v5776_v44 }
0x2478   : > { %v5780_v21 = vpop.permute.xlu0 %5779 }
0x2479   : > { %v5803_v57 = vsel %vm1528_vm6, %v5802_v24, %v5780_v21 }
0x247c   : > { %v5784_v61 = vpop.permute.xlu1 %5783 }
0x247d   : > { %v5804_v4 = vsel %vm1530_vm7, %v5803_v57, %v5784_v61 }
0x2480   : > { %v5788_v41 = vpop.permute.xlu1 %5787 }
0x2481   : > { %v5805_v40 = vsel %vm959_vm3, %v5804_v4, %v5788_v41  ;;  %v7906_v4 = vld [vmem:[%s8661_s1 + $0x8] sm:$0xff] }
0x2484   : > { %v5792_v25 = vpop.permute.xlu0 %5791 }
0x2485   : > { %v5806_v39 = vsel %vm4489_vm9, %v5805_v40, %v5792_v25  ;;  %v7748_v25 = vld [vmem:[%s8656_s10 + $0x30] sm:$0xff]   ;;  %v5947_v40 = vrot.slane %v7906_v4, %v945_v17 }
0x2488   : > { %v5796_v48 = vpop.permute.xlu1 %5795 }
0x2489   : > { %v5807_v52 = vsel %vm4491_vm10, %v5806_v39, %v5796_v48  ;;  %v7749_v48 = vld [vmem:[%s8656_s10 + $0x38] sm:$0xff]  }
0x248c   : > { %v5837_v49 = vpop.permute.xlu1 %5836  ;;  %v5800_v38 = vpop.permute.xlu0 %5799 }
0x248d   : > { %v5808_v2 = vsel %vm4493_vm11, %v5807_v52, %v5800_v38  ;;  %7386 = vmatpush3.bf16.msra.mxu1 %v5837_v49 }
0x248e   : > { %v5809_v27 = vpack.c.bf16 %v5808_v2, %v5808_v2  ;;  %7403 = vmatprep.subr.bf16.mxu1 %v8166_v9 }
0x2490   : > { %7388 = vmatmul.mubr.msk.bf16.vlgmr.msra.gmra.mrb[144].mxu1 %vm2445_vm8, %v5809_v27  ;;  %v5844_v56 = vpop.permute.xlu0 %5843 }
0x2491   : > { %7419 = vmatprep.mubr.msk.bf16.mxu1 %vm8167_vm2, %v8166_v9  ;;  %7404 = vmatpush3.bf16.msra.mxu1 %v7742_v28 }
0x2492   : > { %7405 = vmatprep.subr.bf16.mxu1 %v8166_v9 }
0x2495   : > { %7406 = vmatpush3.bf16.msra.mxu1 %v7743_v51 }
0x2496   : > { %7407 = vmatprep.subr.bf16.mxu1 %v8166_v9 }
0x2499   : > { %7408 = vmatpush3.bf16.msra.mxu1 %v7744_v30 }
0x249a   : > { %7409 = vmatprep.subr.bf16.mxu1 %v8166_v9 }
0x249d   : > { %7410 = vmatpush3.bf16.msra.mxu1 %v7745_v32 }
0x249e   : > { %7411 = vmatprep.subr.bf16.mxu1 %v8166_v9 }
0x24a1   : > { %7412 = vmatpush3.bf16.msra.mxu1 %v7746_v20 }
0x24a2   : > { %7413 = vmatprep.subr.bf16.mxu1 %v8166_v9 }
0x24a5   : > { %7414 = vmatpush3.bf16.msra.mxu1 %v7747_v33 }
0x24a6   : > { %7415 = vmatprep.subr.bf16.mxu1 %v8166_v9 }
0x24a9   : > { %7416 = vmatpush3.bf16.msra.mxu1 %v7748_v25 }
0x24aa   : > { %7417 = vmatprep.subr.bf16.mxu1 %v8166_v9 }
0x24ad   : > { %7418 = vmatpush3.bf16.msra.mxu1 %v7749_v48 }
0x2563   : > { %v5883_v36 = vpop.f32.mrb[144].mxu1 }
0x2564   : > { %v5884_v8 = vadd.f32 %v5883_v36, %v5844_v56  ;;  %v7389_v55 = vpop.f32.mrb[145].mxu1  ;;  %v6036_v36 = vrot.slane %v7906_v4, %v1619_v45 }
0x2565   : > { %v5886_v15 = vpop.f32.mrb[146].mxu1 }
0x2566   : > { %v5889_v53 = vadd.f32 %v5884_v8, %v9467_v62  ;;  %v7390_v58 = vpop.f32.mrb[147].mxu1 }
0x2568   : > { %5904 = vrot.lane.b32.xlu1 %v5889_v53, %s8172_s21  ;;  %v5890_v59 = vsel %vm959_vm3, %v5889_v53, 0.0 }
0x258c   : > { %5891 = vadd.xlane.f32.xlu1 %v5890_v59 }
0x25da   : > { %v5905_v19 = vpop.permute.xlu1 %5904 }
0x25db   : > { %v5907_v1 = vsel %vm959_vm3, %v5905_v19, 0.0 }
0x25dc   : > { %5908 = vadd.xlane.f32.xlu0 %v5907_v1 }
0x2619   : > { %v5892_v63 = vpop.xlane.xlu1 %5891 }
0x261a   : > { %v5893_v3 = vmul.f32 0.03125, %v5892_v63 }
0x261c   : > { %v5894_v0 = vsub.f32 %v5889_v53, %v5893_v3 }
0x261e   : > { %v5895_v54 = vmul.f32 %v5894_v0, %v5894_v0 }
0x2620   : > { %v5896_v12 = vsel %vm959_vm3, %v5895_v54, 0.0 }
0x2621   : > { %5897 = vadd.xlane.f32.xlu1 %v5896_v12 }
0x2669   : > { %v5909_v62 = vpop.xlane.xlu0 %5908 }
0x266a   : > { %v5910_v50 = vmul.f32 0.03125, %v5909_v62 }
0x266c   : > { %v5911_v35 = vsub.f32 %v5889_v53, %v5910_v50  ;;  %v4575_v50 = vmul.f32 0.25, %v9340_v43 }
0x266e   : > { %v5912_v6 = vmul.f32 %v5911_v35, %v5911_v35 }
0x2670   : > { %5914 = vrot.lane.b32.xlu0 %v5912_v6, %s8172_s21 }
0x26ae   : > { %v5898_v29 = vpop.xlane.xlu1 %5897 }
0x26af   : > { %v5899_v37 = vmul.f32 0.03125, %v5898_v29 }
0x26b1   : > { %v5900_v31 = vadd.f32 1e-05, %v5899_v37  ;;  %v4583_v37 = vmul.f32 0.25, %v9352_v60 }
0x26b3   : > { %7892 = vrsqrt.f32 %v5900_v31 }
0x26bd   : > { %v7893_v18 = vpop.eup %7892 }
0x26be   : > { %v5902_v42 = vmul.f32 %v7893_v18, %v5894_v0 }
0x26e2   : > { %v5915_v7 = vpop.permute.xlu0 %5914 }
0x26e3   : > { %v5917_v13 = vsel %vm959_vm3, %v5915_v7, 0.0  ;;  %v6667_v7 = vld [vmem:[%s8661_s1 + $0x10] ss:$0 sm:$0xff] }
0x26e4   : > { %5918 = vadd.xlane.f32.xlu1 %v5917_v13 }
0x26f5   : > { %5931 = vrot.lane.b32.xlu1 %v5928_v11, %s8170_s19 }
0x2771   : > { %v5919_v34 = vpop.xlane.xlu1 %5918 }
0x2772   : > { %v5920_v10 = vmul.f32 0.03125, %v5919_v34 }
0x2774   : > { %v5921_v5 = vadd.f32 1e-05, %v5920_v10 }
0x2775   : > { %v5932_v21 = vpop.permute.xlu1 %5931 }
0x2776   : > { %7894 = vrsqrt.f32 %v5921_v5 }
0x2780   : > { %v7895_v46 = vpop.eup %7894 }
0x2781   : > { %v5923_v44 = vmul.f32 %v7895_v46, %v5911_v35 }
0x2783   : > { %v5924_v61 = vsel %vm959_vm3, %v5902_v42, %v5923_v44 }
0x2784   : > { %v5929_v41 = vmul.f32 %v5928_v11, %v5924_v61 }
0x2786   : > { %v5934_v24 = vadd.f32 %v5932_v21, %v5929_v41 }
0x2788   : > { %v5943_v57 = vpack.c.bf16 %v5934_v24, %v5934_v24 }
0x278a   : > { %7400 = vmatmul.mubr.msk.bf16.vlgmr.msra.gmra.mrb[156].mxu0 %vm2445_vm8, %v5943_v57 }
0x285d   : > { %v6009_v39 = vpop.f32.mrb[156].mxu0 }
0x285e   : > { %v6010_v52 = vadd.f32 %v6009_v39, %v5947_v40  ;;  %v7401_v49 = vpop.f32.mrb[157].mxu0 }
0x285f   : > { %v6012_v38 = vpop.f32.mrb[158].mxu0 }
0x2860   : > { %v6015_v2 = vmax.f32 %v6010_v52, 0.0  ;;  %v7402_v27 = vpop.f32.mrb[159].mxu0 }
0x2862   : > { %v6032_v56 = vpack.c.bf16 %v6015_v2, %v6015_v2 }
0x2864   : > { %7420 = vmatmul.mubr.bf16.vlgmr.msra.gmra.mrb[148].mxu1 %v6032_v56 }
0x2937   : > { %v6119_v8 = vpop.f32.mrb[148].mxu1 }
0x2938   : > { %v6120_v55 = vadd.f32 %v6119_v8, %v6036_v36  ;;  %v7421_v9 = vpop.f32.mrb[149].mxu1 }
0x2939   : > { %v6122_v15 = vpop.f32.mrb[150].mxu1 }
0x293a   : > { %v6125_v53 = vadd.f32 %v6120_v55, %v5934_v24  ;;  %v7422_v58 = vpop.f32.mrb[151].mxu1 }
0x293c   : > { %6140 = vrot.lane.b32.xlu0 %v6125_v53, %s8172_s21  ;;  %v6126_v17 = vsel %vm959_vm3, %v6125_v53, 0.0 }
0x293d   : > { %6127 = vadd.xlane.f32.xlu1 %v6126_v17 }
0x29ae   : > { %v6141_v59 = vpop.permute.xlu0 %6140 }
0x29af   : > { %v6143_v19 = vsel %vm959_vm3, %v6141_v59, 0.0 }
0x29b0   : > { %6144 = vadd.xlane.f32.xlu0 %v6143_v19 }
0x29ca   : > { %v6128_v1 = vpop.xlane.xlu1 %6127 }
0x29cb   : > { %v6129_v63 = vmul.f32 0.03125, %v6128_v1 }
0x29cd   : > { %v6130_v16 = vsub.f32 %v6125_v53, %v6129_v63 }
0x29cf   : > { %v6131_v45 = vmul.f32 %v6130_v16, %v6130_v16 }
0x29d1   : > { %v6132_v3 = vsel %vm959_vm3, %v6131_v45, 0.0 }
0x29d2   : > { %6133 = vadd.xlane.f32.xlu1 %v6132_v3 }
0x2a3d   : > { %v6145_v0 = vpop.xlane.xlu0 %6144 }
0x2a3e   : > { %v6146_v54 = vmul.f32 0.03125, %v6145_v0 }
0x2a40   : > { %v6147_v12 = vsub.f32 %v6125_v53, %v6146_v54 }
0x2a42   : > { %v6148_v62 = vmul.f32 %v6147_v12, %v6147_v12 }
0x2a44   : > { %6150 = vrot.lane.b32.xlu0 %v6148_v62, %s8172_s21 }
0x2a48   : > { %6178 = vrot.lane.b32.xlu0 %v4575_v50, %s8172_s21 }
0x2a5f   : > { %v6134_v13 = vpop.xlane.xlu1 %6133 }
0x2a60   : > { %v6135_v11 = vmul.f32 0.03125, %v6134_v13 }
0x2a62   : > { %v6136_v14 = vadd.f32 1e-05, %v6135_v11 }
0x2a64   : > { %7896 = vrsqrt.f32 %v6136_v14 }
0x2a6e   : > { %v7897_v28 = vpop.eup %7896 }
0x2a6f   : > { %v6138_v43 = vmul.f32 %v7897_v28, %v6130_v16 }
0x2ab6   : > { %v6151_v35 = vpop.permute.xlu0 %6150 }
0x2ab7   : > { %v6153_v6 = vsel %vm959_vm3, %v6151_v35, 0.0 }
0x2ab8   : > { %6154 = vadd.xlane.f32.xlu1 %v6153_v6 }
0x2aba   : > { %v6179_v31 = vpop.permute.xlu0 %6178 }
0x2ac9   : > { %6167 = vrot.lane.b32.xlu1 %v6667_v7, %s8170_s19 }
0x2b45   : > { %v6155_v22 = vpop.xlane.xlu1 %6154 }
0x2b46   : > { %v6156_v23 = vmul.f32 0.03125, %v6155_v22 }
0x2b48   : > { %v6157_v26 = vadd.f32 1e-05, %v6156_v23 }
0x2b49   : > { %v6168_v20 = vpop.permute.xlu1 %6167 }
0x2b4a   : > { %7898 = vrsqrt.f32 %v6157_v26 }
0x2b54   : > { %v7899_v51 = vpop.eup %7898 }
0x2b55   : > { %v6159_v30 = vmul.f32 %v7899_v51, %v6147_v12 }
0x2b57   : > { %v6160_v32 = vsel %vm959_vm3, %v6138_v43, %v6159_v30 }
0x2b58   : > { %v6165_v33 = vmul.f32 %v6667_v7, %v6160_v32 }
0x2b5a   : > { %v6170_v29 = vadd.f32 %v6168_v20, %v6165_v33 }
0x2b5c   : > { %6172 = vst.msk [vmem:[#allocation3] sm:$0xff] %vm2445_vm8, %v6170_v29  ;;  %6174 = vrot.lane.b32.xlu0 %v6170_v29, %s8173_s27 }
0x2b60   : > { %6182 = vrot.lane.b32.xlu0 %v4583_v37, %s8171_s15 }
0x2bce   : > { %v6175_v34 = vpop.permute.xlu0 %6174 }
0x2bcf   : > { %v6185_v10 = vsel %vm959_vm3, %v9445_v47, %v6175_v34 }
0x2bd0   : > { %v6187_v5 = vsel %vm6186_vm12, %v6185_v10, %v6179_v31 }
0x2bd2   : > { %v6183_v18 = vpop.permute.xlu0 %6182 }
0x2bd3   : > { %v6189_v46 = vsel %vm6188_vm13, %v6187_v5, %v6183_v18 }
0x2bd4   : > { %6190 = vst [vmem:[%s8666_s0] sm:$0xff] %v6189_v46 }
0x2bd5 PF: > { %s9910_s1 = sld [smem:[#allocation24_spill]]  ;;  %s9911_s21 = sld [smem:[#allocation16_spill]] }
0x2bd6   : > { %s9912_s22 = sld [smem:[#allocation17_spill]]  ;;  %s9914_s24 = sld [smem:[#allocation18_spill]] }
0x2bd7   : > { %s9913_s23 = sld [smem:[#allocation28_spill]]  ;;  %s9915_s25 = sld [smem:[#allocation19_spill]] }
0x2bd8   : > { %s9916_s26 = sld [smem:[#allocation29_spill]]  ;;  %s9917_s27 = sld [smem:[#allocation22_spill]] }
0x2bd9   : > { %s9918_s28 = sld [smem:[#allocation23_spill]]  ;;  %s9919_s29 = sld [smem:[#allocation25_spill]] }
0x2bda   : > { %s9920_s30 = sld [smem:[#allocation27_spill]] }
0x2bdb   : > { %s35_s0 = sadd.s32 1, %s9910_s1  }
0x2bdc   : > { %p32_p0 = scmp.ge.s32.totalorder %s35_s0, 6  }
0x2bde   :  { %34 = sbr.rel (!%p32_p0) target bundleno = 29 (0x1d), region = 210 }
0x2be5   :  { %6218 = vsyncpa [#allocation6], 1 }
0x2be6   :  { %6220 = vsyncpa [#allocation6 + $0x1], 1 }
0x2be7   :  { %6221 = vsyncpa [#allocation8], 1 }
0x2be8   :  { %6223 = vsyncpa [#allocation8 + $0x1], 1 }
0x2be9   :  { %6224 = vsyncpa [#allocation11], 1 }
0x2bea   :  { %6226 = vsyncpa [#allocation11 + $0x1], 1 }

</bundles_post_ra>
